<compile_context>
chip_gen: v7x
topology: tpu7x:2x2x1
jax: 0.10.0
libtpu: 0.0.40
codegen_flags: <defaults>
</compile_context>

<pallas_src>
import functools

import jax
import jax.numpy as jnp
from jax.experimental import pallas as pl
from jax.experimental.pallas import tpu as pltpu


# ----------------------------- Pallas kernels ------------------------------ #

def _gemm_bn_relu_kernel(a_ref, w_ref, g_ref, b_ref, o_ref, *, phases, eps):
    """(M,K)@(K,phases*C) on the MXU + fused BatchNorm+ReLU epilogue.

    Output channel `c` of the transposed conv shows up in `phases` column
    blocks (one per sub-pixel phase / spatial tap group), so the BN statistics
    are pooled over the phase blocks as well as over the M rows -- exactly the
    (N, H, W) pooling nn.BatchNorm2d does in training mode.  Stats are one-pass
    (sum and sum-of-squares) so y is streamed through the VPU only once.
    """
    y = jnp.dot(a_ref[...], w_ref[...], preferred_element_type=jnp.float32)
    m = y.shape[0]
    c = y.shape[1] // phases
    s1 = jnp.sum(y, axis=0, keepdims=True)            # (1, phases*C)
    s2 = jnp.sum(y * y, axis=0, keepdims=True)
    ps1 = s1[:, 0:c]
    ps2 = s2[:, 0:c]
    for p in range(1, phases):                         # pool the phase blocks
        ps1 = ps1 + s1[:, p * c:(p + 1) * c]
        ps2 = ps2 + s2[:, p * c:(p + 1) * c]
    inv_cnt = 1.0 / float(phases * m)
    mean = ps1 * inv_cnt
    var = jnp.maximum(ps2 * inv_cnt - mean * mean, 0.0)
    scale = g_ref[...] * jax.lax.rsqrt(var + eps)      # (1, C)  (rsqrt -> EUP)
    shift = b_ref[...] - mean * scale
    if phases > 1:                                     # re-expand to (1, phases*C)
        scale = jnp.concatenate([scale] * phases, axis=-1)
        shift = jnp.concatenate([shift] * phases, axis=-1)
    o_ref[...] = jnp.maximum(y * scale + shift, 0.0).astype(o_ref.dtype)


def _gemm_tanh_kernel(a_ref, w_ref, o_ref):
    y = jnp.dot(a_ref[...], w_ref[...], preferred_element_type=jnp.float32)
    o_ref[...] = jnp.tanh(y).astype(o_ref.dtype)


def gemm_bn_relu(cols, w, gamma, beta, *, phases, eps=1e-5):
    """Single-block fused GEMM + BatchNorm(batch stats) + ReLU, bf16 output."""
    M, K = cols.shape
    PC = w.shape[1]
    C = PC // phases
    cost = pl.CostEstimate(
        flops=2 * M * K * PC + 8 * M * PC,
        transcendentals=C,
        bytes_accessed=2 * (M * K + K * PC + M * PC) + 8 * C)
    return pl.pallas_call(
        functools.partial(_gemm_bn_relu_kernel, phases=phases, eps=eps),
        out_shape=jax.ShapeDtypeStruct((M, PC), jnp.bfloat16),
        grid=(1,),
        in_specs=[
            pl.BlockSpec((M, K), lambda i: (0, 0)),
            pl.BlockSpec((K, PC), lambda i: (0, 0)),
            pl.BlockSpec((1, C), lambda i: (0, 0)),
            pl.BlockSpec((1, C), lambda i: (0, 0)),
        ],
        out_specs=pl.BlockSpec((M, PC), lambda i: (0, 0)),
        compiler_params=pltpu.CompilerParams(dimension_semantics=("arbitrary",)),
        cost_estimate=cost,
    )(cols, w, gamma.astype(jnp.float32), beta.astype(jnp.float32))


def gemm_tanh(cols, w, tile_m=1024):
    """GEMM + fused tanh, bf16 output, tiled ('parallel') over M."""
    M, K = cols.shape
    Nout = w.shape[1]
    tm = min(tile_m, M)
    if tm % 16 != 0:                 # keep bf16 sublane packing friendly
        tm = M
    Mp = pl.cdiv(M, tm) * tm
    if Mp != M:
        cols = jnp.pad(cols, ((0, Mp - M), (0, 0)))
    cost = pl.CostEstimate(
        flops=2 * Mp * K * Nout + 2 * Mp * Nout,
        transcendentals=Mp * Nout,
        bytes_accessed=2 * (Mp * K + K * Nout + Mp * Nout))
    out = pl.pallas_call(
        _gemm_tanh_kernel,
        out_shape=jax.ShapeDtypeStruct((Mp, Nout), jnp.bfloat16),
        grid=(Mp // tm,),
        in_specs=[
            pl.BlockSpec((tm, K), lambda i: (i, 0)),
            pl.BlockSpec((K, Nout), lambda i: (0, 0)),
        ],
        out_specs=pl.BlockSpec((tm, Nout), lambda i: (i, 0)),
        compiler_params=pltpu.CompilerParams(dimension_semantics=("parallel",)),
        cost_estimate=cost,
    )(cols, w)
    return out[:M] if Mp != M else out


# --------------------- JAX glue (im2col / phase weights) ------------------- #

# ConvTranspose2d(stride=2, k=4, pad=1): output pixel (2y+py, 2x+px) only
# touches a 2x2 subset of the 4x4 kernel taps and a 2x2 input neighbourhood:
#   phase 0: (dy=-1, kh=3), (dy=0, kh=1);   phase 1: (dy=0, kh=2), (dy=+1, kh=0)
_PHASE_TAPS = {0: ((0, 3), (1, 1)),   # (dy+1, kh) pairs
               1: ((1, 2), (2, 0))}


def tconv_s2_phase_weight(w):
    """(Cin,Cout,4,4) ConvTranspose2d weight -> (9*Cin, 4*Cout) phase matrix.

    Rows ordered (dy+1, dx+1, ci) to match `neighborhood_cols`; columns ordered
    (py, px, co) to match `depth_to_space`.  Unused taps are zero.
    """
    cin, cout = w.shape[0], w.shape[1]
    wp = jnp.zeros((3, 3, cin, 2, 2, cout), w.dtype)
    for py, ytaps in _PHASE_TAPS.items():
        for px, xtaps in _PHASE_TAPS.items():
            for dyi, kh in ytaps:
                for dxi, kw in xtaps:
                    wp = wp.at[dyi, dxi, :, py, px, :].set(w[:, :, kh, kw])
    return wp.reshape(9 * cin, 4 * cout)


def neighborhood_cols(x_nhwc):
    """3x3-neighbourhood im2col: (N,H,W,C) -> (N*H*W, 9*C) (zero borders)."""
    n, h, w, c = x_nhwc.shape
    xp = jnp.pad(x_nhwc, ((0, 0), (1, 1), (1, 1), (0, 0)))
    patches = [xp[:, dy:dy + h, dx:dx + w, :] for dy in range(3) for dx in range(3)]
    return jnp.concatenate(patches, axis=-1).reshape(n * h * w, 9 * c)


def depth_to_space(y, n, h, w, c):
    """(N*H*W, 4*C) phase-major GEMM output -> (N, 2H, 2W, C) NHWC."""
    y = y.reshape(n, h, w, 2, 2, c)
    y = jnp.transpose(y, (0, 1, 3, 2, 4, 5))
    return y.reshape(n, 2 * h, 2 * w, c)


def generator_forward(x_nchw, p):
    """Pallas forward: 5 MXU kernels with fused BN+ReLU / tanh epilogues."""
    n = x_nchw.shape[0]
    nz, c1 = p["w1"].shape[0], p["w1"].shape[1]

    # tconv1 (1x1 input, stride 1, pad 0): out[n,oy,ox,co] = sum_ci x[n,ci]*w[ci,co,oy,ox]
    x0 = x_nchw.reshape(n, nz).astype(jnp.bfloat16)
    w1 = jnp.transpose(p["w1"], (0, 2, 3, 1)).reshape(nz, 16 * c1).astype(jnp.bfloat16)
    y = gemm_bn_relu(x0, w1, p["g1"].reshape(1, -1), p["b1"].reshape(1, -1), phases=16)
    a = y.reshape(n, 4, 4, c1)                                       # NHWC, bf16

    # tconv2-4 (stride 2, k=4, pad 1) + BN + ReLU via sub-pixel phase GEMMs
    for wk, gk, bk in (("w2", "g2", "b2"), ("w3", "g3", "b3"), ("w4", "g4", "b4")):
        w = p[wk]
        _, h, wd, _ = a.shape
        cols = neighborhood_cols(a)
        wp = tconv_s2_phase_weight(w).astype(jnp.bfloat16)
        y = gemm_bn_relu(cols, wp, p[gk].reshape(1, -1), p[bk].reshape(1, -1), phases=4)
        a = depth_to_space(y, n, h, wd, w.shape[1])

    # tconv5 (stride 2) + tanh
    _, h, wd, _ = a.shape
    cols = neighborhood_cols(a)
    wp = tconv_s2_phase_weight(p["w5"]).astype(jnp.bfloat16)
    y = gemm_tanh(cols, wp)
    a = depth_to_space(y, n, h, wd, p["w5"].shape[1])
    return jnp.transpose(a, (0, 3, 1, 2)).astype(jnp.float32)        # NHWC -> NCHW


# ----------------------- pure-JAX reference (validation) ------------------- #
# Independent lowering (zero-upsample + flipped-kernel im2col) of the same
# math and dtype policy -- cross-checks the phase decomposition above.

def _upsampled_cols(x_nhwc, k, stride, padding):
    n, h, w, cin = x_nhwc.shape
    if stride > 1:
        hu, wu = (h - 1) * stride + 1, (w - 1) * stride + 1
        up = jnp.zeros((n, hu, wu, cin), x_nhwc.dtype)
        up = up.at[:, ::stride, ::stride, :].set(x_nhwc)
    else:
        up = x_nhwc
    pad = k - 1 - padding
    up = jnp.pad(up, ((0, 0), (pad, pad), (pad, pad), (0, 0)))
    ho = (h - 1) * stride - 2 * padding + k
    wo = (w - 1) * stride - 2 * padding + k
    patches = [up[:, i:i + ho, j:j + wo, :] for i in range(k) for j in range(k)]
    cols = jnp.concatenate(patches, axis=-1)
    return cols.reshape(n * ho * wo, k * k * cin), (n, ho, wo)


def _ref_layer(x_nhwc, w, stride, padding, gamma=None, beta=None, final_tanh=False):
    k, cout = w.shape[2], w.shape[1]
    cols, (n, ho, wo) = _upsampled_cols(x_nhwc.astype(jnp.bfloat16), k, stride, padding)
    wm = jnp.transpose(jnp.flip(w, axis=(2, 3)), (2, 3, 0, 1)).reshape(k * k * w.shape[0], cout)
    y = jnp.dot(cols, wm.astype(jnp.bfloat16), preferred_element_type=jnp.float32)
    if final_tanh:
        y = jnp.tanh(y)
    else:
        mean = y.mean(0, keepdims=True)
        var = jnp.mean(jnp.square(y - mean), 0, keepdims=True)
        y = jnp.maximum((y - mean) * jax.lax.rsqrt(var + 1e-5) * gamma.reshape(1, -1)
                        + beta.reshape(1, -1), 0.0)
    return y.astype(jnp.bfloat16).reshape(n, ho, wo, cout)


def generator_reference(x_nchw, p):
    x = jnp.transpose(x_nchw, (0, 2, 3, 1))
    x = _ref_layer(x, p["w1"], 1, 0, p["g1"], p["b1"])
    x = _ref_layer(x, p["w2"], 2, 1, p["g2"], p["b2"])
    x = _ref_layer(x, p["w3"], 2, 1, p["g3"], p["b3"])
    x = _ref_layer(x, p["w4"], 2, 1, p["g4"], p["b4"])
    x = _ref_layer(x, p["w5"], 2, 1, final_tanh=True)
    return jnp.transpose(x, (0, 3, 1, 2)).astype(jnp.float32)


# --------------------------------- main ------------------------------------ #

if __name__ == "__main__":
    batch, nz, ngf, nc = 2, 16, 8, 3
    key = jax.random.PRNGKey(0)
    k_x, k1, k2, k3, k4, k5 = jax.random.split(key, 6)

    def w_init(k, shape):
        return (0.05 * jax.random.normal(k, shape)).astype(jnp.float32)

    params = {
        # nn.ConvTranspose2d weight layout: (C_in, C_out, kH, kW), bias=False
        "w1": w_init(k1, (nz, ngf * 8, 4, 4)),
        "w2": w_init(k2, (ngf * 8, ngf * 4, 4, 4)),
        "w3": w_init(k3, (ngf * 4, ngf * 2, 4, 4)),
        "w4": w_init(k4, (ngf * 2, ngf, 4, 4)),
        "w5": w_init(k5, (ngf, nc, 4, 4)),
        # BatchNorm2d defaults: weight=1, bias=0
        "g1": jnp.ones((ngf * 8,), jnp.float32), "b1": jnp.zeros((ngf * 8,), jnp.float32),
        "g2": jnp.ones((ngf * 4,), jnp.float32), "b2": jnp.zeros((ngf * 4,), jnp.float32),
        "g3": jnp.ones((ngf * 2,), jnp.float32), "b3": jnp.zeros((ngf * 2,), jnp.float32),
        "g4": jnp.ones((ngf,), jnp.float32), "b4": jnp.zeros((ngf,), jnp.float32),
    }

    x = jax.random.normal(k_x, (batch, nz, 1, 1), dtype=jnp.float32)

    out = jax.block_until_ready(jax.jit(generator_forward)(x, params))
    assert out.shape == (batch, nc, 64, 64), out.shape
    assert bool(jnp.all(jnp.isfinite(out)))

    # cross-check the phase-decomposed Pallas path against an independent
    # (generic upsampled-im2col) pure-JAX lowering of the same math.
    ref = jax.block_until_ready(jax.jit(generator_reference)(x, params))
    assert jnp.allclose(out, ref, rtol=2e-2, atol=2e-2), \
        float(jnp.max(jnp.abs(out - ref)))

    print("KERNEL_OK")
</pallas_src>

<mosaic_0001>
module attributes {stable_mosaic.version = 11 : i64} {
  func.func @_gemm_bn_relu_kernel(%arg0: i32, %arg1: memref<2x16xbf16, #tpu.memory_space<vmem>>, %arg2: memref<16x1024xbf16, #tpu.memory_space<vmem>>, %arg3: memref<1x64xf32, #tpu.memory_space<vmem>>, %arg4: memref<1x64xf32, #tpu.memory_space<vmem>>, %arg5: memref<2x1024xbf16, #tpu.memory_space<vmem>>) attributes {dimension_semantics = [#tpu.dimension_semantics<arbitrary>], iteration_bounds = array<i64: 1>, scalar_prefetch = 0 : i64, scratch_operands = 0 : i64, tpu.core_type = #tpu.core_type<tc>, window_params = [{pipeline_mode = #tpu.pipeline_mode<synchronous>, transform_indices = @transform_0, window_bounds = array<i64: 2, 16>}, {pipeline_mode = #tpu.pipeline_mode<synchronous>, transform_indices = @transform_1, window_bounds = array<i64: 16, 1024>}, {pipeline_mode = #tpu.pipeline_mode<synchronous>, transform_indices = @transform_2, window_bounds = array<i64: 1, 64>}, {pipeline_mode = #tpu.pipeline_mode<synchronous>, transform_indices = @transform_3, window_bounds = array<i64: 1, 64>}, {pipeline_mode = #tpu.pipeline_mode<synchronous>, transform_indices = @transform_4, window_bounds = array<i64: 2, 1024>}]} {
    %c0 = arith.constant 0 : index
    %c0_0 = arith.constant 0 : index
    %0 = vector.load %arg1[%c0, %c0_0] : memref<2x16xbf16, #tpu.memory_space<vmem>>, vector<2x16xbf16>
    %c0_1 = arith.constant 0 : index
    %c0_2 = arith.constant 0 : index
    %1 = vector.load %arg2[%c0_1, %c0_2] : memref<16x1024xbf16, #tpu.memory_space<vmem>>, vector<16x1024xbf16>
    %cst = arith.constant dense<0.000000e+00> : vector<2x1024xf32>
    %2 = tpu.matmul %0, %1, %cst {dimension_numbers = #tpu.dot_dimension_numbers<[1], [0], [0], [1], [0, 0, 1, 1], [], []>} : vector<2x16xbf16>, vector<16x1024xbf16>, vector<2x1024xf32> -> vector<2x1024xf32>
    %cst_3 = arith.constant dense<0.000000e+00> : vector<1024xf32>
    %3 = vector.multi_reduction <add>, %2, %cst_3 [0] : vector<2x1024xf32> to vector<1024xf32>
    %4 = vector.shape_cast %3 : vector<1024xf32> to vector<1x1024xf32>
    %5 = arith.mulf %2, %2 : vector<2x1024xf32>
    %cst_4 = arith.constant dense<0.000000e+00> : vector<1024xf32>
    %6 = vector.multi_reduction <add>, %5, %cst_4 [0] : vector<2x1024xf32> to vector<1024xf32>
    %7 = vector.shape_cast %6 : vector<1024xf32> to vector<1x1024xf32>
    %8 = vector.extract_strided_slice %4 {offsets = [0, 0], sizes = [1, 64], strides = [1, 1]} : vector<1x1024xf32> to vector<1x64xf32>
    %9 = vector.extract_strided_slice %7 {offsets = [0, 0], sizes = [1, 64], strides = [1, 1]} : vector<1x1024xf32> to vector<1x64xf32>
    %10 = vector.extract_strided_slice %4 {offsets = [0, 64], sizes = [1, 64], strides = [1, 1]} : vector<1x1024xf32> to vector<1x64xf32>
    %11 = arith.addf %8, %10 : vector<1x64xf32>
    %12 = vector.extract_strided_slice %7 {offsets = [0, 64], sizes = [1, 64], strides = [1, 1]} : vector<1x1024xf32> to vector<1x64xf32>
    %13 = arith.addf %9, %12 : vector<1x64xf32>
    %14 = vector.extract_strided_slice %4 {offsets = [0, 128], sizes = [1, 64], strides = [1, 1]} : vector<1x1024xf32> to vector<1x64xf32>
    %15 = arith.addf %11, %14 : vector<1x64xf32>
    %16 = vector.extract_strided_slice %7 {offsets = [0, 128], sizes = [1, 64], strides = [1, 1]} : vector<1x1024xf32> to vector<1x64xf32>
    %17 = arith.addf %13, %16 : vector<1x64xf32>
    %18 = vector.extract_strided_slice %4 {offsets = [0, 192], sizes = [1, 64], strides = [1, 1]} : vector<1x1024xf32> to vector<1x64xf32>
    %19 = arith.addf %15, %18 : vector<1x64xf32>
    %20 = vector.extract_strided_slice %7 {offsets = [0, 192], sizes = [1, 64], strides = [1, 1]} : vector<1x1024xf32> to vector<1x64xf32>
    %21 = arith.addf %17, %20 : vector<1x64xf32>
    %22 = vector.extract_strided_slice %4 {offsets = [0, 256], sizes = [1, 64], strides = [1, 1]} : vector<1x1024xf32> to vector<1x64xf32>
    %23 = arith.addf %19, %22 : vector<1x64xf32>
    %24 = vector.extract_strided_slice %7 {offsets = [0, 256], sizes = [1, 64], strides = [1, 1]} : vector<1x1024xf32> to vector<1x64xf32>
    %25 = arith.addf %21, %24 : vector<1x64xf32>
    %26 = vector.extract_strided_slice %4 {offsets = [0, 320], sizes = [1, 64], strides = [1, 1]} : vector<1x1024xf32> to vector<1x64xf32>
    %27 = arith.addf %23, %26 : vector<1x64xf32>
    %28 = vector.extract_strided_slice %7 {offsets = [0, 320], sizes = [1, 64], strides = [1, 1]} : vector<1x1024xf32> to vector<1x64xf32>
    %29 = arith.addf %25, %28 : vector<1x64xf32>
    %30 = vector.extract_strided_slice %4 {offsets = [0, 384], sizes = [1, 64], strides = [1, 1]} : vector<1x1024xf32> to vector<1x64xf32>
    %31 = arith.addf %27, %30 : vector<1x64xf32>
    %32 = vector.extract_strided_slice %7 {offsets = [0, 384], sizes = [1, 64], strides = [1, 1]} : vector<1x1024xf32> to vector<1x64xf32>
    %33 = arith.addf %29, %32 : vector<1x64xf32>
    %34 = vector.extract_strided_slice %4 {offsets = [0, 448], sizes = [1, 64], strides = [1, 1]} : vector<1x1024xf32> to vector<1x64xf32>
    %35 = arith.addf %31, %34 : vector<1x64xf32>
    %36 = vector.extract_strided_slice %7 {offsets = [0, 448], sizes = [1, 64], strides = [1, 1]} : vector<1x1024xf32> to vector<1x64xf32>
    %37 = arith.addf %33, %36 : vector<1x64xf32>
    %38 = vector.extract_strided_slice %4 {offsets = [0, 512], sizes = [1, 64], strides = [1, 1]} : vector<1x1024xf32> to vector<1x64xf32>
    %39 = arith.addf %35, %38 : vector<1x64xf32>
    %40 = vector.extract_strided_slice %7 {offsets = [0, 512], sizes = [1, 64], strides = [1, 1]} : vector<1x1024xf32> to vector<1x64xf32>
    %41 = arith.addf %37, %40 : vector<1x64xf32>
    %42 = vector.extract_strided_slice %4 {offsets = [0, 576], sizes = [1, 64], strides = [1, 1]} : vector<1x1024xf32> to vector<1x64xf32>
    %43 = arith.addf %39, %42 : vector<1x64xf32>
    %44 = vector.extract_strided_slice %7 {offsets = [0, 576], sizes = [1, 64], strides = [1, 1]} : vector<1x1024xf32> to vector<1x64xf32>
    %45 = arith.addf %41, %44 : vector<1x64xf32>
    %46 = vector.extract_strided_slice %4 {offsets = [0, 640], sizes = [1, 64], strides = [1, 1]} : vector<1x1024xf32> to vector<1x64xf32>
    %47 = arith.addf %43, %46 : vector<1x64xf32>
    %48 = vector.extract_strided_slice %7 {offsets = [0, 640], sizes = [1, 64], strides = [1, 1]} : vector<1x1024xf32> to vector<1x64xf32>
    %49 = arith.addf %45, %48 : vector<1x64xf32>
    %50 = vector.extract_strided_slice %4 {offsets = [0, 704], sizes = [1, 64], strides = [1, 1]} : vector<1x1024xf32> to vector<1x64xf32>
    %51 = arith.addf %47, %50 : vector<1x64xf32>
    %52 = vector.extract_strided_slice %7 {offsets = [0, 704], sizes = [1, 64], strides = [1, 1]} : vector<1x1024xf32> to vector<1x64xf32>
    %53 = arith.addf %49, %52 : vector<1x64xf32>
    %54 = vector.extract_strided_slice %4 {offsets = [0, 768], sizes = [1, 64], strides = [1, 1]} : vector<1x1024xf32> to vector<1x64xf32>
    %55 = arith.addf %51, %54 : vector<1x64xf32>
    %56 = vector.extract_strided_slice %7 {offsets = [0, 768], sizes = [1, 64], strides = [1, 1]} : vector<1x1024xf32> to vector<1x64xf32>
    %57 = arith.addf %53, %56 : vector<1x64xf32>
    %58 = vector.extract_strided_slice %4 {offsets = [0, 832], sizes = [1, 64], strides = [1, 1]} : vector<1x1024xf32> to vector<1x64xf32>
    %59 = arith.addf %55, %58 : vector<1x64xf32>
    %60 = vector.extract_strided_slice %7 {offsets = [0, 832], sizes = [1, 64], strides = [1, 1]} : vector<1x1024xf32> to vector<1x64xf32>
    %61 = arith.addf %57, %60 : vector<1x64xf32>
    %62 = vector.extract_strided_slice %4 {offsets = [0, 896], sizes = [1, 64], strides = [1, 1]} : vector<1x1024xf32> to vector<1x64xf32>
    %63 = arith.addf %59, %62 : vector<1x64xf32>
    %64 = vector.extract_strided_slice %7 {offsets = [0, 896], sizes = [1, 64], strides = [1, 1]} : vector<1x1024xf32> to vector<1x64xf32>
    %65 = arith.addf %61, %64 : vector<1x64xf32>
    %66 = vector.extract_strided_slice %4 {offsets = [0, 960], sizes = [1, 64], strides = [1, 1]} : vector<1x1024xf32> to vector<1x64xf32>
    %67 = arith.addf %63, %66 : vector<1x64xf32>
    %68 = vector.extract_strided_slice %7 {offsets = [0, 960], sizes = [1, 64], strides = [1, 1]} : vector<1x1024xf32> to vector<1x64xf32>
    %69 = arith.addf %65, %68 : vector<1x64xf32>
    %cst_5 = arith.constant 3.125000e-02 : f32
    %70 = vector.broadcast %cst_5 : f32 to vector<1x64xf32>
    %71 = arith.mulf %67, %70 : vector<1x64xf32>
    %cst_6 = arith.constant 3.125000e-02 : f32
    %72 = vector.broadcast %cst_6 : f32 to vector<1x64xf32>
    %73 = arith.mulf %69, %72 : vector<1x64xf32>
    %74 = arith.mulf %71, %71 : vector<1x64xf32>
    %75 = arith.subf %73, %74 : vector<1x64xf32>
    %cst_7 = arith.constant 0.000000e+00 : f32
    %76 = vector.broadcast %cst_7 : f32 to vector<1x64xf32>
    %77 = arith.maximumf %75, %76 : vector<1x64xf32>
    %c0_8 = arith.constant 0 : index
    %c0_9 = arith.constant 0 : index
    %78 = vector.load %arg3[%c0_8, %c0_9] : memref<1x64xf32, #tpu.memory_space<vmem>>, vector<1x64xf32>
    %cst_10 = arith.constant 9.99999974E-6 : f32
    %79 = vector.broadcast %cst_10 : f32 to vector<1x64xf32>
    %80 = arith.addf %77, %79 : vector<1x64xf32>
    %81 = math.rsqrt %80 : vector<1x64xf32>
    %82 = arith.mulf %78, %81 : vector<1x64xf32>
    %c0_11 = arith.constant 0 : index
    %c0_12 = arith.constant 0 : index
    %83 = vector.load %arg4[%c0_11, %c0_12] : memref<1x64xf32, #tpu.memory_space<vmem>>, vector<1x64xf32>
    %84 = arith.mulf %71, %82 : vector<1x64xf32>
    %85 = arith.subf %83, %84 : vector<1x64xf32>
    %86 = tpu.concatenate %82, %82, %82, %82, %82, %82, %82, %82, %82, %82, %82, %82, %82, %82, %82, %82 in 1 : vector<1x64xf32>, vector<1x64xf32>, vector<1x64xf32>, vector<1x64xf32>, vector<1x64xf32>, vector<1x64xf32>, vector<1x64xf32>, vector<1x64xf32>, vector<1x64xf32>, vector<1x64xf32>, vector<1x64xf32>, vector<1x64xf32>, vector<1x64xf32>, vector<1x64xf32>, vector<1x64xf32>, vector<1x64xf32> -> vector<1x1024xf32>
    %87 = tpu.concatenate %85, %85, %85, %85, %85, %85, %85, %85, %85, %85, %85, %85, %85, %85, %85, %85 in 1 : vector<1x64xf32>, vector<1x64xf32>, vector<1x64xf32>, vector<1x64xf32>, vector<1x64xf32>, vector<1x64xf32>, vector<1x64xf32>, vector<1x64xf32>, vector<1x64xf32>, vector<1x64xf32>, vector<1x64xf32>, vector<1x64xf32>, vector<1x64xf32>, vector<1x64xf32>, vector<1x64xf32>, vector<1x64xf32> -> vector<1x1024xf32>
    %88 = vector.broadcast %86 : vector<1x1024xf32> to vector<2x1024xf32>
    %89 = arith.mulf %2, %88 : vector<2x1024xf32>
    %90 = vector.broadcast %87 : vector<1x1024xf32> to vector<2x1024xf32>
    %91 = arith.addf %89, %90 : vector<2x1024xf32>
    %cst_13 = arith.constant 0.000000e+00 : f32
    %92 = vector.broadcast %cst_13 : f32 to vector<2x1024xf32>
    %93 = arith.maximumf %91, %92 : vector<2x1024xf32>
    %94 = arith.truncf %93 : vector<2x1024xf32> to vector<2x1024xbf16>
    %c0_14 = arith.constant 0 : index
    %c0_15 = arith.constant 0 : index
    %95 = vector.load %arg5[%c0_14, %c0_15] : memref<2x1024xbf16, #tpu.memory_space<vmem>>, vector<2x1024xbf16>
    tpu.vector_store %arg5[%c0_14, %c0_15], %94 {strides = array<i32>} : memref<2x1024xbf16, #tpu.memory_space<vmem>>, vector<2x1024xbf16>,
    return
  }
  func.func @transform_0(%arg0: i32) -> (i32, i32) {
    %c0_i32 = arith.constant 0 : i32
    %c0_i32_0 = arith.constant 0 : i32
    %c0_i32_1 = arith.constant 0 : i32
    return %c0_i32, %c0_i32_0 : i32, i32
  }
  func.func @transform_1(%arg0: i32) -> (i32, i32) {
    %c0_i32 = arith.constant 0 : i32
    %c0_i32_0 = arith.constant 0 : i32
    %c0_i32_1 = arith.constant 0 : i32
    return %c0_i32, %c0_i32_0 : i32, i32
  }
  func.func @transform_2(%arg0: i32) -> (i32, i32) {
    %c0_i32 = arith.constant 0 : i32
    %c0_i32_0 = arith.constant 0 : i32
    %c0_i32_1 = arith.constant 0 : i32
    return %c0_i32, %c0_i32_0 : i32, i32
  }
  func.func @transform_3(%arg0: i32) -> (i32, i32) {
    %c0_i32 = arith.constant 0 : i32
    %c0_i32_0 = arith.constant 0 : i32
    %c0_i32_1 = arith.constant 0 : i32
    return %c0_i32, %c0_i32_0 : i32, i32
  }
  func.func @transform_4(%arg0: i32) -> (i32, i32) {
    %c0_i32 = arith.constant 0 : i32
    %c0_i32_0 = arith.constant 0 : i32
    %c0_i32_1 = arith.constant 0 : i32
    return %c0_i32, %c0_i32_0 : i32, i32
  }
}

module attributes {stable_mosaic.version = 11 : i64} {
  func.func @_gemm_bn_relu_kernel(%arg0: i32, %arg1: memref<32x576xbf16, #tpu.memory_space<vmem>>, %arg2: memref<576x128xbf16, #tpu.memory_space<vmem>>, %arg3: memref<1x32xf32, #tpu.memory_space<vmem>>, %arg4: memref<1x32xf32, #tpu.memory_space<vmem>>, %arg5: memref<32x128xbf16, #tpu.memory_space<vmem>>) attributes {dimension_semantics = [#tpu.dimension_semantics<arbitrary>], iteration_bounds = array<i64: 1>, scalar_prefetch = 0 : i64, scratch_operands = 0 : i64, tpu.core_type = #tpu.core_type<tc>, window_params = [{pipeline_mode = #tpu.pipeline_mode<synchronous>, transform_indices = @transform_0, window_bounds = array<i64: 32, 576>}, {pipeline_mode = #tpu.pipeline_mode<synchronous>, transform_indices = @transform_1, window_bounds = array<i64: 576, 128>}, {pipeline_mode = #tpu.pipeline_mode<synchronous>, transform_indices = @transform_2, window_bounds = array<i64: 1, 32>}, {pipeline_mode = #tpu.pipeline_mode<synchronous>, transform_indices = @transform_3, window_bounds = array<i64: 1, 32>}, {pipeline_mode = #tpu.pipeline_mode<synchronous>, transform_indices = @transform_4, window_bounds = array<i64: 32, 128>}]} {
    %c0 = arith.constant 0 : index
    %c0_0 = arith.constant 0 : index
    %0 = vector.load %arg1[%c0, %c0_0] : memref<32x576xbf16, #tpu.memory_space<vmem>>, vector<32x576xbf16>
    %c0_1 = arith.constant 0 : index
    %c0_2 = arith.constant 0 : index
    %1 = vector.load %arg2[%c0_1, %c0_2] : memref<576x128xbf16, #tpu.memory_space<vmem>>, vector<576x128xbf16>
    %cst = arith.constant dense<0.000000e+00> : vector<32x128xf32>
    %2 = tpu.matmul %0, %1, %cst {dimension_numbers = #tpu.dot_dimension_numbers<[1], [0], [0], [1], [0, 0, 1, 1], [], []>} : vector<32x576xbf16>, vector<576x128xbf16>, vector<32x128xf32> -> vector<32x128xf32>
    %cst_3 = arith.constant dense<0.000000e+00> : vector<128xf32>
    %3 = vector.multi_reduction <add>, %2, %cst_3 [0] : vector<32x128xf32> to vector<128xf32>
    %4 = vector.shape_cast %3 : vector<128xf32> to vector<1x128xf32>
    %5 = arith.mulf %2, %2 : vector<32x128xf32>
    %cst_4 = arith.constant dense<0.000000e+00> : vector<128xf32>
    %6 = vector.multi_reduction <add>, %5, %cst_4 [0] : vector<32x128xf32> to vector<128xf32>
    %7 = vector.shape_cast %6 : vector<128xf32> to vector<1x128xf32>
    %8 = vector.extract_strided_slice %4 {offsets = [0, 0], sizes = [1, 32], strides = [1, 1]} : vector<1x128xf32> to vector<1x32xf32>
    %9 = vector.extract_strided_slice %7 {offsets = [0, 0], sizes = [1, 32], strides = [1, 1]} : vector<1x128xf32> to vector<1x32xf32>
    %10 = vector.extract_strided_slice %4 {offsets = [0, 32], sizes = [1, 32], strides = [1, 1]} : vector<1x128xf32> to vector<1x32xf32>
    %11 = arith.addf %8, %10 : vector<1x32xf32>
    %12 = vector.extract_strided_slice %7 {offsets = [0, 32], sizes = [1, 32], strides = [1, 1]} : vector<1x128xf32> to vector<1x32xf32>
    %13 = arith.addf %9, %12 : vector<1x32xf32>
    %14 = vector.extract_strided_slice %4 {offsets = [0, 64], sizes = [1, 32], strides = [1, 1]} : vector<1x128xf32> to vector<1x32xf32>
    %15 = arith.addf %11, %14 : vector<1x32xf32>
    %16 = vector.extract_strided_slice %7 {offsets = [0, 64], sizes = [1, 32], strides = [1, 1]} : vector<1x128xf32> to vector<1x32xf32>
    %17 = arith.addf %13, %16 : vector<1x32xf32>
    %18 = vector.extract_strided_slice %4 {offsets = [0, 96], sizes = [1, 32], strides = [1, 1]} : vector<1x128xf32> to vector<1x32xf32>
    %19 = arith.addf %15, %18 : vector<1x32xf32>
    %20 = vector.extract_strided_slice %7 {offsets = [0, 96], sizes = [1, 32], strides = [1, 1]} : vector<1x128xf32> to vector<1x32xf32>
    %21 = arith.addf %17, %20 : vector<1x32xf32>
    %cst_5 = arith.constant 7.812500e-03 : f32
    %22 = vector.broadcast %cst_5 : f32 to vector<1x32xf32>
    %23 = arith.mulf %19, %22 : vector<1x32xf32>
    %cst_6 = arith.constant 7.812500e-03 : f32
    %24 = vector.broadcast %cst_6 : f32 to vector<1x32xf32>
    %25 = arith.mulf %21, %24 : vector<1x32xf32>
    %26 = arith.mulf %23, %23 : vector<1x32xf32>
    %27 = arith.subf %25, %26 : vector<1x32xf32>
    %cst_7 = arith.constant 0.000000e+00 : f32
    %28 = vector.broadcast %cst_7 : f32 to vector<1x32xf32>
    %29 = arith.maximumf %27, %28 : vector<1x32xf32>
    %c0_8 = arith.constant 0 : index
    %c0_9 = arith.constant 0 : index
    %30 = vector.load %arg3[%c0_8, %c0_9] : memref<1x32xf32, #tpu.memory_space<vmem>>, vector<1x32xf32>
    %cst_10 = arith.constant 9.99999974E-6 : f32
    %31 = vector.broadcast %cst_10 : f32 to vector<1x32xf32>
    %32 = arith.addf %29, %31 : vector<1x32xf32>
    %33 = math.rsqrt %32 : vector<1x32xf32>
    %34 = arith.mulf %30, %33 : vector<1x32xf32>
    %c0_11 = arith.constant 0 : index
    %c0_12 = arith.constant 0 : index
    %35 = vector.load %arg4[%c0_11, %c0_12] : memref<1x32xf32, #tpu.memory_space<vmem>>, vector<1x32xf32>
    %36 = arith.mulf %23, %34 : vector<1x32xf32>
    %37 = arith.subf %35, %36 : vector<1x32xf32>
    %38 = tpu.concatenate %34, %34, %34, %34 in 1 : vector<1x32xf32>, vector<1x32xf32>, vector<1x32xf32>, vector<1x32xf32> -> vector<1x128xf32>
    %39 = tpu.concatenate %37, %37, %37, %37 in 1 : vector<1x32xf32>, vector<1x32xf32>, vector<1x32xf32>, vector<1x32xf32> -> vector<1x128xf32>
    %40 = vector.broadcast %38 : vector<1x128xf32> to vector<32x128xf32>
    %41 = arith.mulf %2, %40 : vector<32x128xf32>
    %42 = vector.broadcast %39 : vector<1x128xf32> to vector<32x128xf32>
    %43 = arith.addf %41, %42 : vector<32x128xf32>
    %cst_13 = arith.constant 0.000000e+00 : f32
    %44 = vector.broadcast %cst_13 : f32 to vector<32x128xf32>
    %45 = arith.maximumf %43, %44 : vector<32x128xf32>
    %46 = arith.truncf %45 : vector<32x128xf32> to vector<32x128xbf16>
    %c0_14 = arith.constant 0 : index
    %c0_15 = arith.constant 0 : index
    %47 = vector.load %arg5[%c0_14, %c0_15] : memref<32x128xbf16, #tpu.memory_space<vmem>>, vector<32x128xbf16>
    tpu.vector_store %arg5[%c0_14, %c0_15], %46 {strides = array<i32>} : memref<32x128xbf16, #tpu.memory_space<vmem>>, vector<32x128xbf16>,
    return
  }
  func.func @transform_0(%arg0: i32) -> (i32, i32) {
    %c0_i32 = arith.constant 0 : i32
    %c0_i32_0 = arith.constant 0 : i32
    %c0_i32_1 = arith.constant 0 : i32
    return %c0_i32, %c0_i32_0 : i32, i32
  }
  func.func @transform_1(%arg0: i32) -> (i32, i32) {
    %c0_i32 = arith.constant 0 : i32
    %c0_i32_0 = arith.constant 0 : i32
    %c0_i32_1 = arith.constant 0 : i32
    return %c0_i32, %c0_i32_0 : i32, i32
  }
  func.func @transform_2(%arg0: i32) -> (i32, i32) {
    %c0_i32 = arith.constant 0 : i32
    %c0_i32_0 = arith.constant 0 : i32
    %c0_i32_1 = arith.constant 0 : i32
    return %c0_i32, %c0_i32_0 : i32, i32
  }
  func.func @transform_3(%arg0: i32) -> (i32, i32) {
    %c0_i32 = arith.constant 0 : i32
    %c0_i32_0 = arith.constant 0 : i32
    %c0_i32_1 = arith.constant 0 : i32
    return %c0_i32, %c0_i32_0 : i32, i32
  }
  func.func @transform_4(%arg0: i32) -> (i32, i32) {
    %c0_i32 = arith.constant 0 : i32
    %c0_i32_0 = arith.constant 0 : i32
    %c0_i32_1 = arith.constant 0 : i32
    return %c0_i32, %c0_i32_0 : i32, i32
  }
}

module attributes {stable_mosaic.version = 11 : i64} {
  func.func @_gemm_bn_relu_kernel(%arg0: i32, %arg1: memref<128x288xbf16, #tpu.memory_space<vmem>>, %arg2: memref<288x64xbf16, #tpu.memory_space<vmem>>, %arg3: memref<1x16xf32, #tpu.memory_space<vmem>>, %arg4: memref<1x16xf32, #tpu.memory_space<vmem>>, %arg5: memref<128x64xbf16, #tpu.memory_space<vmem>>) attributes {dimension_semantics = [#tpu.dimension_semantics<arbitrary>], iteration_bounds = array<i64: 1>, scalar_prefetch = 0 : i64, scratch_operands = 0 : i64, tpu.core_type = #tpu.core_type<tc>, window_params = [{pipeline_mode = #tpu.pipeline_mode<synchronous>, transform_indices = @transform_0, window_bounds = array<i64: 128, 288>}, {pipeline_mode = #tpu.pipeline_mode<synchronous>, transform_indices = @transform_1, window_bounds = array<i64: 288, 64>}, {pipeline_mode = #tpu.pipeline_mode<synchronous>, transform_indices = @transform_2, window_bounds = array<i64: 1, 16>}, {pipeline_mode = #tpu.pipeline_mode<synchronous>, transform_indices = @transform_3, window_bounds = array<i64: 1, 16>}, {pipeline_mode = #tpu.pipeline_mode<synchronous>, transform_indices = @transform_4, window_bounds = array<i64: 128, 64>}]} {
    %c0 = arith.constant 0 : index
    %c0_0 = arith.constant 0 : index
    %0 = vector.load %arg1[%c0, %c0_0] : memref<128x288xbf16, #tpu.memory_space<vmem>>, vector<128x288xbf16>
    %c0_1 = arith.constant 0 : index
    %c0_2 = arith.constant 0 : index
    %1 = vector.load %arg2[%c0_1, %c0_2] : memref<288x64xbf16, #tpu.memory_space<vmem>>, vector<288x64xbf16>
    %cst = arith.constant dense<0.000000e+00> : vector<128x64xf32>
    %2 = tpu.matmul %0, %1, %cst {dimension_numbers = #tpu.dot_dimension_numbers<[1], [0], [0], [1], [0, 0, 1, 1], [], []>} : vector<128x288xbf16>, vector<288x64xbf16>, vector<128x64xf32> -> vector<128x64xf32>
    %cst_3 = arith.constant dense<0.000000e+00> : vector<64xf32>
    %3 = vector.multi_reduction <add>, %2, %cst_3 [0] : vector<128x64xf32> to vector<64xf32>
    %4 = vector.shape_cast %3 : vector<64xf32> to vector<1x64xf32>
    %5 = arith.mulf %2, %2 : vector<128x64xf32>
    %cst_4 = arith.constant dense<0.000000e+00> : vector<64xf32>
    %6 = vector.multi_reduction <add>, %5, %cst_4 [0] : vector<128x64xf32> to vector<64xf32>
    %7 = vector.shape_cast %6 : vector<64xf32> to vector<1x64xf32>
    %8 = vector.extract_strided_slice %4 {offsets = [0, 0], sizes = [1, 16], strides = [1, 1]} : vector<1x64xf32> to vector<1x16xf32>
    %9 = vector.extract_strided_slice %7 {offsets = [0, 0], sizes = [1, 16], strides = [1, 1]} : vector<1x64xf32> to vector<1x16xf32>
    %10 = vector.extract_strided_slice %4 {offsets = [0, 16], sizes = [1, 16], strides = [1, 1]} : vector<1x64xf32> to vector<1x16xf32>
    %11 = arith.addf %8, %10 : vector<1x16xf32>
    %12 = vector.extract_strided_slice %7 {offsets = [0, 16], sizes = [1, 16], strides = [1, 1]} : vector<1x64xf32> to vector<1x16xf32>
    %13 = arith.addf %9, %12 : vector<1x16xf32>
    %14 = vector.extract_strided_slice %4 {offsets = [0, 32], sizes = [1, 16], strides = [1, 1]} : vector<1x64xf32> to vector<1x16xf32>
    %15 = arith.addf %11, %14 : vector<1x16xf32>
    %16 = vector.extract_strided_slice %7 {offsets = [0, 32], sizes = [1, 16], strides = [1, 1]} : vector<1x64xf32> to vector<1x16xf32>
    %17 = arith.addf %13, %16 : vector<1x16xf32>
    %18 = vector.extract_strided_slice %4 {offsets = [0, 48], sizes = [1, 16], strides = [1, 1]} : vector<1x64xf32> to vector<1x16xf32>
    %19 = arith.addf %15, %18 : vector<1x16xf32>
    %20 = vector.extract_strided_slice %7 {offsets = [0, 48], sizes = [1, 16], strides = [1, 1]} : vector<1x64xf32> to vector<1x16xf32>
    %21 = arith.addf %17, %20 : vector<1x16xf32>
    %cst_5 = arith.constant 0.001953125 : f32
    %22 = vector.broadcast %cst_5 : f32 to vector<1x16xf32>
    %23 = arith.mulf %19, %22 : vector<1x16xf32>
    %cst_6 = arith.constant 0.001953125 : f32
    %24 = vector.broadcast %cst_6 : f32 to vector<1x16xf32>
    %25 = arith.mulf %21, %24 : vector<1x16xf32>
    %26 = arith.mulf %23, %23 : vector<1x16xf32>
    %27 = arith.subf %25, %26 : vector<1x16xf32>
    %cst_7 = arith.constant 0.000000e+00 : f32
    %28 = vector.broadcast %cst_7 : f32 to vector<1x16xf32>
    %29 = arith.maximumf %27, %28 : vector<1x16xf32>
    %c0_8 = arith.constant 0 : index
    %c0_9 = arith.constant 0 : index
    %30 = vector.load %arg3[%c0_8, %c0_9] : memref<1x16xf32, #tpu.memory_space<vmem>>, vector<1x16xf32>
    %cst_10 = arith.constant 9.99999974E-6 : f32
    %31 = vector.broadcast %cst_10 : f32 to vector<1x16xf32>
    %32 = arith.addf %29, %31 : vector<1x16xf32>
    %33 = math.rsqrt %32 : vector<1x16xf32>
    %34 = arith.mulf %30, %33 : vector<1x16xf32>
    %c0_11 = arith.constant 0 : index
    %c0_12 = arith.constant 0 : index
    %35 = vector.load %arg4[%c0_11, %c0_12] : memref<1x16xf32, #tpu.memory_space<vmem>>, vector<1x16xf32>
    %36 = arith.mulf %23, %34 : vector<1x16xf32>
    %37 = arith.subf %35, %36 : vector<1x16xf32>
    %38 = tpu.concatenate %34, %34, %34, %34 in 1 : vector<1x16xf32>, vector<1x16xf32>, vector<1x16xf32>, vector<1x16xf32> -> vector<1x64xf32>
    %39 = tpu.concatenate %37, %37, %37, %37 in 1 : vector<1x16xf32>, vector<1x16xf32>, vector<1x16xf32>, vector<1x16xf32> -> vector<1x64xf32>
    %40 = vector.broadcast %38 : vector<1x64xf32> to vector<128x64xf32>
    %41 = arith.mulf %2, %40 : vector<128x64xf32>
    %42 = vector.broadcast %39 : vector<1x64xf32> to vector<128x64xf32>
    %43 = arith.addf %41, %42 : vector<128x64xf32>
    %cst_13 = arith.constant 0.000000e+00 : f32
    %44 = vector.broadcast %cst_13 : f32 to vector<128x64xf32>
    %45 = arith.maximumf %43, %44 : vector<128x64xf32>
    %46 = arith.truncf %45 : vector<128x64xf32> to vector<128x64xbf16>
    %c0_14 = arith.constant 0 : index
    %c0_15 = arith.constant 0 : index
    %47 = vector.load %arg5[%c0_14, %c0_15] : memref<128x64xbf16, #tpu.memory_space<vmem>>, vector<128x64xbf16>
    tpu.vector_store %arg5[%c0_14, %c0_15], %46 {strides = array<i32>} : memref<128x64xbf16, #tpu.memory_space<vmem>>, vector<128x64xbf16>,
    return
  }
  func.func @transform_0(%arg0: i32) -> (i32, i32) {
    %c0_i32 = arith.constant 0 : i32
    %c0_i32_0 = arith.constant 0 : i32
    %c0_i32_1 = arith.constant 0 : i32
    return %c0_i32, %c0_i32_0 : i32, i32
  }
  func.func @transform_1(%arg0: i32) -> (i32, i32) {
    %c0_i32 = arith.constant 0 : i32
    %c0_i32_0 = arith.constant 0 : i32
    %c0_i32_1 = arith.constant 0 : i32
    return %c0_i32, %c0_i32_0 : i32, i32
  }
  func.func @transform_2(%arg0: i32) -> (i32, i32) {
    %c0_i32 = arith.constant 0 : i32
    %c0_i32_0 = arith.constant 0 : i32
    %c0_i32_1 = arith.constant 0 : i32
    return %c0_i32, %c0_i32_0 : i32, i32
  }
  func.func @transform_3(%arg0: i32) -> (i32, i32) {
    %c0_i32 = arith.constant 0 : i32
    %c0_i32_0 = arith.constant 0 : i32
    %c0_i32_1 = arith.constant 0 : i32
    return %c0_i32, %c0_i32_0 : i32, i32
  }
  func.func @transform_4(%arg0: i32) -> (i32, i32) {
    %c0_i32 = arith.constant 0 : i32
    %c0_i32_0 = arith.constant 0 : i32
    %c0_i32_1 = arith.constant 0 : i32
    return %c0_i32, %c0_i32_0 : i32, i32
  }
}

module attributes {stable_mosaic.version = 11 : i64} {
  func.func @_gemm_bn_relu_kernel(%arg0: i32, %arg1: memref<512x144xbf16, #tpu.memory_space<vmem>>, %arg2: memref<144x32xbf16, #tpu.memory_space<vmem>>, %arg3: memref<1x8xf32, #tpu.memory_space<vmem>>, %arg4: memref<1x8xf32, #tpu.memory_space<vmem>>, %arg5: memref<512x32xbf16, #tpu.memory_space<vmem>>) attributes {dimension_semantics = [#tpu.dimension_semantics<arbitrary>], iteration_bounds = array<i64: 1>, scalar_prefetch = 0 : i64, scratch_operands = 0 : i64, tpu.core_type = #tpu.core_type<tc>, window_params = [{pipeline_mode = #tpu.pipeline_mode<synchronous>, transform_indices = @transform_0, window_bounds = array<i64: 512, 144>}, {pipeline_mode = #tpu.pipeline_mode<synchronous>, transform_indices = @transform_1, window_bounds = array<i64: 144, 32>}, {pipeline_mode = #tpu.pipeline_mode<synchronous>, transform_indices = @transform_2, window_bounds = array<i64: 1, 8>}, {pipeline_mode = #tpu.pipeline_mode<synchronous>, transform_indices = @transform_3, window_bounds = array<i64: 1, 8>}, {pipeline_mode = #tpu.pipeline_mode<synchronous>, transform_indices = @transform_4, window_bounds = array<i64: 512, 32>}]} {
    %c0 = arith.constant 0 : index
    %c0_0 = arith.constant 0 : index
    %0 = vector.load %arg1[%c0, %c0_0] : memref<512x144xbf16, #tpu.memory_space<vmem>>, vector<512x144xbf16>
    %c0_1 = arith.constant 0 : index
    %c0_2 = arith.constant 0 : index
    %1 = vector.load %arg2[%c0_1, %c0_2] : memref<144x32xbf16, #tpu.memory_space<vmem>>, vector<144x32xbf16>
    %cst = arith.constant dense<0.000000e+00> : vector<512x32xf32>
    %2 = tpu.matmul %0, %1, %cst {dimension_numbers = #tpu.dot_dimension_numbers<[1], [0], [0], [1], [0, 0, 1, 1], [], []>} : vector<512x144xbf16>, vector<144x32xbf16>, vector<512x32xf32> -> vector<512x32xf32>
    %cst_3 = arith.constant dense<0.000000e+00> : vector<32xf32>
    %3 = vector.multi_reduction <add>, %2, %cst_3 [0] : vector<512x32xf32> to vector<32xf32>
    %4 = vector.shape_cast %3 : vector<32xf32> to vector<1x32xf32>
    %5 = arith.mulf %2, %2 : vector<512x32xf32>
    %cst_4 = arith.constant dense<0.000000e+00> : vector<32xf32>
    %6 = vector.multi_reduction <add>, %5, %cst_4 [0] : vector<512x32xf32> to vector<32xf32>
    %7 = vector.shape_cast %6 : vector<32xf32> to vector<1x32xf32>
    %8 = vector.extract_strided_slice %4 {offsets = [0, 0], sizes = [1, 8], strides = [1, 1]} : vector<1x32xf32> to vector<1x8xf32>
    %9 = vector.extract_strided_slice %7 {offsets = [0, 0], sizes = [1, 8], strides = [1, 1]} : vector<1x32xf32> to vector<1x8xf32>
    %10 = vector.extract_strided_slice %4 {offsets = [0, 8], sizes = [1, 8], strides = [1, 1]} : vector<1x32xf32> to vector<1x8xf32>
    %11 = arith.addf %8, %10 : vector<1x8xf32>
    %12 = vector.extract_strided_slice %7 {offsets = [0, 8], sizes = [1, 8], strides = [1, 1]} : vector<1x32xf32> to vector<1x8xf32>
    %13 = arith.addf %9, %12 : vector<1x8xf32>
    %14 = vector.extract_strided_slice %4 {offsets = [0, 16], sizes = [1, 8], strides = [1, 1]} : vector<1x32xf32> to vector<1x8xf32>
    %15 = arith.addf %11, %14 : vector<1x8xf32>
    %16 = vector.extract_strided_slice %7 {offsets = [0, 16], sizes = [1, 8], strides = [1, 1]} : vector<1x32xf32> to vector<1x8xf32>
    %17 = arith.addf %13, %16 : vector<1x8xf32>
    %18 = vector.extract_strided_slice %4 {offsets = [0, 24], sizes = [1, 8], strides = [1, 1]} : vector<1x32xf32> to vector<1x8xf32>
    %19 = arith.addf %15, %18 : vector<1x8xf32>
    %20 = vector.extract_strided_slice %7 {offsets = [0, 24], sizes = [1, 8], strides = [1, 1]} : vector<1x32xf32> to vector<1x8xf32>
    %21 = arith.addf %17, %20 : vector<1x8xf32>
    %cst_5 = arith.constant 4.8828125E-4 : f32
    %22 = vector.broadcast %cst_5 : f32 to vector<1x8xf32>
    %23 = arith.mulf %19, %22 : vector<1x8xf32>
    %cst_6 = arith.constant 4.8828125E-4 : f32
    %24 = vector.broadcast %cst_6 : f32 to vector<1x8xf32>
    %25 = arith.mulf %21, %24 : vector<1x8xf32>
    %26 = arith.mulf %23, %23 : vector<1x8xf32>
    %27 = arith.subf %25, %26 : vector<1x8xf32>
    %cst_7 = arith.constant 0.000000e+00 : f32
    %28 = vector.broadcast %cst_7 : f32 to vector<1x8xf32>
    %29 = arith.maximumf %27, %28 : vector<1x8xf32>
    %c0_8 = arith.constant 0 : index
    %c0_9 = arith.constant 0 : index
    %30 = vector.load %arg3[%c0_8, %c0_9] : memref<1x8xf32, #tpu.memory_space<vmem>>, vector<1x8xf32>
    %cst_10 = arith.constant 9.99999974E-6 : f32
    %31 = vector.broadcast %cst_10 : f32 to vector<1x8xf32>
    %32 = arith.addf %29, %31 : vector<1x8xf32>
    %33 = math.rsqrt %32 : vector<1x8xf32>
    %34 = arith.mulf %30, %33 : vector<1x8xf32>
    %c0_11 = arith.constant 0 : index
    %c0_12 = arith.constant 0 : index
    %35 = vector.load %arg4[%c0_11, %c0_12] : memref<1x8xf32, #tpu.memory_space<vmem>>, vector<1x8xf32>
    %36 = arith.mulf %23, %34 : vector<1x8xf32>
    %37 = arith.subf %35, %36 : vector<1x8xf32>
    %38 = tpu.concatenate %34, %34, %34, %34 in 1 : vector<1x8xf32>, vector<1x8xf32>, vector<1x8xf32>, vector<1x8xf32> -> vector<1x32xf32>
    %39 = tpu.concatenate %37, %37, %37, %37 in 1 : vector<1x8xf32>, vector<1x8xf32>, vector<1x8xf32>, vector<1x8xf32> -> vector<1x32xf32>
    %40 = vector.broadcast %38 : vector<1x32xf32> to vector<512x32xf32>
    %41 = arith.mulf %2, %40 : vector<512x32xf32>
    %42 = vector.broadcast %39 : vector<1x32xf32> to vector<512x32xf32>
    %43 = arith.addf %41, %42 : vector<512x32xf32>
    %cst_13 = arith.constant 0.000000e+00 : f32
    %44 = vector.broadcast %cst_13 : f32 to vector<512x32xf32>
    %45 = arith.maximumf %43, %44 : vector<512x32xf32>
    %46 = arith.truncf %45 : vector<512x32xf32> to vector<512x32xbf16>
    %c0_14 = arith.constant 0 : index
    %c0_15 = arith.constant 0 : index
    %47 = vector.load %arg5[%c0_14, %c0_15] : memref<512x32xbf16, #tpu.memory_space<vmem>>, vector<512x32xbf16>
    tpu.vector_store %arg5[%c0_14, %c0_15], %46 {strides = array<i32>} : memref<512x32xbf16, #tpu.memory_space<vmem>>, vector<512x32xbf16>,
    return
  }
  func.func @transform_0(%arg0: i32) -> (i32, i32) {
    %c0_i32 = arith.constant 0 : i32
    %c0_i32_0 = arith.constant 0 : i32
    %c0_i32_1 = arith.constant 0 : i32
    return %c0_i32, %c0_i32_0 : i32, i32
  }
  func.func @transform_1(%arg0: i32) -> (i32, i32) {
    %c0_i32 = arith.constant 0 : i32
    %c0_i32_0 = arith.constant 0 : i32
    %c0_i32_1 = arith.constant 0 : i32
    return %c0_i32, %c0_i32_0 : i32, i32
  }
  func.func @transform_2(%arg0: i32) -> (i32, i32) {
    %c0_i32 = arith.constant 0 : i32
    %c0_i32_0 = arith.constant 0 : i32
    %c0_i32_1 = arith.constant 0 : i32
    return %c0_i32, %c0_i32_0 : i32, i32
  }
  func.func @transform_3(%arg0: i32) -> (i32, i32) {
    %c0_i32 = arith.constant 0 : i32
    %c0_i32_0 = arith.constant 0 : i32
    %c0_i32_1 = arith.constant 0 : i32
    return %c0_i32, %c0_i32_0 : i32, i32
  }
  func.func @transform_4(%arg0: i32) -> (i32, i32) {
    %c0_i32 = arith.constant 0 : i32
    %c0_i32_0 = arith.constant 0 : i32
    %c0_i32_1 = arith.constant 0 : i32
    return %c0_i32, %c0_i32_0 : i32, i32
  }
}

module attributes {stable_mosaic.version = 11 : i64} {
  func.func @_gemm_tanh_kernel(%arg0: i32, %arg1: memref<1024x72xbf16, #tpu.memory_space<vmem>>, %arg2: memref<72x12xbf16, #tpu.memory_space<vmem>>, %arg3: memref<1024x12xbf16, #tpu.memory_space<vmem>>) attributes {dimension_semantics = [#tpu.dimension_semantics<parallel>], iteration_bounds = array<i64: 2>, scalar_prefetch = 0 : i64, scratch_operands = 0 : i64, tpu.core_type = #tpu.core_type<tc>, window_params = [{transform_indices = @transform_0, window_bounds = array<i64: 1024, 72>}, {pipeline_mode = #tpu.pipeline_mode<synchronous>, transform_indices = @transform_1, window_bounds = array<i64: 72, 12>}, {transform_indices = @transform_2, window_bounds = array<i64: 1024, 12>}]} {
    %c0 = arith.constant 0 : index
    %c0_0 = arith.constant 0 : index
    %0 = vector.load %arg1[%c0, %c0_0] : memref<1024x72xbf16, #tpu.memory_space<vmem>>, vector<1024x72xbf16>
    %c0_1 = arith.constant 0 : index
    %c0_2 = arith.constant 0 : index
    %1 = vector.load %arg2[%c0_1, %c0_2] : memref<72x12xbf16, #tpu.memory_space<vmem>>, vector<72x12xbf16>
    %cst = arith.constant dense<0.000000e+00> : vector<1024x12xf32>
    %2 = tpu.matmul %0, %1, %cst {dimension_numbers = #tpu.dot_dimension_numbers<[1], [0], [0], [1], [0, 0, 1, 1], [], []>} : vector<1024x72xbf16>, vector<72x12xbf16>, vector<1024x12xf32> -> vector<1024x12xf32>
    %3 = math.tanh %2 : vector<1024x12xf32>
    %4 = arith.truncf %3 : vector<1024x12xf32> to vector<1024x12xbf16>
    %c0_3 = arith.constant 0 : index
    %c0_4 = arith.constant 0 : index
    %5 = vector.load %arg3[%c0_3, %c0_4] : memref<1024x12xbf16, #tpu.memory_space<vmem>>, vector<1024x12xbf16>
    tpu.vector_store %arg3[%c0_3, %c0_4], %4 {strides = array<i32>} : memref<1024x12xbf16, #tpu.memory_space<vmem>>, vector<1024x12xbf16>,
    return
  }
  func.func @transform_0(%arg0: i32) -> (i32, i32) {
    %c0_i32 = arith.constant 0 : i32
    %c0_i32_0 = arith.constant 0 : i32
    return %arg0, %c0_i32 : i32, i32
  }
  func.func @transform_1(%arg0: i32) -> (i32, i32) {
    %c0_i32 = arith.constant 0 : i32
    %c0_i32_0 = arith.constant 0 : i32
    %c0_i32_1 = arith.constant 0 : i32
    return %c0_i32, %c0_i32_0 : i32, i32
  }
  func.func @transform_2(%arg0: i32) -> (i32, i32) {
    %c0_i32 = arith.constant 0 : i32
    %c0_i32_0 = arith.constant 0 : i32
    return %arg0, %c0_i32 : i32, i32
  }
}

</mosaic_0001>

<bundles_post_ra>
// kernel: generator_forward.5
= control target key start
LH: loop header
LB: loop body
LE: loop exit
PB: predicated region body
PF: predicated region fallthrough
CT: control target
= control target key end

     0   :  { %9 = vsyncpa [#allocation3], 0  ;;  %s867_s0 = inlined_call_operand.vmem [shape: bf16[2,16], index: 0, kind: input, shape index: {}]   ;;  %s868_s1 = inlined_call_operand.vmem [shape: bf16[16,1024], index: 1, kind: input, shape index: {}]   ;;  %s869_s2 = inlined_call_operand.hbm [shape: f32[1,64], index: 2, kind: input, shape index: {}]   ;;  %s870_s3 = inlined_call_operand.hbm [shape: f32[1,64], index: 3, kind: input, shape index: {}]   ;;  %s871_s4 = inlined_call_operand.vmem [shape: bf16[2,1024], index: 4, kind: output, shape index: {}]  }
   0x1   :  { %10 = vsyncpa [#allocation5], 0  ;;  %s681_s15 = smov [#allocation2]   ;;  %s682_s17 = smov [#allocation4]  }
   0x2   :  { %s21_s16 = sshll.u32 %s681_s15, 4  ;;  %s31_s18 = sshll.u32 %s682_s17, 4  ;;  %s22_s16 = int_to_ptr.vmem [resolvable:$true] %s21_s16  ;;  %s32_s18 = int_to_ptr.vmem [resolvable:$true] %s31_s18 }
   0x3   :  { %s633_s21 = scalar_lea.hbm %s869_s2, 16 }
   0x4   :  { %p634_p0 = scmp.ne.s32.totalorder %s869_s2, %s633_s21  ;;  %p637_p1 = scmp.lt.u32.totalorder %s633_s21, %s869_s2 }
   0x6   :  { %p639_p2 = pnand %p637_p1, %p634_p0 }
   0x8   :  { %642 = shalt.err (!%p639_p2)
}
   0x9   :  { %s643_s26 = scalar_lea.vmem %s22_s16, 16  ;;  %s647_s27 = scalar_lea.vmem %s22_s16, 32 }
   0xa   :  { %p644_p3 = scmp.ne.s32.totalorder %s22_s16, %s643_s26  ;;  %p648_p4 = scmp.lt.s32.totalorder %s22_s16, %s22_s16 }
   0xb   :  { %p649_p5 = scmp.lt.s32.totalorder %s647_s27, %s643_s26 }
   0xd   :  { %p650_p6 = por %p649_p5, %p648_p4 }
   0xf   :  { %p651_p7 = pnand %p650_p6, %p644_p3 }
  0x11   :  { %654 = shalt.err (!%p651_p7)
}
  0x12   :  { %24 = dma.hbm_to_vmem [thread:$0]  %s869_s2, 16, %s22_s16, [#allocation3]  }
  0x13   :  { %s655_s6 = scalar_lea.hbm %s870_s3, 16 }
  0x14   :  { %p656_p8 = scmp.ne.s32.totalorder %s870_s3, %s655_s6  ;;  %p659_p9 = scmp.lt.u32.totalorder %s655_s6, %s870_s3 }
  0x16   :  { %p661_p10 = pnand %p659_p9, %p656_p8 }
  0x18   :  { %664 = shalt.err (!%p661_p10)
}
  0x19   :  { %s665_s11 = scalar_lea.vmem %s32_s18, 16  ;;  %s669_s12 = scalar_lea.vmem %s32_s18, 32 }
  0x1a   :  { %p666_p11 = scmp.ne.s32.totalorder %s32_s18, %s665_s11  ;;  %p670_p12 = scmp.lt.s32.totalorder %s32_s18, %s32_s18 }
  0x1b   :  { %p671_p13 = scmp.lt.s32.totalorder %s669_s12, %s665_s11 }
  0x1d   :  { %p672_p0 = por %p671_p13, %p670_p12 }
  0x1f   :  { %p673_p1 = pnand %p672_p0, %p666_p11 }
  0x21   :  { %676 = shalt.err (!%p673_p1)
}
  0x22   :  { %34 = dma.hbm_to_vmem [thread:$0]  %s870_s3, 16, %s32_s18, [#allocation5]  }
  0x23   :  { %677 = dma.done.wait [#allocation3], 16  }
  0x24   :  { %678 = vsyncadd [#allocation3], 4294967280 }
  0x25   :  { %679 = dma.done.wait [#allocation5], 16  }
  0x26   :  { %680 = vsyncadd [#allocation5], 4294967280  ;;  %v683_v0 = vmov 0   ;;  %v43_v1 = vld [vmem:[%s868_s1] sm:$0xff]  ;;  %v44_v3 = vld [vmem:[%s868_s1 + $0x8] sm:$0xff]  ;;  %vm91_vm0 = vcmask 130048  }
  0x27   :  { %127 = vmatprep.mubr.bf16.mxu0 %v683_v0  ;;  %168 = vmatprep.mubr.bf16.mxu1 %v683_v0  ;;  %v47_v2 = vld [vmem:[%s868_s1 + $0x20] sm:$0xff]  ;;  %v48_v6 = vld [vmem:[%s868_s1 + $0x28] sm:$0xff]  ;;  %v45_v7 = vld [vmem:[%s868_s1 + $0x10] sm:$0xff]  ;;  %vm259_vm1 = vcmask 1041408   ;;  %vm494_vm2 = vcmask 523264  }
  0x28   :  { %v611_v4 = vcombine.high %v43_v1, %v47_v2  ;;  %v610_v5 = vcombine.low %v43_v1, %v47_v2  ;;  %v613_v8 = vcombine.high %v44_v3, %v48_v6  ;;  %v612_v9 = vcombine.low %v44_v3, %v48_v6  ;;  %v49_v10 = vld [vmem:[%s868_s1 + $0x30] sm:$0xff]  ;;  %v46_v11 = vld [vmem:[%s868_s1 + $0x18] sm:$0xff]  ;;  %v42_v15 = vld [vmem:[%s867_s0] sm:$0x1]  ;;  %s684_s0 = smov 64  }
  0x29   :  { %v50_v12 = vld [vmem:[%s868_s1 + $0x38] sm:$0xff]  ;;  %v615_v13 = vcombine.high %v45_v7, %v49_v10  ;;  %v614_v16 = vcombine.low %v45_v7, %v49_v10 }
  0x2a   :  { %95 = vmatprep.subr.bf16.mxu0 %v611_v4  ;;  %v617_v14 = vcombine.high %v46_v11, %v50_v12  ;;  %136 = vmatprep.subr.bf16.mxu1 %v613_v8  ;;  %v616_v17 = vcombine.low %v46_v11, %v50_v12 }
  0x2b   :  { %96 = vmatpush1.bf16.msra.mxu0 %v610_v5  ;;  %137 = vmatpush1.bf16.msra.mxu1 %v612_v9 }
  0x2c   :  { %177 = vmatprep.subr.bf16.mxu0 %v615_v13  ;;  %218 = vmatprep.subr.bf16.mxu1 %v617_v14 }
  0x2e   :  { %618 = vmatmul.mubr.msk.bf16.vlgmr.msra.gmra.mrb[0].mxu0 %vm91_vm0, %v42_v15  ;;  %619 = vmatmul.mubr.msk.bf16.vlgmr.msra.gmra.mrb[0].mxu1 %vm91_vm0, %v42_v15 }
  0x2f   :  { %178 = vmatpush1.bf16.msra.mxu0 %v614_v16  ;;  %209 = vmatprep.mubr.bf16.mxu0 %v683_v0 }
  0x30   :  { %219 = vmatpush1.bf16.msra.mxu1 %v616_v17  ;;  %250 = vmatprep.mubr.bf16.mxu1 %v683_v0 }
  0x36   :  { %620 = vmatmul.mubr.msk.bf16.vlgmr.msra.gmra.mrb[4].mxu0 %vm91_vm0, %v42_v15  ;;  %621 = vmatmul.mubr.msk.bf16.vlgmr.msra.gmra.mrb[4].mxu1 %vm91_vm0, %v42_v15 }
 0x101   :  { %v762_v18 = vpop.f32.mrb[0].mxu0  ;;  %v770_v22 = vpop.f32.mrb[0].mxu1 }
 0x102   :  { %v260_v19 = vsel %vm259_vm1, %v762_v18, 0.0  ;;  %v316_v20 = vmul.f32 %v762_v18, %v762_v18  ;;  %v768_v21 = vpop.f32.mrb[1].mxu0  ;;  %v274_v27 = vsel %vm259_vm1, %v770_v22, 0.0  ;;  %v778_v28 = vpop.f32.mrb[1].mxu1  ;;  %v318_v33 = vmul.f32 %v770_v22, %v770_v22 }
 0x103   :  { %v261_v23 = vrot.slane %v260_v19, 4  ;;  %v267_v24 = vsel %vm259_vm1, %v768_v21, 0.0  ;;  %v317_v25 = vmul.f32 %v768_v21, %v768_v21  ;;  %v133_v26 = vpop.f32.mrb[2].mxu0  ;;  %v275_v32 = vrot.slane %v274_v27, 4  ;;  %v174_v34 = vpop.f32.mrb[2].mxu1 }
 0x104   :  { %v324_v29 = vsel %vm259_vm1, %v316_v20, 0.0  ;;  %v268_v30 = vrot.slane %v267_v24, 4  ;;  %v134_v31 = vpop.f32.mrb[3].mxu0  ;;  %v281_v38 = vsel %vm259_vm1, %v778_v28, 0.0  ;;  %v175_v39 = vpop.f32.mrb[3].mxu1  ;;  %v338_v41 = vsel %vm259_vm1, %v318_v33, 0.0 }
 0x105   :  { %v262_v35 = vadd.f32 %v261_v23, %v260_v19  ;;  %v325_v36 = vrot.slane %v324_v29, 4  ;;  %v331_v37 = vsel %vm259_vm1, %v317_v25, 0.0  ;;  %v282_v43 = vrot.slane %v281_v38, 4 }
 0x106   :  { %v269_v40 = vadd.f32 %v268_v30, %v267_v24  ;;  %v319_v44 = vmul.f32 %v778_v28, %v778_v28  ;;  %v332_v45 = vrot.slane %v331_v37, 4  ;;  %v276_v47 = vadd.f32 %v275_v32, %v274_v27 }
 0x107   :  { %v326_v42 = vadd.f32 %v325_v36, %v324_v29  ;;  %v263_v46 = vrot.slane %v262_v35, 2  ;;  %v339_v48 = vrot.slane %v338_v41, 4  ;;  %v283_v58 = vadd.f32 %v282_v43, %v281_v38 }
 0x108   :  { %v345_v49 = vsel %vm259_vm1, %v319_v44, 0.0  ;;  %v270_v51 = vrot.slane %v269_v40, 2  ;;  %v333_v0 = vadd.f32 %v332_v45, %v331_v37  ;;  %v277_v6 = vrot.slane %v276_v47, 2 }
 0x109   :  { %v790_v50 = vpop.f32.mrb[4].mxu0  ;;  %v264_v55 = vadd.f32 %v263_v46, %v262_v35  ;;  %v327_v56 = vrot.slane %v326_v42, 2  ;;  %v798_v57 = vpop.f32.mrb[4].mxu1  ;;  %v346_v7 = vrot.slane %v345_v49, 4  ;;  %v340_v11 = vadd.f32 %v339_v48, %v338_v41 }
 0x10a   :  { %v288_v52 = vsel %vm259_vm1, %v790_v50, 0.0  ;;  %v320_v53 = vmul.f32 %v790_v50, %v790_v50  ;;  %v796_v54 = vpop.f32.mrb[5].mxu0  ;;  %v804_v63 = vpop.f32.mrb[5].mxu1  ;;  %v271_v9 = vadd.f32 %v270_v51, %v269_v40  ;;  %v284_v15 = vrot.slane %v283_v58, 2 }
 0x10b   :  { %v289_v59 = vrot.slane %v288_v52, 4  ;;  %v295_v60 = vsel %vm259_vm1, %v796_v54, 0.0  ;;  %v321_v61 = vmul.f32 %v796_v54, %v796_v54  ;;  %v215_v62 = vpop.f32.mrb[6].mxu0  ;;  %v265_v3 = vrot.slane %v264_v55, 1  ;;  %v256_v5 = vpop.f32.mrb[6].mxu1 }
 0x10c   :  { %v352_v1 = vsel %vm259_vm1, %v320_v53, 0.0  ;;  %v296_v2 = vrot.slane %v295_v60, 4  ;;  %v216_v4 = vpop.f32.mrb[7].mxu0  ;;  %v257_v10 = vpop.f32.mrb[7].mxu1  ;;  %v328_v14 = vadd.f32 %v327_v56, %v326_v42  ;;  %v272_v17 = vrot.slane %v271_v9, 1 }
 0x10d   :  { %v359_v8 = vsel %vm259_vm1, %v321_v61, 0.0  ;;  %v290_v12 = vadd.f32 %v289_v59, %v288_v52  ;;  %v808_v13 = vadd.f32 %v265_v3, %v264_v55  ;;  %v353_v16 = vrot.slane %v352_v1, 4 }
 0x10e   :  { %v302_v19 = vsel %vm259_vm1, %v798_v57, 0.0  ;;  %v297_v20 = vadd.f32 %v296_v2, %v295_v60  ;;  %v360_v23 = vrot.slane %v359_v8, 4  ;;  %v329_v24 = vrot.slane %v328_v14, 1 }
 0x10f   :  { %381 = vrot.lane.b32.xlu0 %v808_v13, %s684_s0  ;;  %v303_v25 = vrot.slane %v302_v19, 4  ;;  %v347_v26 = vadd.f32 %v346_v7, %v345_v49  ;;  %v814_v27 = vadd.f32 %v272_v17, %v271_v9  ;;  %v322_v29 = vmul.f32 %v798_v57, %v798_v57 }
 0x110   :  { %v334_v30 = vrot.slane %v333_v0, 2  ;;  %v291_v31 = vrot.slane %v290_v12, 2  ;;  %v818_v32 = vadd.f32 %v329_v24, %v328_v14  ;;  %v309_v33 = vsel %vm259_vm1, %v804_v63, 0.0 }
 0x111   :  { %v323_v34 = vmul.f32 %v804_v63, %v804_v63  ;;  %393 = vrot.lane.b32.xlu1 %v814_v27, %s684_s0  ;;  %v366_v35 = vsel %vm259_vm1, %v322_v29, 0.0  ;;  %v278_v37 = vadd.f32 %v277_v6, %v276_v47  ;;  %v341_v38 = vrot.slane %v340_v11, 2 }
 0x112   :  { %v335_v36 = vadd.f32 %v334_v30, %v333_v0  ;;  %v354_v39 = vadd.f32 %v353_v16, %v352_v1  ;;  %v298_v40 = vrot.slane %v297_v20, 2  ;;  %v361_v41 = vadd.f32 %v360_v23, %v359_v8 }
 0x113   :  { %386 = vrot.lane.b32.xlu0 %v818_v32, %s684_s0  ;;  %v304_v42 = vadd.f32 %v303_v25, %v302_v19  ;;  %v310_v44 = vrot.slane %v309_v33, 4  ;;  %v279_v45 = vrot.slane %v278_v37, 1  ;;  %v342_v46 = vadd.f32 %v341_v38, %v340_v11 }
 0x114   :  { %v336_v43 = vrot.slane %v335_v36, 1  ;;  %v367_v48 = vrot.slane %v366_v35, 4  ;;  %v373_v49 = vsel %vm259_vm1, %v323_v34, 0.0  ;;  %v285_v51 = vadd.f32 %v284_v15, %v283_v58 }
 0x115   :  { %v348_v52 = vrot.slane %v347_v26, 2  ;;  %v832_v47 = vadd.f32 %v279_v45, %v278_v37  ;;  %v343_v55 = vrot.slane %v342_v46, 1  ;;  %v292_v60 = vadd.f32 %v291_v31, %v290_v12 }
 0x116   :  { %v830_v53 = vadd.f32 %v336_v43, %v335_v36  ;;  %v286_v56 = vrot.slane %v285_v51, 1  ;;  %v355_v61 = vrot.slane %v354_v39, 2  ;;  %v305_v62 = vrot.slane %v304_v42, 2 }
 0x117   :  { %v349_v59 = vadd.f32 %v348_v52, %v347_v26  ;;  %v311_v0 = vadd.f32 %v310_v44, %v309_v33  ;;  %v374_v1 = vrot.slane %v373_v49, 4  ;;  %405 = vrot.lane.b32.xlu0 %v832_v47, %s684_s0  ;;  %v368_v58 = vadd.f32 %v367_v48, %v366_v35 }
 0x118   :  { %398 = vrot.lane.b32.xlu1 %v830_v53, %s684_s0  ;;  %v344_v2 = vadd.f32 %v343_v55, %v342_v46  ;;  %v299_v3 = vadd.f32 %v298_v40, %v297_v20  ;;  %v362_v4 = vrot.slane %v361_v41, 2  ;;  %v287_v5 = vadd.f32 %v286_v56, %v285_v51 }
 0x119   :  { %v350_v6 = vrot.slane %v349_v59, 1  ;;  %v293_v7 = vrot.slane %v292_v60, 1  ;;  %v356_v8 = vadd.f32 %v355_v61, %v354_v39  ;;  %v312_v9 = vrot.slane %v311_v0, 2 }
 0x11a   :  { %v375_v10 = vadd.f32 %v374_v1, %v373_v49  ;;  %v300_v11 = vrot.slane %v299_v3, 1  ;;  %v363_v12 = vadd.f32 %v362_v4, %v361_v41  ;;  %v306_v14 = vadd.f32 %v305_v62, %v304_v42 }
 0x11b   :  { %417 = vrot.lane.b32.xlu0 %v287_v5, %s684_s0  ;;  %v351_v15 = vadd.f32 %v350_v6, %v349_v59  ;;  %v294_v16 = vadd.f32 %v293_v7, %v292_v60  ;;  %v357_v17 = vrot.slane %v356_v8, 1  ;;  %v369_v19 = vrot.slane %v368_v58, 2 }
 0x11c   :  { %410 = vrot.lane.b32.xlu1 %v344_v2, %s684_s0  ;;  %v301_v20 = vadd.f32 %v300_v11, %v299_v3  ;;  %v307_v23 = vrot.slane %v306_v14, 1  ;;  %v313_v24 = vadd.f32 %v312_v9, %v311_v0  ;;  %v364_v26 = vrot.slane %v363_v12, 1 }
 0x11d   :  { %v358_v25 = vadd.f32 %v357_v17, %v356_v8  ;;  %v370_v29 = vadd.f32 %v369_v19, %v368_v58  ;;  %v376_v30 = vrot.slane %v375_v10, 2 }
 0x11e   :  { %v308_v31 = vadd.f32 %v307_v23, %v306_v14  ;;  %v365_v33 = vadd.f32 %v364_v26, %v363_v12  ;;  %v314_v35 = vrot.slane %v313_v24, 1 }
 0x11f   :  { %429 = vrot.lane.b32.xlu0 %v294_v16, %s684_s0  ;;  %v371_v34 = vrot.slane %v370_v29, 1  ;;  %v377_v36 = vadd.f32 %v376_v30, %v375_v10 }
 0x120   :  { %422 = vrot.lane.b32.xlu1 %v351_v15, %s684_s0  ;;  %v315_v38 = vadd.f32 %v314_v35, %v313_v24 }
 0x121   :  { %v372_v37 = vadd.f32 %v371_v34, %v370_v29  ;;  %v378_v39 = vrot.slane %v377_v36, 1 }
 0x123   :  { %441 = vrot.lane.b32.xlu0 %v301_v20, %s684_s0  ;;  %v379_v40 = vadd.f32 %v378_v39, %v377_v36 }
 0x124   :  { %434 = vrot.lane.b32.xlu1 %v358_v25, %s684_s0 }
 0x127   :  { %453 = vrot.lane.b32.xlu0 %v308_v31, %s684_s0 }
 0x128   :  { %446 = vrot.lane.b32.xlu1 %v365_v33, %s684_s0 }
 0x12b   :  { %465 = vrot.lane.b32.xlu0 %v315_v38, %s684_s0 }
 0x12c   :  { %458 = vrot.lane.b32.xlu1 %v372_v37, %s684_s0 }
 0x130   :  { %470 = vrot.lane.b32.xlu1 %v379_v40, %s684_s0 }
 0x181   :  { %v382_v41 = vpop.permute.xlu0 %381 }
 0x182   :  { %v384_v42 = vadd.f32 %v382_v41, %v808_v13 }
 0x183   :  { %v394_v43 = vpop.permute.xlu1 %393 }
 0x184   :  { %v390_v44 = vadd.f32 %v384_v42, %v814_v27  ;;  %v479_v42 = vld [vmem:[#allocation2] sm:$0x1] }
 0x185   :  { %v387_v45 = vpop.permute.xlu0 %386 }
 0x186   :  { %v396_v46 = vadd.f32 %v394_v43, %v390_v44  ;;  %v389_v48 = vadd.f32 %v387_v45, %v818_v32  ;;  %v483_v44 = vld [vmem:[#allocation4] sm:$0x1] }
 0x188   :  { %v391_v49 = vadd.f32 %v389_v48, %v830_v53  ;;  %v402_v51 = vadd.f32 %v396_v46, %v832_v47 }
 0x189   :  { %v406_v55 = vpop.permute.xlu0 %405 }
 0x18a   :  { %v399_v52 = vpop.permute.xlu1 %398  ;;  %v408_v59 = vadd.f32 %v406_v55, %v402_v51 }
 0x18b   :  { %v401_v56 = vadd.f32 %v399_v52, %v391_v49  ;;  %v685_v49 = vmov 1966171168  }
 0x18c   :  { %v414_v61 = vadd.f32 %v408_v59, %v287_v5  ;;  %v558_v51 = vunpack.c.l.s4 %v685_v49 }
 0x18d   :  { %v403_v60 = vadd.f32 %v401_v56, %v344_v2  ;;  %v418_v0 = vpop.permute.xlu0 %417 }
 0x18e   :  { %v411_v62 = vpop.permute.xlu1 %410  ;;  %v420_v1 = vadd.f32 %v418_v0, %v414_v61  ;;  %v559_v56 = vunpack.c.0.s8 %v558_v51 }
 0x18f   :  { %v413_v13 = vadd.f32 %v411_v62, %v403_v60 }
 0x190   :  { %v426_v27 = vadd.f32 %v420_v1, %v294_v16 }
 0x191   :  { %v415_v58 = vadd.f32 %v413_v13, %v351_v15  ;;  %v430_v4 = vpop.permute.xlu0 %429 }
 0x192   :  { %v423_v3 = vpop.permute.xlu1 %422  ;;  %v432_v32 = vadd.f32 %v430_v4, %v426_v27 }
 0x193   :  { %v425_v6 = vadd.f32 %v423_v3, %v415_v58 }
 0x194   :  { %v438_v53 = vadd.f32 %v432_v32, %v301_v20 }
 0x195   :  { %v427_v7 = vadd.f32 %v425_v6, %v358_v25  ;;  %v442_v47 = vpop.permute.xlu0 %441 }
 0x196   :  { %v435_v8 = vpop.permute.xlu1 %434  ;;  %v444_v10 = vadd.f32 %v442_v47, %v438_v53 }
 0x197   :  { %v437_v9 = vadd.f32 %v435_v8, %v427_v7 }
 0x198   :  { %v450_v12 = vadd.f32 %v444_v10, %v308_v31  ;;  %v487_v31 = vlaneseq }
 0x199   :  { %v439_v11 = vadd.f32 %v437_v9, %v365_v33  ;;  %v454_v5 = vpop.permute.xlu0 %453 }
 0x19a   :  { %v447_v2 = vpop.permute.xlu1 %446  ;;  %v456_v17 = vadd.f32 %v454_v5, %v450_v12  ;;  %v488_v41 = vshrl.u32 %v487_v31, 7 }
 0x19b   :  { %v449_v14 = vadd.f32 %v447_v2, %v439_v11 }
 0x19c   :  { %v462_v23 = vadd.f32 %v456_v17, %v315_v38  ;;  %v489_v43 = vsub.s32 0, %v488_v41  ;;  %v562_v61 = vsub.s32 %v559_v56, %v488_v41 }
 0x19d   :  { %v451_v19 = vadd.f32 %v449_v14, %v372_v37  ;;  %v466_v16 = vpop.permute.xlu0 %465 }
 0x19e   :  { %v459_v15 = vpop.permute.xlu1 %458  ;;  %v468_v26 = vadd.f32 %v466_v16, %v462_v23 }
 0x19f   :  { %v461_v24 = vadd.f32 %v459_v15, %v451_v19 }
 0x1a0   :  { %v474_v29 = vmul.f32 0.03125, %v468_v26 }
 0x1a1   :  { %v463_v30 = vadd.f32 %v461_v24, %v379_v40 }
 0x1a2   :  { %v471_v25 = vpop.permute.xlu1 %470  ;;  %v476_v34 = vmul.f32 %v474_v29, %v474_v29 }
 0x1a3   :  { %v473_v20 = vadd.f32 %v471_v25, %v463_v30 }
 0x1a5   :  { %v475_v35 = vmul.f32 0.03125, %v473_v20 }
 0x1a7   :  { %v477_v36 = vsub.f32 %v475_v35, %v476_v34 }
 0x1a9   :  { %v478_v39 = vmax.f32 %v477_v36, 0.0 }
 0x1ab   :  { %v480_v33 = vadd.f32 1e-05, %v478_v39 }
 0x1ad   :  { %631 = vrsqrt.f32 %v480_v33 }
 0x1b7   :  { %v632_v37 = vpop.eup %631 }
 0x1b8   :  { %v482_v38 = vmul.f32 %v632_v37, %v479_v42 }
 0x1ba   :  { %v490_v45 = vrot.slane %v482_v38, %v489_v43  ;;  %v484_v46 = vmul.f32 %v482_v38, %v474_v29 }
 0x1bc   :  { %491 = vrot.lane.b32.xlu0 %v490_v45, %s684_s0  ;;  %v485_v40 = vsub.f32 %v483_v44, %v484_v46 }
 0x1be   :  { %v500_v48 = vrot.slane %v485_v40, %v489_v43 }
 0x1c0   :  { %501 = vrot.lane.b32.xlu1 %v500_v48, %s684_s0 }
 0x22e   :  { %v492_v52 = vpop.permute.xlu0 %491 }
 0x22f   :  { %v495_v55 = vsel %vm494_vm2, %v482_v38, %v492_v52 }
 0x230   :  { %v508_v59 = vrot.slane %v495_v55, %v489_v43 }
 0x232   :  { %v502_v60 = vpop.permute.xlu1 %501  ;;  %v509_v62 = vmul.f32 %v508_v59, %v762_v18  ;;  %v510_v13 = vmul.f32 %v508_v59, %v768_v21  ;;  %v511_v1 = vmul.f32 %v508_v59, %v770_v22  ;;  %v512_v58 = vmul.f32 %v508_v59, %v778_v28 }
 0x233   :  { %v504_v0 = vsel %vm494_vm2, %v485_v40, %v502_v60  ;;  %v513_v3 = vmul.f32 %v508_v59, %v790_v50  ;;  %v514_v4 = vmul.f32 %v508_v59, %v796_v54  ;;  %v515_v6 = vmul.f32 %v508_v59, %v798_v57 }
 0x234   :  { %v520_v27 = vrot.slane %v504_v0, %v489_v43  ;;  %v516_v32 = vmul.f32 %v508_v59, %v804_v63 }
 0x236   :  { %v521_v7 = vadd.f32 %v520_v27, %v509_v62  ;;  %v522_v53 = vadd.f32 %v520_v27, %v510_v13  ;;  %v523_v8 = vadd.f32 %v520_v27, %v511_v1  ;;  %v524_v18 = vadd.f32 %v520_v27, %v512_v58 }
 0x237   :  { %v525_v47 = vadd.f32 %v520_v27, %v513_v3  ;;  %v526_v9 = vadd.f32 %v520_v27, %v514_v4  ;;  %v527_v21 = vadd.f32 %v520_v27, %v515_v6  ;;  %v528_v10 = vadd.f32 %v520_v27, %v516_v32 }
 0x238   :  { %v529_v22 = vmax.f32 %v521_v7, 0.0  ;;  %v530_v11 = vmax.f32 %v522_v53, 0.0  ;;  %v531_v28 = vmax.f32 %v523_v8, 0.0  ;;  %v532_v12 = vmax.f32 %v524_v18, 0.0 }
 0x239   :  { %v533_v2 = vmax.f32 %v525_v47, 0.0  ;;  %v534_v50 = vmax.f32 %v526_v9, 0.0  ;;  %v535_v5 = vmax.f32 %v527_v21, 0.0  ;;  %v536_v54 = vmax.f32 %v528_v10, 0.0 }
 0x23a   :  { %v622_v14 = vpack.c.bf16 %v530_v11, %v529_v22  ;;  %v623_v57 = vpack.c.bf16 %v532_v12, %v531_v28 }
 0x23b   :  { %v624_v17 = vpack.c.bf16 %v534_v50, %v533_v2  ;;  %v625_v63 = vpack.c.bf16 %v536_v54, %v535_v5 }
 0x23c   :  { %v563_v19 = vrot.slane %v622_v14, %v562_v61  ;;  %v570_v23 = vrot.slane %v623_v57, %v562_v61 }
 0x23d   :  { %v577_v15 = vrot.slane %v624_v17, %v562_v61  ;;  %v584_v16 = vrot.slane %v625_v63, %v562_v61 }
 0x23e   :  { %v585_v24 = vcombine.low %v563_v19, %v570_v23 }
 0x23f   :  { %v586_v26 = vcombine.low %v577_v15, %v584_v16 }
 0x240   :  { %v593_v29 = vrot.slane %v585_v24, %v562_v61 }
 0x241   :  { %v600_v30 = vrot.slane %v586_v26, %v562_v61 }
 0x243   :  { %v601_v25 = vcombine.low %v593_v29, %v600_v30 }
 0x245   :  { %603 = vst [vmem:[%s871_s4] sm:$0xff] %v601_v25 }
 0x246   :  { %608 = vsyncpa [#allocation3], 1 }
 0x247   :  { %609 = vsyncpa [#allocation5], 1 }

// kernel: generator_forward.6
= control target key start
LH: loop header
LB: loop body
LE: loop exit
PB: predicated region body
PF: predicated region fallthrough
CT: control target
= control target key end

     0   :  { %9 = vsyncpa [#allocation3], 0  ;;  %s1172_s0 = inlined_call_operand.vmem [shape: bf16[32,576], index: 0, kind: input, shape index: {}]   ;;  %s1173_s1 = inlined_call_operand.vmem [shape: bf16[576,128], index: 1, kind: input, shape index: {}]   ;;  %s1174_s2 = inlined_call_operand.hbm [shape: f32[1,32], index: 2, kind: input, shape index: {}]   ;;  %s1175_s3 = inlined_call_operand.hbm [shape: f32[1,32], index: 3, kind: input, shape index: {}]   ;;  %s1176_s4 = inlined_call_operand.vmem [shape: bf16[32,128], index: 4, kind: output, shape index: {}]  }
   0x1   :  { %10 = vsyncpa [#allocation5], 0  ;;  %s934_s15 = smov [#allocation2]   ;;  %s935_s17 = smov [#allocation4]  }
   0x2   :  { %s21_s16 = sshll.u32 %s934_s15, 4  ;;  %s31_s18 = sshll.u32 %s935_s17, 4  ;;  %s22_s16 = int_to_ptr.vmem [resolvable:$true] %s21_s16  ;;  %s32_s18 = int_to_ptr.vmem [resolvable:$true] %s31_s18 }
   0x3   :  { %s886_s21 = scalar_lea.hbm %s1174_s2, 16 }
   0x4   :  { %p887_p0 = scmp.ne.s32.totalorder %s1174_s2, %s886_s21  ;;  %p890_p1 = scmp.lt.u32.totalorder %s886_s21, %s1174_s2 }
   0x6   :  { %p892_p2 = pnand %p890_p1, %p887_p0 }
   0x8   :  { %895 = shalt.err (!%p892_p2)
}
   0x9   :  { %s896_s26 = scalar_lea.vmem %s22_s16, 16  ;;  %s900_s27 = scalar_lea.vmem %s22_s16, 32 }
   0xa   :  { %p897_p3 = scmp.ne.s32.totalorder %s22_s16, %s896_s26  ;;  %p901_p4 = scmp.lt.s32.totalorder %s22_s16, %s22_s16 }
   0xb   :  { %p902_p5 = scmp.lt.s32.totalorder %s900_s27, %s896_s26 }
   0xd   :  { %p903_p6 = por %p902_p5, %p901_p4 }
   0xf   :  { %p904_p7 = pnand %p903_p6, %p897_p3 }
  0x11   :  { %907 = shalt.err (!%p904_p7)
}
  0x12   :  { %24 = dma.hbm_to_vmem [thread:$0]  %s1174_s2, 16, %s22_s16, [#allocation3]  }
  0x13   :  { %s908_s6 = scalar_lea.hbm %s1175_s3, 16 }
  0x14   :  { %p909_p8 = scmp.ne.s32.totalorder %s1175_s3, %s908_s6  ;;  %p912_p9 = scmp.lt.u32.totalorder %s908_s6, %s1175_s3 }
  0x16   :  { %p914_p10 = pnand %p912_p9, %p909_p8 }
  0x18   :  { %917 = shalt.err (!%p914_p10)
}
  0x19   :  { %s918_s11 = scalar_lea.vmem %s32_s18, 16  ;;  %s922_s12 = scalar_lea.vmem %s32_s18, 32 }
  0x1a   :  { %p919_p11 = scmp.ne.s32.totalorder %s32_s18, %s918_s11  ;;  %p923_p12 = scmp.lt.s32.totalorder %s32_s18, %s32_s18 }
  0x1b   :  { %p924_p13 = scmp.lt.s32.totalorder %s922_s12, %s918_s11 }
  0x1d   :  { %p925_p0 = por %p924_p13, %p923_p12 }
  0x1f   :  { %p926_p1 = pnand %p925_p0, %p919_p11 }
  0x21   :  { %929 = shalt.err (!%p926_p1)
}
  0x22   :  { %34 = dma.hbm_to_vmem [thread:$0]  %s1175_s3, 16, %s32_s18, [#allocation5]  }
  0x23   :  { %930 = dma.done.wait [#allocation3], 16  }
  0x24   :  { %931 = vsyncadd [#allocation3], 4294967280 }
  0x25   :  { %932 = dma.done.wait [#allocation5], 16  }
  0x26   :  { %933 = vsyncadd [#allocation5], 4294967280  ;;  %v834_v0 = vld [vmem:[%s1173_s1 + $0x40] sm:$0xff]   ;;  %v838_v4 = vld [vmem:[%s1173_s1 + $0x48] sm:$0xff]   ;;  %vm392_vm0 = vcmask 523264   ;;  %s938_s18 = smov 32  }
  0x27   :  { %v835_v1 = vld [vmem:[%s1173_s1 + $0xc0] sm:$0xff]   ;;  %755 = vmatprep.subr.bf16.mxu0 %v834_v0  ;;  %v839_v5 = vld [vmem:[%s1173_s1 + $0xc8] sm:$0xff]   ;;  %v842_v8 = vld [vmem:[%s1173_s1 + $0x50] sm:$0xff]   ;;  %vm620_vm1 = vcmask 261120   ;;  %vm623_vm2 = vcmask 785408  }
  0x28   :  { %v836_v2 = vld [vmem:[%s1173_s1] sm:$0xff]   ;;  %783 = vmatprep.subr.bf16.mxu1 %v835_v1  ;;  %v840_v6 = vld [vmem:[%s1173_s1 + $0x8] sm:$0xff]   ;;  %v843_v9 = vld [vmem:[%s1173_s1 + $0xd0] sm:$0xff]  }
  0x29   :  { %v837_v3 = vld [vmem:[%s1173_s1 + $0x80] sm:$0xff]   ;;  %756 = vmatpush3.bf16.msra.mxu0 %v836_v2  ;;  %v841_v7 = vld [vmem:[%s1173_s1 + $0x88] sm:$0xff]   ;;  %v844_v10 = vld [vmem:[%s1173_s1 + $0x10] sm:$0xff]  }
  0x2a   :  { %784 = vmatpush3.bf16.msra.mxu1 %v837_v3  ;;  %757 = vmatprep.subr.bf16.mxu0 %v838_v4  ;;  %v845_v11 = vld [vmem:[%s1173_s1 + $0x90] sm:$0xff]   ;;  %v846_v12 = vld [vmem:[%s1173_s1 + $0x58] sm:$0xff]   ;;  %v850_v16 = vld [vmem:[%s1173_s1 + $0x60] sm:$0xff]  }
  0x2b   :  { %785 = vmatprep.subr.bf16.mxu1 %v839_v5  ;;  %v847_v13 = vld [vmem:[%s1173_s1 + $0xd8] sm:$0xff]   ;;  %v851_v17 = vld [vmem:[%s1173_s1 + $0xe0] sm:$0xff]   ;;  %v854_v20 = vld [vmem:[%s1173_s1 + $0x68] sm:$0xff]  }
  0x2c   :  { %v848_v14 = vld [vmem:[%s1173_s1 + $0x18] sm:$0xff]   ;;  %v852_v18 = vld [vmem:[%s1173_s1 + $0x20] sm:$0xff]   ;;  %v855_v21 = vld [vmem:[%s1173_s1 + $0xe8] sm:$0xff]  }
  0x2d   :  { %758 = vmatpush3.bf16.msra.mxu0 %v840_v6  ;;  %v849_v15 = vld [vmem:[%s1173_s1 + $0x98] sm:$0xff]   ;;  %v853_v19 = vld [vmem:[%s1173_s1 + $0xa0] sm:$0xff]   ;;  %v856_v22 = vld [vmem:[%s1173_s1 + $0x28] sm:$0xff]  }
  0x2e   :  { %786 = vmatpush3.bf16.msra.mxu1 %v841_v7  ;;  %759 = vmatprep.subr.bf16.mxu0 %v842_v8  ;;  %v857_v23 = vld [vmem:[%s1173_s1 + $0xa8] sm:$0xff]   ;;  %v858_v24 = vld [vmem:[%s1173_s1 + $0x70] sm:$0xff]   ;;  %v862_v28 = vld [vmem:[%s1173_s1 + $0x78] sm:$0xff]  }
  0x2f   :  { %787 = vmatprep.subr.bf16.mxu1 %v843_v9  ;;  %v859_v25 = vld [vmem:[%s1173_s1 + $0xf0] sm:$0xff]   ;;  %v863_v29 = vld [vmem:[%s1173_s1 + $0xf8] sm:$0xff]   ;;  %v871_v35 = vld [vmem:[%s1172_s0 + $0xc] ss:$20 sps:$4 sm:$0xff]  }
  0x30   :  { %v860_v26 = vld [vmem:[%s1173_s1 + $0x30] sm:$0xff]   ;;  %v864_v30 = vld [vmem:[%s1173_s1 + $0x38] sm:$0xff]   ;;  %v872_v36 = vld [vmem:[%s1173_s1 + $0x100] sm:$0xff]   ;;  %480 = vmatprep.mubr.bf16.mxu1 %v871_v35 }
  0x31   :  { %760 = vmatpush3.bf16.msra.mxu0 %v844_v10  ;;  %v861_v27 = vld [vmem:[%s1173_s1 + $0xb0] sm:$0xff]   ;;  %v865_v31 = vld [vmem:[%s1173_s1 + $0xb8] sm:$0xff]   ;;  %v873_v37 = vld [vmem:[%s1173_s1 + $0x108] sm:$0xff]  }
  0x32   :  { %788 = vmatpush3.bf16.msra.mxu1 %v845_v11  ;;  %761 = vmatprep.subr.bf16.mxu0 %v846_v12  ;;  %v866_v32 = vld [vmem:[%s1172_s0] ss:$20 sps:$4 sm:$0xff]   ;;  %v868_v33 = vld [vmem:[%s1172_s0 + $0x4] ss:$20 sps:$4 sm:$0xff]   ;;  %v869_v34 = vld [vmem:[%s1172_s0 + $0x8] ss:$20 sps:$4 sm:$0xff]  }
  0x33   :  { %789 = vmatprep.subr.bf16.mxu1 %v847_v13  ;;  %431 = vmatprep.mubr.bf16.mxu0 %v868_v33  ;;  %v874_v38 = vld [vmem:[%s1172_s0 + $0x2c] ss:$20 sps:$4 sm:$0xff]   ;;  %v876_v39 = vld [vmem:[%s1172_s0 + $0x34] ss:$20 sps:$4 sm:$0xff]   ;;  %v879_v42 = vld [vmem:[%s1172_s0 + $0x30] ss:$20 sps:$4 sm:$0xff]  }
  0x34   :  { %v878_v40 = vld [vmem:[%s1172_s0 + $0x28] ss:$20 sps:$4 sm:$0xff]   ;;  %v880_v41 = vld [vmem:[%s1173_s1 + $0x110] sm:$0xff]   ;;  %v883_v45 = vld [vmem:[%s1172_s0 + $0x38] ss:$20 sps:$4 sm:$0xff]  }
  0x35   :  { %762 = vmatpush3.bf16.msra.mxu0 %v848_v14  ;;  %v882_v43 = vld [vmem:[%s1172_s0 + $0x10] ss:$20 sps:$4 sm:$0xff]   ;;  %v881_v44 = vld [vmem:[%s1173_s1 + $0x118] sm:$0xff]   ;;  %s936_s0 = smov 64   ;;  %s937_s1 = smov 96  }
  0x36   :  { %790 = vmatpush3.bf16.msra.mxu1 %v849_v15  ;;  %763 = vmatprep.subr.bf16.mxu0 %v850_v16 }
  0x37   :  { %791 = vmatprep.subr.bf16.mxu1 %v851_v17 }
  0x39   :  { %764 = vmatpush3.bf16.msra.mxu0 %v852_v18 }
  0x3a   :  { %792 = vmatpush3.bf16.msra.mxu1 %v853_v19  ;;  %765 = vmatprep.subr.bf16.mxu0 %v854_v20 }
  0x3b   :  { %793 = vmatprep.subr.bf16.mxu1 %v855_v21 }
  0x3d   :  { %766 = vmatpush3.bf16.msra.mxu0 %v856_v22 }
  0x3e   :  { %794 = vmatpush3.bf16.msra.mxu1 %v857_v23  ;;  %767 = vmatprep.subr.bf16.mxu0 %v858_v24 }
  0x3f   :  { %795 = vmatprep.subr.bf16.mxu1 %v859_v25 }
  0x41   :  { %768 = vmatpush3.bf16.msra.mxu0 %v860_v26 }
  0x42   :  { %796 = vmatpush3.bf16.msra.mxu1 %v861_v27  ;;  %769 = vmatprep.subr.bf16.mxu0 %v862_v28 }
  0x43   :  { %797 = vmatprep.subr.bf16.mxu1 %v863_v29 }
  0x45   :  { %770 = vmatpush3.bf16.msra.mxu0 %v864_v30 }
  0x46   :  { %798 = vmatpush3.bf16.msra.mxu1 %v865_v31  ;;  %817 = vmatprep.subr.bf16.mxu0 %v872_v36 }
  0x48   :  { %432 = vmatmul.mubr.bf16.vlgmr.msra.gmra.mrb[0].mxu0 %v866_v32 }
  0x49   :  { %481 = vmatmul.mubr.bf16.vlgmr.msra.gmra.mrb[0].mxu1 %v869_v34  ;;  %818 = vmatpush3.bf16.msra.mxu0 %v872_v36 }
  0x4a   :  { %819 = vmatprep.subr.bf16.mxu0 %v873_v37  ;;  %439 = vmatprep.mubr.bf16.mxu0 %v874_v38 }
  0x4b   :  { %488 = vmatprep.mubr.bf16.mxu1 %v876_v39 }
  0x4d   :  { %820 = vmatpush3.bf16.msra.mxu0 %v873_v37 }
  0x4e   :  { %821 = vmatprep.subr.bf16.mxu0 %v880_v41 }
  0x50   :  { %440 = vmatmul.mubr.bf16.gmra.mrb[4].mxu0 %v878_v40 }
  0x51   :  { %489 = vmatmul.mubr.bf16.gmra.mrb[4].mxu1 %v879_v42  ;;  %825 = vmatprep.mubr.msk.bf16.mxu0 %vm392_vm0, %v882_v43 }
  0x52   :  { %822 = vmatpush3.bf16.msra.mxu0 %v880_v41 }
  0x53   :  { %823 = vmatprep.subr.bf16.mxu0 %v881_v44 }
  0x56   :  { %824 = vmatpush3.bf16.msra.mxu0 %v881_v44 }
  0x59   :  { %826 = vmatmul.mubr.msk.bf16.vlgmr.msra.gmra.mrb[8].mxu0 %vm392_vm0, %v883_v45 }
 0x11b   :  { %v771_v46 = vpop.f32.mrb[0].mxu0 }
 0x11c   :  { %v799_v47 = vpop.f32.mrb[0].mxu1  ;;  %v772_v48 = vpop.f32.mrb[1].mxu0 }
 0x11d   :  { %v773_v49 = vadd.f32 %v772_v48, %v771_v46  ;;  %v800_v50 = vpop.f32.mrb[1].mxu1  ;;  %v774_v51 = vpop.f32.mrb[2].mxu0 }
 0x11e   :  { %v801_v52 = vadd.f32 %v800_v50, %v799_v47  ;;  %v802_v53 = vpop.f32.mrb[2].mxu1  ;;  %v775_v54 = vpop.f32.mrb[3].mxu0 }
 0x11f   :  { %v776_v55 = vadd.f32 %v775_v54, %v774_v51  ;;  %v803_v56 = vpop.f32.mrb[3].mxu1 }
 0x120   :  { %v804_v57 = vadd.f32 %v803_v56, %v802_v53  ;;  %v483_v58 = vadd.f32 %v801_v52, %v773_v49 }
 0x122   :  { %v486_v59 = vadd.f32 %v804_v57, %v776_v55 }
 0x123   :  { %v777_v60 = vpop.f32.mrb[4].mxu0 }
 0x124   :  { %v805_v61 = vpop.f32.mrb[4].mxu1  ;;  %v778_v62 = vpop.f32.mrb[5].mxu0 }
 0x125   :  { %v779_v63 = vadd.f32 %v778_v62, %v777_v60  ;;  %v806_v0 = vpop.f32.mrb[5].mxu1  ;;  %v780_v1 = vpop.f32.mrb[6].mxu0  ;;  %v599_v60 = vld [vmem:[#allocation2] sm:$0x1] }
 0x126   :  { %v807_v2 = vadd.f32 %v806_v0, %v805_v61  ;;  %v808_v3 = vpop.f32.mrb[6].mxu1  ;;  %v781_v4 = vpop.f32.mrb[7].mxu0  ;;  %v603_v0 = vld [vmem:[#allocation4] sm:$0x1] }
 0x127   :  { %v782_v5 = vadd.f32 %v781_v4, %v780_v1  ;;  %v809_v6 = vpop.f32.mrb[7].mxu1 }
 0x128   :  { %v810_v7 = vadd.f32 %v809_v6, %v808_v3  ;;  %v491_v8 = vadd.f32 %v807_v2, %v779_v63 }
 0x12a   :  { %v494_v9 = vadd.f32 %v810_v7, %v782_v5 }
 0x12c   :  { %v827_v10 = vpop.f32.mrb[8].mxu0 }
 0x12d   :  { %v1128_v11 = vadd.f32 %v827_v10, %v491_v8  ;;  %v531_v12 = vpop.f32.mrb[9].mxu0 }
 0x12e   :  { %v1130_v13 = vadd.f32 %v531_v12, %v483_v58  ;;  %v828_v14 = vpop.f32.mrb[10].mxu0  ;;  %v607_v58 = vlaneseq }
 0x12f   :  { %v1132_v15 = vadd.f32 %v828_v14, %v494_v9  ;;  %v534_v16 = vpop.f32.mrb[11].mxu0  ;;  %v557_v21 = vmul.f32 %v1128_v11, %v1128_v11 }
 0x130   :  { %v1134_v17 = vadd.f32 %v534_v16, %v486_v59  ;;  %v555_v18 = vmul.f32 %v1130_v13, %v1130_v13  ;;  %v608_v59 = vshrl.u32 %v607_v58, 7 }
 0x131   :  { %v558_v24 = vmul.f32 %v1132_v15, %v1132_v15 }
 0x132   :  { %v546_v19 = vadd.f32 %v1134_v17, %v1130_v13  ;;  %v556_v20 = vmul.f32 %v1134_v17, %v1134_v17  ;;  %v609_v61 = vsub.s32 0, %v608_v59 }
 0x134   :  { %v547_v22 = vadd.f32 %v546_v19, %v1128_v11  ;;  %v559_v23 = vadd.f32 %v556_v20, %v555_v18 }
 0x136   :  { %v548_v25 = vadd.f32 %v547_v22, %v1132_v15  ;;  %v560_v26 = vadd.f32 %v559_v23, %v557_v21 }
 0x138   :  { %v549_v27 = vrot.slane %v548_v25, 4  ;;  %v561_v28 = vadd.f32 %v560_v26, %v558_v24 }
 0x13a   :  { %v550_v29 = vadd.f32 %v549_v27, %v548_v25  ;;  %v562_v30 = vrot.slane %v561_v28, 4 }
 0x13c   :  { %v551_v31 = vrot.slane %v550_v29, 2  ;;  %v563_v32 = vadd.f32 %v562_v30, %v561_v28 }
 0x13e   :  { %v552_v33 = vadd.f32 %v551_v31, %v550_v29  ;;  %v564_v34 = vrot.slane %v563_v32, 2 }
 0x140   :  { %v553_v35 = vrot.slane %v552_v33, 1  ;;  %v565_v36 = vadd.f32 %v564_v34, %v563_v32 }
 0x142   :  { %v554_v37 = vadd.f32 %v553_v35, %v552_v33  ;;  %v566_v38 = vrot.slane %v565_v36, 1 }
 0x144   :  { %578 = vrot.lane.b32.xlu1 %v554_v37, %s936_s0  ;;  %569 = vrot.lane.b32.xlu0 %v554_v37, %s937_s1  ;;  %v567_v39 = vadd.f32 %v566_v38, %v565_v36 }
 0x148   :  { %582 = vrot.lane.b32.xlu1 %v567_v39, %s936_s0  ;;  %574 = vrot.lane.b32.xlu0 %v567_v39, %s937_s1 }
 0x14c   :  { %590 = vrot.lane.b32.xlu1 %v567_v39, %s938_s18  ;;  %586 = vrot.lane.b32.xlu0 %v554_v37, %s938_s18 }
 0x1b6   :  { %v579_v40 = vpop.permute.xlu1 %578  ;;  %v570_v41 = vpop.permute.xlu0 %569 }
 0x1b7   :  { %v572_v42 = vadd.f32 %v570_v41, %v554_v37 }
 0x1b9   :  { %v581_v47 = vadd.f32 %v579_v40, %v572_v42 }
 0x1ba   :  { %v583_v43 = vpop.permute.xlu1 %582  ;;  %v575_v44 = vpop.permute.xlu0 %574 }
 0x1bb   :  { %v577_v45 = vadd.f32 %v575_v44, %v567_v39 }
 0x1bd   :  { %v585_v46 = vadd.f32 %v583_v43, %v577_v45 }
 0x1be   :  { %v591_v48 = vpop.permute.xlu1 %590  ;;  %v587_v49 = vpop.permute.xlu0 %586 }
 0x1bf   :  { %v593_v50 = vadd.f32 %v591_v48, %v585_v46  ;;  %v589_v51 = vadd.f32 %v587_v49, %v581_v47 }
 0x1c1   :  { %v594_v52 = vmul.f32 0.0078125, %v589_v51  ;;  %v595_v53 = vmul.f32 0.0078125, %v593_v50 }
 0x1c3   :  { %v596_v54 = vmul.f32 %v594_v52, %v594_v52 }
 0x1c5   :  { %v597_v55 = vsub.f32 %v595_v53, %v596_v54 }
 0x1c7   :  { %v598_v56 = vmax.f32 %v597_v55, 0.0 }
 0x1c9   :  { %v600_v57 = vadd.f32 1e-05, %v598_v56 }
 0x1cb   :  { %884 = vrsqrt.f32 %v600_v57 }
 0x1d5   :  { %v885_v62 = vpop.eup %884 }
 0x1d6   :  { %v602_v63 = vmul.f32 %v885_v62, %v599_v60 }
 0x1d8   :  { %v604_v1 = vmul.f32 %v602_v63, %v594_v52  ;;  %v610_v2 = vrot.slane %v602_v63, %v609_v61 }
 0x1da   :  { %v605_v3 = vsub.f32 %v603_v0, %v604_v1  ;;  %614 = vrot.lane.b32.xlu1 %v610_v2, %s936_s0  ;;  %611 = vrot.lane.b32.xlu0 %v610_v2, %s938_s18 }
 0x1dc   :  { %v629_v4 = vrot.slane %v605_v3, %v609_v61 }
 0x1de   :  { %617 = vrot.lane.b32.xlu0 %v610_v2, %s937_s1  ;;  %630 = vrot.lane.b32.xlu1 %v629_v4, %s938_s18 }
 0x1e2   :  { %633 = vrot.lane.b32.xlu0 %v629_v4, %s936_s0  ;;  %636 = vrot.lane.b32.xlu1 %v629_v4, %s937_s1 }
 0x24c   :  { %v615_v5 = vpop.permute.xlu1 %614  ;;  %v612_v6 = vpop.permute.xlu0 %611 }
 0x24d   :  { %v621_v7 = vsel %vm620_vm1, %v602_v63, %v612_v6 }
 0x24e   :  { %v622_v8 = vsel %vm392_vm0, %v621_v7, %v615_v5 }
 0x250   :  { %v618_v9 = vpop.permute.xlu0 %617  ;;  %v631_v10 = vpop.permute.xlu1 %630 }
 0x251   :  { %v624_v12 = vsel %vm623_vm2, %v622_v8, %v618_v9  ;;  %v639_v16 = vsel %vm620_vm1, %v605_v3, %v631_v10 }
 0x252   :  { %v645_v14 = vrot.slane %v624_v12, %v609_v61 }
 0x254   :  { %v634_v18 = vpop.permute.xlu0 %633  ;;  %v637_v19 = vpop.permute.xlu1 %636  ;;  %v646_v21 = vmul.f32 %v645_v14, %v1130_v13  ;;  %v647_v23 = vmul.f32 %v645_v14, %v1134_v17  ;;  %v648_v24 = vmul.f32 %v645_v14, %v1128_v11  ;;  %v649_v25 = vmul.f32 %v645_v14, %v1132_v15 }
 0x255   :  { %v640_v20 = vsel %vm392_vm0, %v639_v16, %v634_v18 }
 0x256   :  { %v641_v22 = vsel %vm623_vm2, %v640_v20, %v637_v19 }
 0x257   :  { %v653_v26 = vrot.slane %v641_v22, %v609_v61 }
 0x259   :  { %v654_v27 = vadd.f32 %v653_v26, %v646_v21  ;;  %v655_v28 = vadd.f32 %v653_v26, %v647_v23  ;;  %v656_v29 = vadd.f32 %v653_v26, %v648_v24  ;;  %v657_v30 = vadd.f32 %v653_v26, %v649_v25 }
 0x25b   :  { %v658_v31 = vmax.f32 %v654_v27, 0.0  ;;  %v659_v32 = vmax.f32 %v655_v28, 0.0  ;;  %v660_v33 = vmax.f32 %v656_v29, 0.0  ;;  %v661_v34 = vmax.f32 %v657_v30, 0.0 }
 0x25d   :  { %v747_v35 = vpack.c.bf16 %v659_v32, %v658_v31  ;;  %v752_v36 = vpack.c.bf16 %v661_v34, %v660_v33 }
 0x25f   :  { %748 = vst [vmem:[%s1176_s4] sm:$0xff] %v747_v35   ;;  %754 = vst [vmem:[%s1176_s4 + $0x8] sm:$0xff] %v752_v36  }
 0x260   :  { %686 = vsyncpa [#allocation3], 1 }
 0x261   :  { %687 = vsyncpa [#allocation5], 1 }

// kernel: generator_forward.7
= control target key start
LH: loop header
LB: loop body
LE: loop exit
PB: predicated region body
PF: predicated region fallthrough
CT: control target
= control target key end

     0   :  { %vm314_vm0 = vcmask 261120   ;;  %vm533_vm1 = vcmask 523264   ;;  %s1090_s19 = smov 112   ;;  %s1091_s20 = smov 80   ;;  %vm676_vm2 = vcmask 130048   ;;  %vm679_vm3 = vcmask 392192   ;;  %s1468_s1 = inlined_call_operand.vmem [shape: bf16[288,64], index: 1, kind: input, shape index: {}]   ;;  %s1469_s0 = inlined_call_operand.vmem [shape: bf16[128,288], index: 0, kind: input, shape index: {}]   ;;  %s1470_s2 = inlined_call_operand.vmem [shape: f32[1,16], index: 2, kind: input, shape index: {}]   ;;  %s1471_s3 = inlined_call_operand.vmem [shape: f32[1,16], index: 3, kind: input, shape index: {}]   ;;  %s1472_s4 = inlined_call_operand.vmem [shape: bf16[128,64], index: 4, kind: output, shape index: {}]  }
   0x1   :  { %v1037_v0 = vld [vmem:[%s1468_s1 + $0x40] sm:$0xff]   ;;  %v1039_v2 = vld [vmem:[%s1468_s1 + $0x48] sm:$0xff]   ;;  %v1041_v4 = vld [vmem:[%s1468_s1 + $0x50] sm:$0xff]   ;;  %s1092_s25 = smov 32   ;;  %s1093_s26 = smov 16   ;;  %vm818_vm4 = vcmask 519168  }
   0x2   :  { %v1038_v1 = vld [vmem:[%s1468_s1] sm:$0xff]   ;;  %921 = vmatprep.subr.bf16.mxu0 %v1037_v0  ;;  %1015 = vmatprep.subr.bf16.mxu1 %v1037_v0  ;;  %v1040_v3 = vld [vmem:[%s1468_s1 + $0x8] sm:$0xff]   ;;  %v1042_v5 = vld [vmem:[%s1468_s1 + $0x10] sm:$0xff]   ;;  %s1094_s27 = smov 48  }
   0x3   :  { %922 = vmatpush3.bf16.msra.mxu0 %v1038_v1  ;;  %1023 = vmatpush3.bf16.msra.mxu1 %v1038_v1  ;;  %v1043_v6 = vld [vmem:[%s1468_s1 + $0x58] sm:$0xff]   ;;  %v1045_v8 = vld [vmem:[%s1468_s1 + $0x60] sm:$0xff]   ;;  %v1047_v10 = vld [vmem:[%s1468_s1 + $0x68] sm:$0xff]  }
   0x4   :  { %923 = vmatprep.subr.bf16.mxu0 %v1039_v2  ;;  %1016 = vmatprep.subr.bf16.mxu1 %v1039_v2  ;;  %v1044_v7 = vld [vmem:[%s1468_s1 + $0x18] sm:$0xff]   ;;  %v1046_v9 = vld [vmem:[%s1468_s1 + $0x20] sm:$0xff]   ;;  %v1048_v13 = vld [vmem:[%s1468_s1 + $0x28] sm:$0xff]  }
   0x5   :  { %v1055_v11 = vld [vmem:[%s1469_s0 + $0x4] ss:$12 sps:$4 sm:$0xff]   ;;  %v1058_v12 = vld [vmem:[%s1469_s0 + $0x94] ss:$12 sps:$4 sm:$0xff]   ;;  %v1051_v16 = vld [vmem:[%s1468_s1 + $0x78] sm:$0xff]  }
   0x6   :  { %v1049_v14 = vld [vmem:[%s1468_s1 + $0x70] sm:$0xff]   ;;  %371 = vmatprep.mubr.bf16.mxu0 %v1055_v11  ;;  %419 = vmatprep.mubr.bf16.mxu1 %v1058_v12  ;;  %v1052_v17 = vld [vmem:[%s1468_s1 + $0x38] sm:$0xff]   ;;  %v1053_v18 = vld [vmem:[%s1469_s0] ss:$12 sps:$4 sm:$0xff]  }
   0x7   :  { %924 = vmatpush3.bf16.msra.mxu0 %v1040_v3  ;;  %1024 = vmatpush3.bf16.msra.mxu1 %v1040_v3  ;;  %v1050_v15 = vld [vmem:[%s1468_s1 + $0x30] sm:$0xff]   ;;  %v1059_v19 = vld [vmem:[%s1468_s1 + $0x80] sm:$0xff]   ;;  %v1060_v21 = vld [vmem:[%s1469_s0 + $0x1c] ss:$12 sps:$4 sm:$0xff]  }
   0x8   :  { %925 = vmatprep.subr.bf16.mxu0 %v1041_v4  ;;  %1017 = vmatprep.subr.bf16.mxu1 %v1041_v4  ;;  %v1056_v20 = vld [vmem:[%s1469_s0 + $0x90] ss:$12 sps:$4 sm:$0xff]   ;;  %v1062_v22 = vld [vmem:[%s1469_s0 + $0xac] ss:$12 sps:$4 sm:$0xff]   ;;  %v1065_v25 = vld [vmem:[%s1469_s0 + $0xa8] ss:$12 sps:$4 sm:$0xff]  }
   0x9   :  { %v1066_v23 = vld [vmem:[%s1468_s1 + $0x88] sm:$0xff]   ;;  %v1064_v24 = vld [vmem:[%s1469_s0 + $0x18] ss:$12 sps:$4 sm:$0xff]   ;;  %v1067_v26 = vld [vmem:[%s1469_s0 + $0x34] ss:$12 sps:$4 sm:$0xff]  }
   0xa   :  { %v1069_v27 = vld [vmem:[%s1469_s0 + $0x8] ss:$12 sps:$4 sm:$0xff]   ;;  %v1070_v28 = vld [vmem:[%s1469_s0 + $0x30] ss:$12 sps:$4 sm:$0xff]   ;;  %v1071_v29 = vld [vmem:[%s1469_s0 + $0x20] ss:$12 sps:$4 sm:$0xff]  }
   0xb   :  { %926 = vmatpush3.bf16.msra.mxu0 %v1042_v5  ;;  %1025 = vmatpush3.bf16.msra.mxu1 %v1042_v5  ;;  %v1072_v30 = vld [vmem:[%s1469_s0 + $0x4c] ss:$12 sps:$4 sm:$0xff]   ;;  %v1075_v32 = vld [vmem:[%s1469_s0 + $0x48] ss:$12 sps:$4 sm:$0xff]   ;;  %v1076_v33 = vld [vmem:[%s1469_s0 + $0x50] ss:$12 sps:$4 sm:$0xff]  }
   0xc   :  { %927 = vmatprep.subr.bf16.mxu0 %v1043_v6  ;;  %1018 = vmatprep.subr.bf16.mxu1 %v1043_v6  ;;  %v1074_v31 = vld [vmem:[%s1469_s0 + $0x38] ss:$12 sps:$4 sm:$0xff]   ;;  %v1079_v35 = vld [vmem:[%s1469_s0 + $0x68] ss:$12 sps:$4 sm:$0xff]   ;;  %v1080_v36 = vld [vmem:[%s1469_s0 + $0x60] ss:$12 sps:$4 sm:$0xff]  }
   0xd   :  { %v1077_v34 = vld [vmem:[%s1469_s0 + $0x64] ss:$12 sps:$4 sm:$0xff]   ;;  %v1081_v37 = vld [vmem:[%s1469_s0 + $0x80] ss:$12 sps:$4 sm:$0xff]   ;;  %v1082_v38 = vld [vmem:[%s1469_s0 + $0x7c] ss:$12 sps:$4 sm:$0xff]  }
   0xe   :  { %v1084_v39 = vld [vmem:[%s1469_s0 + $0x98] ss:$12 sps:$4 sm:$0xff]   ;;  %v1086_v41 = vld [vmem:[%s1469_s0 + $0xb0] ss:$12 sps:$4 sm:$0xff]  }
   0xf   :  { %928 = vmatpush3.bf16.msra.mxu0 %v1044_v7  ;;  %1026 = vmatpush3.bf16.msra.mxu1 %v1044_v7  ;;  %v1085_v40 = vld [vmem:[%s1469_s0 + $0x78] ss:$12 sps:$4 sm:$0xff]   ;;  %s1089_s0 = smov 96  }
  0x10   :  { %929 = vmatprep.subr.bf16.mxu0 %v1045_v8  ;;  %1019 = vmatprep.subr.bf16.mxu1 %v1045_v8 }
  0x13   :  { %930 = vmatpush3.bf16.msra.mxu0 %v1046_v9  ;;  %1027 = vmatpush3.bf16.msra.mxu1 %v1046_v9 }
  0x14   :  { %931 = vmatprep.subr.bf16.mxu0 %v1047_v10  ;;  %1020 = vmatprep.subr.bf16.mxu1 %v1047_v10 }
  0x17   :  { %932 = vmatpush3.bf16.msra.mxu0 %v1048_v13  ;;  %1028 = vmatpush3.bf16.msra.mxu1 %v1048_v13 }
  0x18   :  { %933 = vmatprep.subr.bf16.mxu0 %v1049_v14  ;;  %1021 = vmatprep.subr.bf16.mxu1 %v1049_v14 }
  0x1b   :  { %934 = vmatpush3.bf16.msra.mxu0 %v1050_v15  ;;  %1029 = vmatpush3.bf16.msra.mxu1 %v1050_v15 }
  0x1c   :  { %935 = vmatprep.subr.bf16.mxu0 %v1051_v16  ;;  %1022 = vmatprep.subr.bf16.mxu1 %v1051_v16 }
  0x1f   :  { %936 = vmatpush3.bf16.msra.mxu0 %v1052_v17  ;;  %1030 = vmatpush3.bf16.msra.mxu1 %v1052_v17 }
  0x20   :  { %995 = vmatprep.subr.bf16.mxu1 %v1059_v19 }
  0x22   :  { %372 = vmatmul.mubr.bf16.vlgmr.msra.gmra.mrb[0].mxu0 %v1053_v18  ;;  %420 = vmatmul.mubr.bf16.vlgmr.msra.gmra.mrb[0].mxu1 %v1056_v20 }
  0x23   :  { %996 = vmatpush3.bf16.msra.mxu1 %v1059_v19  ;;  %379 = vmatprep.mubr.bf16.mxu0 %v1060_v21 }
  0x24   :  { %427 = vmatprep.mubr.bf16.mxu1 %v1062_v22  ;;  %997 = vmatprep.subr.bf16.mxu1 %v1066_v23 }
  0x27   :  { %998 = vmatpush3.bf16.msra.mxu1 %v1066_v23 }
  0x2a   :  { %380 = vmatmul.mubr.bf16.gmra.mrb[4].mxu0 %v1064_v24  ;;  %428 = vmatmul.mubr.bf16.gmra.mrb[4].mxu1 %v1065_v25 }
  0x2b   :  { %387 = vmatprep.mubr.bf16.mxu0 %v1067_v26  ;;  %999 = vmatprep.mubr.msk.bf16.mxu1 %vm314_vm0, %v1069_v27 }
  0x32   :  { %388 = vmatmul.mubr.bf16.gmra.mrb[8].mxu0 %v1070_v28  ;;  %1000 = vmatmul.mubr.msk.bf16.vlgmr.msra.gmra.mrb[8].mxu1 %vm314_vm0, %v1071_v29 }
  0x33   :  { %395 = vmatprep.mubr.bf16.mxu0 %v1072_v30  ;;  %1003 = vmatprep.mubr.msk.bf16.mxu1 %vm314_vm0, %v1074_v31 }
  0x3a   :  { %396 = vmatmul.mubr.bf16.gmra.mrb[12].mxu0 %v1075_v32  ;;  %1004 = vmatmul.mubr.msk.bf16.gmra.mrb[12].mxu1 %vm314_vm0, %v1076_v33 }
  0x3b   :  { %403 = vmatprep.mubr.bf16.mxu0 %v1077_v34  ;;  %1007 = vmatprep.mubr.msk.bf16.mxu1 %vm314_vm0, %v1079_v35 }
  0x42   :  { %404 = vmatmul.mubr.bf16.gmra.mrb[16].mxu0 %v1080_v36  ;;  %1008 = vmatmul.mubr.msk.bf16.gmra.mrb[16].mxu1 %vm314_vm0, %v1081_v37 }
  0x43   :  { %411 = vmatprep.mubr.bf16.mxu0 %v1082_v38  ;;  %1011 = vmatprep.mubr.msk.bf16.mxu1 %vm314_vm0, %v1084_v39 }
  0x4a   :  { %412 = vmatmul.mubr.bf16.gmra.mrb[20].mxu0 %v1085_v40  ;;  %1012 = vmatmul.mubr.msk.bf16.gmra.mrb[20].mxu1 %vm314_vm0, %v1086_v41 }
  0xf5   :  { %v937_v42 = vpop.f32.mrb[0].mxu0  ;;  %v973_v43 = vpop.f32.mrb[0].mxu1 }
  0xf6   :  { %v938_v44 = vpop.f32.mrb[1].mxu0  ;;  %v974_v45 = vpop.f32.mrb[1].mxu1 }
  0xf7   :  { %v939_v46 = vadd.f32 %v938_v44, %v937_v42  ;;  %v940_v47 = vpop.f32.mrb[2].mxu0  ;;  %v1254_v48 = vadd.f32 %v974_v45, %v973_v43  ;;  %v976_v49 = vpop.f32.mrb[2].mxu1 }
  0xf8   :  { %v941_v50 = vpop.f32.mrb[3].mxu0  ;;  %v977_v51 = vpop.f32.mrb[3].mxu1 }
  0xf9   :  { %v942_v52 = vadd.f32 %v941_v50, %v940_v47  ;;  %v1256_v53 = vadd.f32 %v977_v51, %v976_v49 }
  0xfd   :  { %v943_v54 = vpop.f32.mrb[4].mxu0  ;;  %v979_v55 = vpop.f32.mrb[4].mxu1 }
  0xfe   :  { %v944_v56 = vpop.f32.mrb[5].mxu0  ;;  %v980_v57 = vpop.f32.mrb[5].mxu1 }
  0xff   :  { %v945_v58 = vadd.f32 %v944_v56, %v943_v54  ;;  %v946_v59 = vpop.f32.mrb[6].mxu0  ;;  %v1258_v60 = vadd.f32 %v980_v57, %v979_v55  ;;  %v982_v61 = vpop.f32.mrb[6].mxu1 }
 0x100   :  { %v947_v62 = vpop.f32.mrb[7].mxu0  ;;  %v983_v63 = vpop.f32.mrb[7].mxu1 }
 0x101   :  { %v948_v0 = vadd.f32 %v947_v62, %v946_v59  ;;  %v1260_v1 = vadd.f32 %v983_v63, %v982_v61 }
 0x105   :  { %v949_v2 = vpop.f32.mrb[8].mxu0  ;;  %v1001_v3 = vpop.f32.mrb[8].mxu1 }
 0x106   :  { %v1262_v4 = vadd.f32 %v1001_v3, %v945_v58  ;;  %v950_v5 = vpop.f32.mrb[9].mxu0  ;;  %v470_v6 = vpop.f32.mrb[9].mxu1 }
 0x107   :  { %v951_v7 = vadd.f32 %v950_v5, %v949_v2  ;;  %v1264_v8 = vadd.f32 %v939_v46, %v470_v6  ;;  %v952_v9 = vpop.f32.mrb[10].mxu0  ;;  %v1002_v10 = vpop.f32.mrb[10].mxu1 }
 0x108   :  { %v1266_v11 = vadd.f32 %v1002_v10, %v948_v0  ;;  %v953_v12 = vpop.f32.mrb[11].mxu0  ;;  %v473_v13 = vpop.f32.mrb[11].mxu1  ;;  %v573_v17 = vmul.f32 %v1262_v4, %v1262_v4  ;;  %v537_v23 = vsel %vm533_vm1, %v1262_v4, 0.0 }
 0x109   :  { %v571_v14 = vmul.f32 %v1264_v8, %v1264_v8  ;;  %v954_v15 = vadd.f32 %v953_v12, %v952_v9  ;;  %v1270_v16 = vadd.f32 %v942_v52, %v473_v13  ;;  %v534_v18 = vsel %vm533_vm1, %v1264_v8, 0.0 }
 0x10a   :  { %v574_v21 = vmul.f32 %v1266_v11, %v1266_v11  ;;  %v590_v32 = vsel %vm533_vm1, %v573_v17, 0.0  ;;  %v539_v33 = vsel %vm533_vm1, %v1266_v11, 0.0 }
 0x10b   :  { %v535_v19 = vsel %vm533_vm1, %v1270_v16, 0.0  ;;  %v572_v20 = vmul.f32 %v1270_v16, %v1270_v16  ;;  %v587_v24 = vsel %vm533_vm1, %v571_v14, 0.0 }
 0x10c   :  { %v536_v22 = vadd.f32 %v535_v19, %v534_v18  ;;  %v592_v38 = vsel %vm533_vm1, %v574_v21, 0.0 }
 0x10d   :  { %v588_v25 = vsel %vm533_vm1, %v572_v20, 0.0  ;;  %v955_v26 = vpop.f32.mrb[12].mxu0  ;;  %v1005_v27 = vpop.f32.mrb[12].mxu1 }
 0x10e   :  { %v538_v28 = vadd.f32 %v537_v23, %v536_v22  ;;  %v589_v29 = vadd.f32 %v588_v25, %v587_v24  ;;  %v956_v30 = vpop.f32.mrb[13].mxu0  ;;  %v486_v31 = vpop.f32.mrb[13].mxu1 }
 0x10f   :  { %v957_v34 = vadd.f32 %v956_v30, %v955_v26  ;;  %v1289_v35 = vadd.f32 %v951_v7, %v486_v31  ;;  %v958_v36 = vpop.f32.mrb[14].mxu0  ;;  %v1006_v37 = vpop.f32.mrb[14].mxu1 }
 0x110   :  { %v591_v39 = vadd.f32 %v590_v32, %v589_v29  ;;  %v540_v40 = vadd.f32 %v539_v33, %v538_v28  ;;  %v959_v41 = vpop.f32.mrb[15].mxu0  ;;  %v489_v42 = vpop.f32.mrb[15].mxu1 }
 0x111   :  { %v1292_v43 = vadd.f32 %v1005_v27, %v957_v34  ;;  %v541_v44 = vsel %vm533_vm1, %v1289_v35, 0.0  ;;  %v575_v45 = vmul.f32 %v1289_v35, %v1289_v35  ;;  %v960_v46 = vadd.f32 %v959_v41, %v958_v36 }
 0x112   :  { %v542_v47 = vadd.f32 %v541_v44, %v540_v40  ;;  %v593_v49 = vadd.f32 %v592_v38, %v591_v39  ;;  %v1298_v50 = vadd.f32 %v954_v15, %v489_v42 }
 0x113   :  { %v594_v51 = vsel %vm533_vm1, %v575_v45, 0.0  ;;  %v1301_v52 = vadd.f32 %v1006_v37, %v960_v46  ;;  %v577_v57 = vmul.f32 %v1292_v43, %v1292_v43  ;;  %v545_v2 = vsel %vm533_vm1, %v1292_v43, 0.0 }
 0x114   :  { %v595_v54 = vadd.f32 %v594_v51, %v593_v49  ;;  %v543_v55 = vsel %vm533_vm1, %v1298_v50, 0.0  ;;  %v576_v56 = vmul.f32 %v1298_v50, %v1298_v50 }
 0x115   :  { %v544_v58 = vadd.f32 %v543_v55, %v542_v47  ;;  %v961_v59 = vpop.f32.mrb[16].mxu0  ;;  %v1009_v61 = vpop.f32.mrb[16].mxu1  ;;  %v598_v13 = vsel %vm533_vm1, %v577_v57, 0.0  ;;  %v578_v14 = vmul.f32 %v1301_v52, %v1301_v52  ;;  %v547_v19 = vsel %vm533_vm1, %v1301_v52, 0.0 }
 0x116   :  { %v596_v62 = vsel %vm533_vm1, %v576_v56, 0.0  ;;  %v962_v63 = vpop.f32.mrb[17].mxu0  ;;  %v502_v0 = vpop.f32.mrb[17].mxu1 }
 0x117   :  { %v597_v3 = vadd.f32 %v596_v62, %v595_v54  ;;  %v963_v5 = vadd.f32 %v962_v63, %v961_v59  ;;  %v964_v6 = vpop.f32.mrb[18].mxu0  ;;  %v1010_v7 = vpop.f32.mrb[18].mxu1  ;;  %v546_v9 = vadd.f32 %v545_v2, %v544_v58  ;;  %v600_v24 = vsel %vm533_vm1, %v578_v14, 0.0 }
 0x118   :  { %v965_v10 = vpop.f32.mrb[19].mxu0  ;;  %v505_v12 = vpop.f32.mrb[19].mxu1 }
 0x119   :  { %v966_v15 = vadd.f32 %v965_v10, %v964_v6  ;;  %v1315_v17 = vadd.f32 %v963_v5, %v502_v0  ;;  %v599_v18 = vadd.f32 %v598_v13, %v597_v3  ;;  %v548_v23 = vadd.f32 %v547_v19, %v546_v9 }
 0x11b   :  { %v549_v20 = vsel %vm533_vm1, %v1315_v17, 0.0  ;;  %v579_v21 = vmul.f32 %v1315_v17, %v1315_v17  ;;  %v1323_v22 = vadd.f32 %v966_v15, %v505_v12  ;;  %v601_v30 = vadd.f32 %v600_v24, %v599_v18 }
 0x11c   :  { %v550_v29 = vadd.f32 %v549_v20, %v548_v23 }
 0x11d   :  { %v602_v25 = vsel %vm533_vm1, %v579_v21, 0.0  ;;  %v580_v26 = vmul.f32 %v1323_v22, %v1323_v22  ;;  %v967_v27 = vpop.f32.mrb[20].mxu0  ;;  %v1013_v28 = vpop.f32.mrb[20].mxu1  ;;  %v551_v34 = vsel %vm533_vm1, %v1323_v22, 0.0 }
 0x11e   :  { %v1330_v31 = vadd.f32 %v1013_v28, %v1258_v60  ;;  %v968_v32 = vpop.f32.mrb[21].mxu0  ;;  %v518_v33 = vpop.f32.mrb[21].mxu1  ;;  %v603_v40 = vadd.f32 %v602_v25, %v601_v30  ;;  %v552_v47 = vadd.f32 %v551_v34, %v550_v29 }
 0x11f   :  { %v969_v36 = vadd.f32 %v968_v32, %v967_v27  ;;  %v1335_v37 = vadd.f32 %v1254_v48, %v518_v33  ;;  %v970_v38 = vpop.f32.mrb[22].mxu0  ;;  %v1014_v39 = vpop.f32.mrb[22].mxu1  ;;  %v604_v60 = vsel %vm533_vm1, %v580_v26, 0.0 }
 0x120   :  { %v1338_v41 = vadd.f32 %v1014_v39, %v1260_v1  ;;  %v971_v42 = vpop.f32.mrb[23].mxu0  ;;  %v521_v44 = vpop.f32.mrb[23].mxu1  ;;  %v605_v1 = vadd.f32 %v604_v60, %v603_v40  ;;  %v585_v5 = vmul.f32 %v1330_v31, %v1330_v31  ;;  %v561_v12 = vsel %vm533_vm1, %v1330_v31, 0.0 }
 0x121   :  { %v1341_v45 = vadd.f32 %v1009_v61, %v969_v36  ;;  %v972_v46 = vadd.f32 %v971_v42, %v970_v38  ;;  %v1344_v49 = vadd.f32 %v1256_v53, %v521_v44  ;;  %v583_v57 = vmul.f32 %v1335_v37, %v1335_v37 }
 0x122   :  { %v557_v62 = vsel %vm533_vm1, %v1335_v37, 0.0  ;;  %v586_v13 = vmul.f32 %v1338_v41, %v1338_v41  ;;  %v614_v19 = vsel %vm533_vm1, %v585_v5, 0.0  ;;  %v563_v20 = vsel %vm533_vm1, %v1338_v41, 0.0  ;;  %v655_v5 = vld [vmem:[%s1470_s2] sm:$0x1] }
 0x123   :  { %v553_v48 = vsel %vm533_vm1, %v1341_v45, 0.0  ;;  %v581_v51 = vmul.f32 %v1341_v45, %v1341_v45  ;;  %v1350_v54 = vadd.f32 %v1010_v7, %v972_v46  ;;  %v584_v0 = vmul.f32 %v1344_v49, %v1344_v49 }
 0x124   :  { %v554_v55 = vadd.f32 %v553_v48, %v552_v47  ;;  %v610_v6 = vsel %vm533_vm1, %v583_v57, 0.0  ;;  %v559_v7 = vsel %vm533_vm1, %v1344_v49, 0.0  ;;  %v616_v24 = vsel %vm533_vm1, %v586_v13, 0.0 }
 0x125   :  { %v606_v56 = vsel %vm533_vm1, %v581_v51, 0.0  ;;  %v555_v58 = vsel %vm533_vm1, %v1350_v54, 0.0  ;;  %v582_v53 = vmul.f32 %v1350_v54, %v1350_v54  ;;  %v612_v14 = vsel %vm533_vm1, %v584_v0, 0.0 }
 0x126   :  { %v607_v59 = vadd.f32 %v606_v56, %v605_v1  ;;  %v556_v61 = vadd.f32 %v555_v58, %v554_v55 }
 0x127   :  { %v608_v63 = vsel %vm533_vm1, %v582_v53, 0.0 }
 0x128   :  { %v609_v2 = vadd.f32 %v608_v63, %v607_v59  ;;  %v558_v3 = vadd.f32 %v557_v62, %v556_v61 }
 0x12a   :  { %v560_v9 = vadd.f32 %v559_v7, %v558_v3  ;;  %v611_v10 = vadd.f32 %v610_v6, %v609_v2  ;;  %v663_v2 = vlaneseq }
 0x12c   :  { %v562_v15 = vadd.f32 %v561_v12, %v560_v9  ;;  %v613_v18 = vadd.f32 %v612_v14, %v611_v10  ;;  %v664_v3 = vshrl.u32 %v663_v2, 7  ;;  %v659_v10 = vld [vmem:[%s1471_s3] sm:$0x1] }
 0x12e   :  { %v564_v21 = vadd.f32 %v563_v20, %v562_v15  ;;  %v615_v23 = vadd.f32 %v614_v19, %v613_v18  ;;  %v665_v6 = vsub.s32 0, %v664_v3 }
 0x130   :  { %v565_v25 = vrot.slane %v564_v21, 4  ;;  %v617_v26 = vadd.f32 %v616_v24, %v615_v23 }
 0x132   :  { %v566_v27 = vadd.f32 %v565_v25, %v564_v21  ;;  %v618_v28 = vrot.slane %v617_v26, 4 }
 0x134   :  { %v567_v29 = vrot.slane %v566_v27, 2  ;;  %v619_v30 = vadd.f32 %v618_v28, %v617_v26 }
 0x136   :  { %v568_v32 = vadd.f32 %v567_v29, %v566_v27  ;;  %v620_v33 = vrot.slane %v619_v30, 2 }
 0x138   :  { %v569_v34 = vrot.slane %v568_v32, 1  ;;  %v621_v36 = vadd.f32 %v620_v33, %v619_v30 }
 0x13a   :  { %v570_v38 = vadd.f32 %v569_v34, %v568_v32  ;;  %v622_v39 = vrot.slane %v621_v36, 1 }
 0x13c   :  { %634 = vrot.lane.b32.xlu1 %v570_v38, %s1089_s0  ;;  %625 = vrot.lane.b32.xlu0 %v570_v38, %s1090_s19  ;;  %v623_v40 = vadd.f32 %v622_v39, %v621_v36 }
 0x140   :  { %638 = vrot.lane.b32.xlu1 %v623_v40, %s1089_s0  ;;  %630 = vrot.lane.b32.xlu0 %v623_v40, %s1090_s19 }
 0x144   :  { %646 = vrot.lane.b32.xlu1 %v623_v40, %s1091_s20  ;;  %642 = vrot.lane.b32.xlu0 %v570_v38, %s1091_s20 }
 0x1ae   :  { %v635_v42 = vpop.permute.xlu1 %634  ;;  %v626_v44 = vpop.permute.xlu0 %625 }
 0x1af   :  { %v628_v60 = vadd.f32 %v626_v44, %v570_v38 }
 0x1b1   :  { %v637_v1 = vadd.f32 %v635_v42, %v628_v60 }
 0x1b2   :  { %v639_v46 = vpop.permute.xlu1 %638  ;;  %v631_v47 = vpop.permute.xlu0 %630 }
 0x1b3   :  { %v633_v48 = vadd.f32 %v631_v47, %v623_v40 }
 0x1b5   :  { %v641_v51 = vadd.f32 %v639_v46, %v633_v48 }
 0x1b6   :  { %v647_v55 = vpop.permute.xlu1 %646  ;;  %v643_v56 = vpop.permute.xlu0 %642 }
 0x1b7   :  { %v649_v57 = vadd.f32 %v647_v55, %v641_v51  ;;  %v645_v58 = vadd.f32 %v643_v56, %v637_v1 }
 0x1b9   :  { %v650_v53 = vmul.f32 0.001953125, %v645_v58  ;;  %v651_v59 = vmul.f32 0.001953125, %v649_v57 }
 0x1bb   :  { %v652_v61 = vmul.f32 %v650_v53, %v650_v53 }
 0x1bd   :  { %v653_v62 = vsub.f32 %v651_v59, %v652_v61 }
 0x1bf   :  { %v654_v63 = vmax.f32 %v653_v62, 0.0 }
 0x1c1   :  { %v656_v0 = vadd.f32 1e-05, %v654_v63 }
 0x1c3   :  { %1087 = vrsqrt.f32 %v656_v0 }
 0x1cd   :  { %v1088_v7 = vpop.eup %1087 }
 0x1ce   :  { %v658_v9 = vmul.f32 %v1088_v7, %v655_v5 }
 0x1d0   :  { %v660_v12 = vmul.f32 %v658_v9, %v650_v53  ;;  %v666_v13 = vrot.slane %v658_v9, %v665_v6 }
 0x1d2   :  { %v661_v14 = vsub.f32 %v659_v10, %v660_v12  ;;  %670 = vrot.lane.b32.xlu1 %v666_v13, %s1092_s25  ;;  %667 = vrot.lane.b32.xlu0 %v666_v13, %s1093_s26 }
 0x1d4   :  { %v685_v15 = vrot.slane %v661_v14, %v665_v6 }
 0x1d6   :  { %673 = vrot.lane.b32.xlu0 %v666_v13, %s1094_s27  ;;  %686 = vrot.lane.b32.xlu1 %v685_v15, %s1093_s26 }
 0x1da   :  { %689 = vrot.lane.b32.xlu0 %v685_v15, %s1092_s25  ;;  %692 = vrot.lane.b32.xlu1 %v685_v15, %s1094_s27 }
 0x244   :  { %v671_v18 = vpop.permute.xlu1 %670  ;;  %v668_v19 = vpop.permute.xlu0 %667 }
 0x245   :  { %v677_v20 = vsel %vm676_vm2, %v658_v9, %v668_v19 }
 0x246   :  { %v678_v21 = vsel %vm314_vm0, %v677_v20, %v671_v18 }
 0x248   :  { %v674_v23 = vpop.permute.xlu0 %673  ;;  %v687_v24 = vpop.permute.xlu1 %686 }
 0x249   :  { %v680_v25 = vsel %vm679_vm3, %v678_v21, %v674_v23  ;;  %v695_v33 = vsel %vm676_vm2, %v661_v14, %v687_v24 }
 0x24a   :  { %v701_v26 = vrot.slane %v680_v25, %v665_v6 }
 0x24c   :  { %v690_v27 = vpop.permute.xlu0 %689  ;;  %v693_v28 = vpop.permute.xlu1 %692  ;;  %v702_v29 = vmul.f32 %v701_v26, %v1264_v8  ;;  %v703_v30 = vmul.f32 %v701_v26, %v1270_v16  ;;  %v704_v32 = vmul.f32 %v701_v26, %v1262_v4  ;;  %v705_v34 = vmul.f32 %v701_v26, %v1266_v11 }
 0x24d   :  { %v706_v36 = vmul.f32 %v701_v26, %v1289_v35  ;;  %v707_v38 = vmul.f32 %v701_v26, %v1298_v50  ;;  %v696_v39 = vsel %vm314_vm0, %v695_v33, %v690_v27  ;;  %v708_v40 = vmul.f32 %v701_v26, %v1292_v43 }
 0x24e   :  { %v709_v42 = vmul.f32 %v701_v26, %v1301_v52  ;;  %v710_v44 = vmul.f32 %v701_v26, %v1315_v17  ;;  %v697_v8 = vsel %vm679_vm3, %v696_v39, %v693_v28  ;;  %v711_v16 = vmul.f32 %v701_v26, %v1323_v22 }
 0x24f   :  { %v712_v4 = vmul.f32 %v701_v26, %v1341_v45  ;;  %v713_v11 = vmul.f32 %v701_v26, %v1350_v54  ;;  %v721_v60 = vrot.slane %v697_v8, %v665_v6  ;;  %v714_v35 = vmul.f32 %v701_v26, %v1335_v37 }
 0x250   :  { %v715_v50 = vmul.f32 %v701_v26, %v1344_v49  ;;  %v716_v46 = vmul.f32 %v701_v26, %v1330_v31  ;;  %v717_v43 = vmul.f32 %v701_v26, %v1338_v41 }
 0x251   :  { %v722_v52 = vadd.f32 %v721_v60, %v702_v29  ;;  %v723_v17 = vadd.f32 %v721_v60, %v703_v30  ;;  %v724_v47 = vadd.f32 %v721_v60, %v704_v32  ;;  %v725_v48 = vadd.f32 %v721_v60, %v705_v34 }
 0x252   :  { %v726_v51 = vadd.f32 %v721_v60, %v706_v36  ;;  %v727_v22 = vadd.f32 %v721_v60, %v707_v38  ;;  %v728_v1 = vadd.f32 %v721_v60, %v708_v40  ;;  %v729_v45 = vadd.f32 %v721_v60, %v709_v42 }
 0x253   :  { %v730_v55 = vadd.f32 %v721_v60, %v710_v44  ;;  %v731_v54 = vadd.f32 %v721_v60, %v711_v16  ;;  %v732_v56 = vadd.f32 %v721_v60, %v712_v4  ;;  %v733_v57 = vadd.f32 %v721_v60, %v713_v11 }
 0x254   :  { %v734_v37 = vadd.f32 %v721_v60, %v714_v35  ;;  %v735_v58 = vadd.f32 %v721_v60, %v715_v50  ;;  %v736_v49 = vadd.f32 %v721_v60, %v716_v46  ;;  %v737_v53 = vadd.f32 %v721_v60, %v717_v43 }
 0x255   :  { %v738_v31 = vmax.f32 %v722_v52, 0.0  ;;  %v739_v59 = vmax.f32 %v723_v17, 0.0  ;;  %v740_v41 = vmax.f32 %v724_v47, 0.0  ;;  %v741_v61 = vmax.f32 %v725_v48, 0.0 }
 0x256   :  { %v742_v62 = vmax.f32 %v726_v51, 0.0  ;;  %v743_v63 = vmax.f32 %v727_v22, 0.0  ;;  %v744_v0 = vmax.f32 %v728_v1, 0.0  ;;  %v745_v2 = vmax.f32 %v729_v45, 0.0 }
 0x257   :  { %v746_v3 = vmax.f32 %v730_v55, 0.0  ;;  %v747_v5 = vmax.f32 %v731_v54, 0.0  ;;  %v748_v6 = vmax.f32 %v732_v56, 0.0  ;;  %v749_v7 = vmax.f32 %v733_v57, 0.0 }
 0x258   :  { %v750_v9 = vmax.f32 %v734_v37, 0.0  ;;  %v751_v10 = vmax.f32 %v735_v58, 0.0  ;;  %v752_v12 = vmax.f32 %v736_v49, 0.0  ;;  %v753_v13 = vmax.f32 %v737_v53, 0.0 }
 0x259   :  { %v905_v14 = vpack.c.bf16 %v738_v31, %v738_v31  ;;  %v906_v15 = vpack.c.bf16 %v739_v59, %v739_v59  ;;  %v907_v18 = vpack.c.bf16 %v740_v41, %v740_v41  ;;  %v908_v19 = vpack.c.bf16 %v741_v61, %v741_v61 }
 0x25a   :  { %v909_v20 = vpack.c.bf16 %v742_v62, %v742_v62  ;;  %v910_v21 = vpack.c.bf16 %v743_v63, %v743_v63  ;;  %v911_v23 = vpack.c.bf16 %v744_v0, %v744_v0  ;;  %v912_v24 = vpack.c.bf16 %v745_v2, %v745_v2 }
 0x25b   :  { %v913_v25 = vpack.c.bf16 %v746_v3, %v746_v3  ;;  %v914_v26 = vpack.c.bf16 %v747_v5, %v747_v5  ;;  %v915_v27 = vpack.c.bf16 %v748_v6, %v748_v6  ;;  %v916_v28 = vpack.c.bf16 %v749_v7, %v749_v7  ;;  %819 = vst.msk [vmem:[%s1472_s4] sm:$0xf] %vm818_vm4, %v905_v14 }
 0x25c   :  { %820 = vst.msk [vmem:[%s1472_s4 + $0x4] sm:$0xf] %vm818_vm4, %v906_v15  ;;  %821 = vst.msk [vmem:[%s1472_s4 + $0x8] sm:$0xf] %vm818_vm4, %v907_v18  ;;  %v917_v29 = vpack.c.bf16 %v750_v9, %v750_v9  ;;  %v918_v30 = vpack.c.bf16 %v751_v10, %v751_v10  ;;  %v919_v32 = vpack.c.bf16 %v752_v12, %v752_v12 }
 0x25d   :  { %822 = vst.msk [vmem:[%s1472_s4 + $0xc] sm:$0xf] %vm818_vm4, %v908_v19  ;;  %v920_v33 = vpack.c.bf16 %v753_v13, %v753_v13  ;;  %823 = vst.msk [vmem:[%s1472_s4 + $0x10] sm:$0xf] %vm818_vm4, %v909_v20 }
 0x25e   :  { %824 = vst.msk [vmem:[%s1472_s4 + $0x14] sm:$0xf] %vm818_vm4, %v910_v21  ;;  %825 = vst.msk [vmem:[%s1472_s4 + $0x18] sm:$0xf] %vm818_vm4, %v911_v23 }
 0x25f   :  { %826 = vst.msk [vmem:[%s1472_s4 + $0x1c] sm:$0xf] %vm818_vm4, %v912_v24  ;;  %827 = vst.msk [vmem:[%s1472_s4 + $0x20] sm:$0xf] %vm818_vm4, %v913_v25 }
 0x260   :  { %828 = vst.msk [vmem:[%s1472_s4 + $0x24] sm:$0xf] %vm818_vm4, %v914_v26  ;;  %829 = vst.msk [vmem:[%s1472_s4 + $0x28] sm:$0xf] %vm818_vm4, %v915_v27 }
 0x261   :  { %830 = vst.msk [vmem:[%s1472_s4 + $0x2c] sm:$0xf] %vm818_vm4, %v916_v28  ;;  %831 = vst.msk [vmem:[%s1472_s4 + $0x30] sm:$0xf] %vm818_vm4, %v917_v29 }
 0x262   :  { %832 = vst.msk [vmem:[%s1472_s4 + $0x34] sm:$0xf] %vm818_vm4, %v918_v30  ;;  %833 = vst.msk [vmem:[%s1472_s4 + $0x38] sm:$0xf] %vm818_vm4, %v919_v32 }
 0x263   :  { %834 = vst.msk [vmem:[%s1472_s4 + $0x3c] sm:$0xf] %vm818_vm4, %v920_v33 }

// kernel: generator_forward.8
= control target key start
LH: loop header
LB: loop body
LE: loop exit
PB: predicated region body
PF: predicated region fallthrough
CT: control target
= control target key end

     0   :  { %v2123_v0 = vmov 0   ;;  %vm442_vm0 = vcmask 130048   ;;  %vm828_vm1 = vcmask 261120   ;;  %s2125_s26 = smov 120   ;;  %s2126_s27 = smov 104   ;;  %vm1211_vm2 = vcmask 64512   ;;  %s3898_s1 = inlined_call_operand.vmem [shape: bf16[144,32], index: 1, kind: input, shape index: {}]   ;;  %s3899_s0 = inlined_call_operand.vmem [shape: bf16[512,144], index: 0, kind: input, shape index: {}]   ;;  %s3900_s2 = inlined_call_operand.vmem [shape: f32[1,8], index: 2, kind: input, shape index: {}]   ;;  %s3901_s3 = inlined_call_operand.vmem [shape: f32[1,8], index: 3, kind: input, shape index: {}]   ;;  %s3902_s4 = inlined_call_operand.vmem [shape: bf16[512,32], index: 4, kind: output, shape index: {}]  }
   0x1   :  { %539 = vmatprep.subr.bf16.mxu0 %v2123_v0  ;;  %v2016_v1 = vld [vmem:[%s3898_s1] sm:$0xff]   ;;  %1991 = vmatprep.subr.bf16.mxu1 %v2123_v0  ;;  %v2017_v2 = vld [vmem:[%s3898_s1 + $0x8] sm:$0xff]   ;;  %v2018_v3 = vld [vmem:[%s3898_s1 + $0x10] sm:$0xff]   ;;  %s2127_s6 = smov 16   ;;  %s2128_s7 = smov 8   ;;  %vm1214_vm3 = vcmask 195584  }
   0x2   :  { %540 = vmatpush1.bf16.msra.mxu0 %v2016_v1  ;;  %2000 = vmatpush1.bf16.msra.mxu1 %v2016_v1  ;;  %v2019_v4 = vld [vmem:[%s3898_s1 + $0x18] sm:$0xff]   ;;  %v2027_v5 = vld [vmem:[%s3899_s0 + $0x4] ss:$8 sps:$4 sm:$0xff]   ;;  %v2022_v9 = vld [vmem:[%s3898_s1 + $0x30] sm:$0xff]   ;;  %s2129_s8 = smov 24   ;;  %vm1689_vm4 = vcmask 257024  }
   0x3   :  { %541 = vmatprep.subr.bf16.mxu0 %v2123_v0  ;;  %1992 = vmatprep.subr.bf16.mxu1 %v2123_v0  ;;  %v2020_v6 = vld [vmem:[%s3898_s1 + $0x20] sm:$0xff]   ;;  %v2021_v7 = vld [vmem:[%s3898_s1 + $0x28] sm:$0xff]   ;;  %v2023_v10 = vld [vmem:[%s3898_s1 + $0x38] sm:$0xff]  }
   0x4   :  { %1831 = vmatprep.mubr.msk.bf16.mxu0 %vm442_vm0, %v2027_v5  ;;  %v2051_v8 = vld [vmem:[%s3899_s0 + $0x104] ss:$8 sps:$4 sm:$0xff]   ;;  %v2025_v12 = vld [vmem:[%s3899_s0] ss:$8 sps:$4 sm:$0xff]   ;;  %v2028_v13 = vld [vmem:[%s3899_s0 + $0x14] ss:$8 sps:$4 sm:$0xff]  }
   0x5   :  { %1847 = vmatprep.mubr.msk.bf16.mxu1 %vm442_vm0, %v2051_v8  ;;  %v2024_v11 = vld [vmem:[%s3898_s1 + $0x40] sm:$0xff]   ;;  %v2055_v15 = vld [vmem:[%s3899_s0 + $0x114] ss:$8 sps:$4 sm:$0xff]   ;;  %v2030_v16 = vld [vmem:[%s3899_s0 + $0x10] ss:$8 sps:$4 sm:$0xff]  }
   0x6   :  { %542 = vmatpush1.bf16.msra.mxu0 %v2017_v2  ;;  %2001 = vmatpush1.bf16.msra.mxu1 %v2017_v2  ;;  %v2049_v14 = vld [vmem:[%s3899_s0 + $0x100] ss:$8 sps:$4 sm:$0xff]   ;;  %v2031_v17 = vld [vmem:[%s3899_s0 + $0x24] ss:$8 sps:$4 sm:$0xff]   ;;  %v2057_v18 = vld [vmem:[%s3899_s0 + $0x110] ss:$8 sps:$4 sm:$0xff]  }
   0x7   :  { %543 = vmatprep.subr.bf16.mxu0 %v2123_v0  ;;  %1993 = vmatprep.subr.bf16.mxu1 %v2123_v0  ;;  %v2061_v19 = vld [vmem:[%s3899_s0 + $0x124] ss:$8 sps:$4 sm:$0xff]   ;;  %v2033_v20 = vld [vmem:[%s3899_s0 + $0x20] ss:$8 sps:$4 sm:$0xff]   ;;  %v2034_v21 = vld [vmem:[%s3899_s0 + $0x34] ss:$8 sps:$4 sm:$0xff]  }
   0x8   :  { %v2063_v22 = vld [vmem:[%s3899_s0 + $0x120] ss:$8 sps:$4 sm:$0xff]   ;;  %v2067_v23 = vld [vmem:[%s3899_s0 + $0x134] ss:$8 sps:$4 sm:$0xff]   ;;  %v2036_v24 = vld [vmem:[%s3899_s0 + $0x30] ss:$8 sps:$4 sm:$0xff]  }
   0x9   :  { %v2069_v25 = vld [vmem:[%s3899_s0 + $0x130] ss:$8 sps:$4 sm:$0xff]   ;;  %v2037_v26 = vld [vmem:[%s3899_s0 + $0x44] ss:$8 sps:$4 sm:$0xff]   ;;  %v2039_v28 = vld [vmem:[%s3899_s0 + $0x40] ss:$8 sps:$4 sm:$0xff]  }
   0xa   :  { %544 = vmatpush1.bf16.msra.mxu0 %v2018_v3  ;;  %2002 = vmatpush1.bf16.msra.mxu1 %v2018_v3  ;;  %v2073_v27 = vld [vmem:[%s3899_s0 + $0x144] ss:$8 sps:$4 sm:$0xff]   ;;  %v2075_v29 = vld [vmem:[%s3899_s0 + $0x140] ss:$8 sps:$4 sm:$0xff]   ;;  %v2040_v30 = vld [vmem:[%s3899_s0 + $0x54] ss:$8 sps:$4 sm:$0xff]  }
   0xb   :  { %545 = vmatprep.subr.bf16.mxu0 %v2123_v0  ;;  %1994 = vmatprep.subr.bf16.mxu1 %v2123_v0  ;;  %v2079_v31 = vld [vmem:[%s3899_s0 + $0x154] ss:$8 sps:$4 sm:$0xff]   ;;  %v2042_v32 = vld [vmem:[%s3899_s0 + $0x50] ss:$8 sps:$4 sm:$0xff]   ;;  %v2043_v34 = vld [vmem:[%s3899_s0 + $0x64] ss:$8 sps:$4 sm:$0xff]  }
   0xc   :  { %v2081_v33 = vld [vmem:[%s3899_s0 + $0x150] ss:$8 sps:$4 sm:$0xff]   ;;  %v2085_v35 = vld [vmem:[%s3899_s0 + $0x164] ss:$8 sps:$4 sm:$0xff]   ;;  %v2045_v36 = vld [vmem:[%s3899_s0 + $0x60] ss:$8 sps:$4 sm:$0xff]  }
   0xd   :  { %v2087_v37 = vld [vmem:[%s3899_s0 + $0x160] ss:$8 sps:$4 sm:$0xff]   ;;  %v2046_v38 = vld [vmem:[%s3899_s0 + $0x74] ss:$8 sps:$4 sm:$0xff]   ;;  %v2048_v40 = vld [vmem:[%s3899_s0 + $0x70] ss:$8 sps:$4 sm:$0xff]  }
   0xe   :  { %546 = vmatpush1.bf16.msra.mxu0 %v2019_v4  ;;  %2003 = vmatpush1.bf16.msra.mxu1 %v2019_v4  ;;  %v2091_v39 = vld [vmem:[%s3899_s0 + $0x174] ss:$8 sps:$4 sm:$0xff]   ;;  %v2093_v41 = vld [vmem:[%s3899_s0 + $0x170] ss:$8 sps:$4 sm:$0xff]   ;;  %v2052_v42 = vld [vmem:[%s3899_s0 + $0x84] ss:$8 sps:$4 sm:$0xff]  }
   0xf   :  { %547 = vmatprep.subr.bf16.mxu0 %v2123_v0  ;;  %1995 = vmatprep.subr.bf16.mxu1 %v2123_v0  ;;  %v2097_v43 = vld [vmem:[%s3899_s0 + $0x184] ss:$8 sps:$4 sm:$0xff]   ;;  %v2054_v44 = vld [vmem:[%s3899_s0 + $0x80] ss:$8 sps:$4 sm:$0xff]   ;;  %v2058_v46 = vld [vmem:[%s3899_s0 + $0x94] ss:$8 sps:$4 sm:$0xff]  }
  0x10   :  { %v2099_v45 = vld [vmem:[%s3899_s0 + $0x180] ss:$8 sps:$4 sm:$0xff]   ;;  %v2100_v47 = vld [vmem:[%s3899_s0 + $0x194] ss:$8 sps:$4 sm:$0xff]   ;;  %v2060_v48 = vld [vmem:[%s3899_s0 + $0x90] ss:$8 sps:$4 sm:$0xff]  }
  0x11   :  { %v2102_v49 = vld [vmem:[%s3899_s0 + $0x190] ss:$8 sps:$4 sm:$0xff]   ;;  %v2064_v50 = vld [vmem:[%s3899_s0 + $0xa4] ss:$8 sps:$4 sm:$0xff]   ;;  %v2066_v52 = vld [vmem:[%s3899_s0 + $0xa0] ss:$8 sps:$4 sm:$0xff]  }
  0x12   :  { %548 = vmatpush1.bf16.msra.mxu0 %v2020_v6  ;;  %2004 = vmatpush1.bf16.msra.mxu1 %v2020_v6  ;;  %v2103_v51 = vld [vmem:[%s3899_s0 + $0x1a4] ss:$8 sps:$4 sm:$0xff]   ;;  %v2105_v53 = vld [vmem:[%s3899_s0 + $0x1a0] ss:$8 sps:$4 sm:$0xff]   ;;  %v2070_v54 = vld [vmem:[%s3899_s0 + $0xb4] ss:$8 sps:$4 sm:$0xff]  }
  0x13   :  { %549 = vmatprep.subr.bf16.mxu0 %v2123_v0  ;;  %1996 = vmatprep.subr.bf16.mxu1 %v2123_v0  ;;  %v2106_v55 = vld [vmem:[%s3899_s0 + $0x1b4] ss:$8 sps:$4 sm:$0xff]   ;;  %v2072_v56 = vld [vmem:[%s3899_s0 + $0xb0] ss:$8 sps:$4 sm:$0xff]   ;;  %v2076_v58 = vld [vmem:[%s3899_s0 + $0xc4] ss:$8 sps:$4 sm:$0xff]  }
  0x14   :  { %v2108_v57 = vld [vmem:[%s3899_s0 + $0x1b0] ss:$8 sps:$4 sm:$0xff]   ;;  %v2109_v59 = vld [vmem:[%s3899_s0 + $0x1c4] ss:$8 sps:$4 sm:$0xff]   ;;  %v2078_v60 = vld [vmem:[%s3899_s0 + $0xc0] ss:$8 sps:$4 sm:$0xff]  }
  0x15   :  { %v2111_v61 = vld [vmem:[%s3899_s0 + $0x1c0] ss:$8 sps:$4 sm:$0xff]   ;;  %v2082_v62 = vld [vmem:[%s3899_s0 + $0xd4] ss:$8 sps:$4 sm:$0xff]   ;;  %v2114_v1 = vld [vmem:[%s3899_s0 + $0x1d0] ss:$8 sps:$4 sm:$0xff]  }
  0x16   :  { %550 = vmatpush1.bf16.msra.mxu0 %v2021_v7  ;;  %2005 = vmatpush1.bf16.msra.mxu1 %v2021_v7  ;;  %v2112_v63 = vld [vmem:[%s3899_s0 + $0x1d4] ss:$8 sps:$4 sm:$0xff]   ;;  %v2088_v2 = vld [vmem:[%s3899_s0 + $0xe4] ss:$8 sps:$4 sm:$0xff]   ;;  %v2090_v4 = vld [vmem:[%s3899_s0 + $0xe0] ss:$8 sps:$4 sm:$0xff]  }
  0x17   :  { %551 = vmatprep.subr.bf16.mxu0 %v2123_v0  ;;  %1997 = vmatprep.subr.bf16.mxu1 %v2123_v0  ;;  %v2115_v3 = vld [vmem:[%s3899_s0 + $0x1e4] ss:$8 sps:$4 sm:$0xff]   ;;  %v2117_v5 = vld [vmem:[%s3899_s0 + $0x1e0] ss:$8 sps:$4 sm:$0xff]   ;;  %v2094_v6 = vld [vmem:[%s3899_s0 + $0xf4] ss:$8 sps:$4 sm:$0xff]  }
  0x18   :  { %v2118_v7 = vld [vmem:[%s3899_s0 + $0x1f4] ss:$8 sps:$4 sm:$0xff]   ;;  %v2096_v8 = vld [vmem:[%s3899_s0 + $0xf0] ss:$8 sps:$4 sm:$0xff]  }
  0x1a   :  { %552 = vmatpush1.bf16.msra.mxu0 %v2022_v9  ;;  %2006 = vmatpush1.bf16.msra.mxu1 %v2022_v9  ;;  %v2120_v9 = vld [vmem:[%s3899_s0 + $0x1f0] ss:$8 sps:$4 sm:$0xff]  }
  0x1b   :  { %553 = vmatprep.subr.bf16.mxu0 %v2123_v0  ;;  %1998 = vmatprep.subr.bf16.mxu1 %v2123_v0 }
  0x1e   :  { %554 = vmatpush1.bf16.msra.mxu0 %v2023_v10  ;;  %2007 = vmatpush1.bf16.msra.mxu1 %v2023_v10 }
  0x1f   :  { %555 = vmatprep.subr.bf16.mxu0 %v2123_v0  ;;  %1999 = vmatprep.subr.bf16.mxu1 %v2123_v0  ;;  %v2084_v0 = vld [vmem:[%s3899_s0 + $0xd0] ss:$8 sps:$4 sm:$0xff]   ;;  %s2124_s0 = smov 112  }
  0x22   :  { %556 = vmatpush1.bf16.msra.mxu0 %v2024_v11  ;;  %2008 = vmatpush1.bf16.msra.mxu1 %v2024_v11 }
  0x25   :  { %572 = vmatmul.mubr.bf16.vlgmr.msra.gmra.mrb[0].mxu0 %v2025_v12  ;;  %700 = vmatmul.mubr.bf16.vlgmr.msra.gmra.mrb[0].mxu1 %v2049_v14 }
  0x26   :  { %1832 = vmatprep.mubr.msk.bf16.mxu0 %vm442_vm0, %v2028_v13  ;;  %1848 = vmatprep.mubr.msk.bf16.mxu1 %vm442_vm0, %v2055_v15 }
  0x2d   :  { %580 = vmatmul.mubr.bf16.gmra.mrb[4].mxu0 %v2030_v16  ;;  %708 = vmatmul.mubr.bf16.gmra.mrb[4].mxu1 %v2057_v18 }
  0x2e   :  { %1833 = vmatprep.mubr.msk.bf16.mxu0 %vm442_vm0, %v2031_v17  ;;  %1849 = vmatprep.mubr.msk.bf16.mxu1 %vm442_vm0, %v2061_v19 }
  0x35   :  { %588 = vmatmul.mubr.bf16.gmra.mrb[8].mxu0 %v2033_v20  ;;  %716 = vmatmul.mubr.bf16.gmra.mrb[8].mxu1 %v2063_v22 }
  0x36   :  { %1834 = vmatprep.mubr.msk.bf16.mxu0 %vm442_vm0, %v2034_v21  ;;  %1850 = vmatprep.mubr.msk.bf16.mxu1 %vm442_vm0, %v2067_v23 }
  0x3d   :  { %596 = vmatmul.mubr.bf16.gmra.mrb[12].mxu0 %v2036_v24  ;;  %724 = vmatmul.mubr.bf16.gmra.mrb[12].mxu1 %v2069_v25 }
  0x3e   :  { %1835 = vmatprep.mubr.msk.bf16.mxu0 %vm442_vm0, %v2037_v26  ;;  %1851 = vmatprep.mubr.msk.bf16.mxu1 %vm442_vm0, %v2073_v27 }
  0x45   :  { %604 = vmatmul.mubr.bf16.gmra.mrb[16].mxu0 %v2039_v28  ;;  %732 = vmatmul.mubr.bf16.gmra.mrb[16].mxu1 %v2075_v29 }
  0x46   :  { %1836 = vmatprep.mubr.msk.bf16.mxu0 %vm442_vm0, %v2040_v30  ;;  %1852 = vmatprep.mubr.msk.bf16.mxu1 %vm442_vm0, %v2079_v31 }
  0x4d   :  { %612 = vmatmul.mubr.bf16.gmra.mrb[20].mxu0 %v2042_v32  ;;  %740 = vmatmul.mubr.bf16.gmra.mrb[20].mxu1 %v2081_v33 }
  0x4e   :  { %1837 = vmatprep.mubr.msk.bf16.mxu0 %vm442_vm0, %v2043_v34  ;;  %1853 = vmatprep.mubr.msk.bf16.mxu1 %vm442_vm0, %v2085_v35 }
  0x55   :  { %620 = vmatmul.mubr.bf16.gmra.mrb[24].mxu0 %v2045_v36  ;;  %748 = vmatmul.mubr.bf16.gmra.mrb[24].mxu1 %v2087_v37 }
  0x56   :  { %1838 = vmatprep.mubr.msk.bf16.mxu0 %vm442_vm0, %v2046_v38  ;;  %1854 = vmatprep.mubr.msk.bf16.mxu1 %vm442_vm0, %v2091_v39 }
  0x5d   :  { %628 = vmatmul.mubr.bf16.gmra.mrb[28].mxu0 %v2048_v40  ;;  %756 = vmatmul.mubr.bf16.gmra.mrb[28].mxu1 %v2093_v41 }
  0x5e   :  { %1839 = vmatprep.mubr.msk.bf16.mxu0 %vm442_vm0, %v2052_v42  ;;  %1855 = vmatprep.mubr.msk.bf16.mxu1 %vm442_vm0, %v2097_v43 }
  0x65   :  { %636 = vmatmul.mubr.bf16.gmra.mrb[32].mxu0 %v2054_v44  ;;  %764 = vmatmul.mubr.bf16.gmra.mrb[32].mxu1 %v2099_v45 }
  0x66   :  { %1840 = vmatprep.mubr.msk.bf16.mxu0 %vm442_vm0, %v2058_v46  ;;  %1856 = vmatprep.mubr.msk.bf16.mxu1 %vm442_vm0, %v2100_v47 }
  0x6d   :  { %644 = vmatmul.mubr.bf16.gmra.mrb[36].mxu0 %v2060_v48  ;;  %772 = vmatmul.mubr.bf16.gmra.mrb[36].mxu1 %v2102_v49 }
  0x6e   :  { %1841 = vmatprep.mubr.msk.bf16.mxu0 %vm442_vm0, %v2064_v50  ;;  %1857 = vmatprep.mubr.msk.bf16.mxu1 %vm442_vm0, %v2103_v51 }
  0x75   :  { %652 = vmatmul.mubr.bf16.gmra.mrb[40].mxu0 %v2066_v52  ;;  %780 = vmatmul.mubr.bf16.gmra.mrb[40].mxu1 %v2105_v53 }
  0x76   :  { %1842 = vmatprep.mubr.msk.bf16.mxu0 %vm442_vm0, %v2070_v54  ;;  %1858 = vmatprep.mubr.msk.bf16.mxu1 %vm442_vm0, %v2106_v55 }
  0x7d   :  { %660 = vmatmul.mubr.bf16.gmra.mrb[44].mxu0 %v2072_v56  ;;  %788 = vmatmul.mubr.bf16.gmra.mrb[44].mxu1 %v2108_v57 }
  0x7e   :  { %1843 = vmatprep.mubr.msk.bf16.mxu0 %vm442_vm0, %v2076_v58  ;;  %1859 = vmatprep.mubr.msk.bf16.mxu1 %vm442_vm0, %v2109_v59 }
  0x85   :  { %668 = vmatmul.mubr.bf16.gmra.mrb[48].mxu0 %v2078_v60  ;;  %796 = vmatmul.mubr.bf16.gmra.mrb[48].mxu1 %v2111_v61 }
  0x86   :  { %1844 = vmatprep.mubr.msk.bf16.mxu0 %vm442_vm0, %v2082_v62  ;;  %1860 = vmatprep.mubr.msk.bf16.mxu1 %vm442_vm0, %v2112_v63 }
  0x8d   :  { %676 = vmatmul.mubr.bf16.gmra.mrb[52].mxu0 %v2084_v0  ;;  %804 = vmatmul.mubr.bf16.gmra.mrb[52].mxu1 %v2114_v1 }
  0x8e   :  { %1845 = vmatprep.mubr.msk.bf16.mxu0 %vm442_vm0, %v2088_v2  ;;  %1861 = vmatprep.mubr.msk.bf16.mxu1 %vm442_vm0, %v2115_v3 }
  0x95   :  { %684 = vmatmul.mubr.bf16.gmra.mrb[56].mxu0 %v2090_v4  ;;  %812 = vmatmul.mubr.bf16.gmra.mrb[56].mxu1 %v2117_v5 }
  0x96   :  { %1846 = vmatprep.mubr.msk.bf16.mxu0 %vm442_vm0, %v2094_v6  ;;  %1862 = vmatprep.mubr.msk.bf16.mxu1 %vm442_vm0, %v2118_v7 }
  0x9d   :  { %692 = vmatmul.mubr.bf16.gmra.mrb[60].mxu0 %v2096_v8  ;;  %820 = vmatmul.mubr.bf16.gmra.mrb[60].mxu1 %v2120_v9 }
  0xf8   :  { %v2406_v10 = vpop.f32.mrb[0].mxu0  ;;  %v2408_v11 = vpop.f32.mrb[0].mxu1 }
  0xf9   :  { %v962_v12 = vmul.f32 %v2406_v10, %v2406_v10  ;;  %v575_v13 = vpop.f32.mrb[1].mxu0  ;;  %v703_v14 = vpop.f32.mrb[1].mxu1  ;;  %v829_v17 = vsel %vm828_vm1, %v2406_v10, 0.0 }
  0xfa   :  { %v2412_v15 = vpop.f32.mrb[2].mxu0  ;;  %v2414_v16 = vpop.f32.mrb[2].mxu1 }
  0xfb   :  { %v830_v18 = vsel %vm828_vm1, %v2412_v15, 0.0  ;;  %v963_v19 = vmul.f32 %v2412_v15, %v2412_v15  ;;  %v578_v20 = vpop.f32.mrb[3].mxu0  ;;  %v706_v21 = vpop.f32.mrb[3].mxu1  ;;  %v1026_v23 = vsel %vm828_vm1, %v962_v12, 0.0 }
  0xfc   :  { %v831_v22 = vadd.f32 %v830_v18, %v829_v17 }
  0xfd   :  { %v1027_v24 = vsel %vm828_vm1, %v963_v19, 0.0 }
  0xfe   :  { %v1028_v25 = vadd.f32 %v1027_v24, %v1026_v23 }
 0x100   :  { %v2424_v26 = vpop.f32.mrb[4].mxu0  ;;  %v2426_v27 = vpop.f32.mrb[4].mxu1 }
 0x101   :  { %v832_v28 = vsel %vm828_vm1, %v2424_v26, 0.0  ;;  %v964_v29 = vmul.f32 %v2424_v26, %v2424_v26  ;;  %v583_v30 = vpop.f32.mrb[5].mxu0  ;;  %v711_v31 = vpop.f32.mrb[5].mxu1 }
 0x102   :  { %v833_v32 = vadd.f32 %v832_v28, %v831_v22  ;;  %v2432_v33 = vpop.f32.mrb[6].mxu0  ;;  %v2434_v34 = vpop.f32.mrb[6].mxu1 }
 0x103   :  { %v1029_v35 = vsel %vm828_vm1, %v964_v29, 0.0  ;;  %v834_v36 = vsel %vm828_vm1, %v2432_v33, 0.0  ;;  %v965_v37 = vmul.f32 %v2432_v33, %v2432_v33  ;;  %v586_v38 = vpop.f32.mrb[7].mxu0  ;;  %v714_v39 = vpop.f32.mrb[7].mxu1 }
 0x104   :  { %v1030_v40 = vadd.f32 %v1029_v35, %v1028_v25  ;;  %v835_v41 = vadd.f32 %v834_v36, %v833_v32 }
 0x105   :  { %v1031_v42 = vsel %vm828_vm1, %v965_v37, 0.0 }
 0x106   :  { %v1032_v43 = vadd.f32 %v1031_v42, %v1030_v40 }
 0x108   :  { %v2442_v44 = vpop.f32.mrb[8].mxu0  ;;  %v2444_v45 = vpop.f32.mrb[8].mxu1 }
 0x109   :  { %v836_v46 = vsel %vm828_vm1, %v2442_v44, 0.0  ;;  %v966_v47 = vmul.f32 %v2442_v44, %v2442_v44  ;;  %v591_v48 = vpop.f32.mrb[9].mxu0  ;;  %v719_v49 = vpop.f32.mrb[9].mxu1 }
 0x10a   :  { %v837_v50 = vadd.f32 %v836_v46, %v835_v41  ;;  %v2450_v51 = vpop.f32.mrb[10].mxu0  ;;  %v2452_v52 = vpop.f32.mrb[10].mxu1 }
 0x10b   :  { %v1033_v53 = vsel %vm828_vm1, %v966_v47, 0.0  ;;  %v838_v54 = vsel %vm828_vm1, %v2450_v51, 0.0  ;;  %v967_v55 = vmul.f32 %v2450_v51, %v2450_v51  ;;  %v594_v56 = vpop.f32.mrb[11].mxu0  ;;  %v722_v57 = vpop.f32.mrb[11].mxu1 }
 0x10c   :  { %v1034_v58 = vadd.f32 %v1033_v53, %v1032_v43  ;;  %v839_v59 = vadd.f32 %v838_v54, %v837_v50 }
 0x10d   :  { %v1035_v60 = vsel %vm828_vm1, %v967_v55, 0.0 }
 0x10e   :  { %v1036_v61 = vadd.f32 %v1035_v60, %v1034_v58 }
 0x110   :  { %v2460_v62 = vpop.f32.mrb[12].mxu0  ;;  %v2462_v63 = vpop.f32.mrb[12].mxu1 }
 0x111   :  { %v840_v0 = vsel %vm828_vm1, %v2460_v62, 0.0  ;;  %v968_v1 = vmul.f32 %v2460_v62, %v2460_v62  ;;  %v599_v2 = vpop.f32.mrb[13].mxu0  ;;  %v727_v3 = vpop.f32.mrb[13].mxu1 }
 0x112   :  { %v841_v4 = vadd.f32 %v840_v0, %v839_v59  ;;  %v2468_v5 = vpop.f32.mrb[14].mxu0  ;;  %v2470_v6 = vpop.f32.mrb[14].mxu1 }
 0x113   :  { %v1037_v7 = vsel %vm828_vm1, %v968_v1, 0.0  ;;  %v842_v8 = vsel %vm828_vm1, %v2468_v5, 0.0  ;;  %v969_v9 = vmul.f32 %v2468_v5, %v2468_v5  ;;  %v602_v12 = vpop.f32.mrb[15].mxu0  ;;  %v730_v13 = vpop.f32.mrb[15].mxu1 }
 0x114   :  { %v1038_v14 = vadd.f32 %v1037_v7, %v1036_v61  ;;  %v843_v17 = vadd.f32 %v842_v8, %v841_v4 }
 0x115   :  { %v1039_v18 = vsel %vm828_vm1, %v969_v9, 0.0 }
 0x116   :  { %v1040_v19 = vadd.f32 %v1039_v18, %v1038_v14 }
 0x118   :  { %v2478_v20 = vpop.f32.mrb[16].mxu0  ;;  %v2480_v21 = vpop.f32.mrb[16].mxu1 }
 0x119   :  { %v844_v22 = vsel %vm828_vm1, %v2478_v20, 0.0  ;;  %v970_v23 = vmul.f32 %v2478_v20, %v2478_v20  ;;  %v607_v24 = vpop.f32.mrb[17].mxu0  ;;  %v735_v25 = vpop.f32.mrb[17].mxu1 }
 0x11a   :  { %v845_v28 = vadd.f32 %v844_v22, %v843_v17  ;;  %v2486_v29 = vpop.f32.mrb[18].mxu0  ;;  %v2488_v30 = vpop.f32.mrb[18].mxu1 }
 0x11b   :  { %v1041_v31 = vsel %vm828_vm1, %v970_v23, 0.0  ;;  %v846_v32 = vsel %vm828_vm1, %v2486_v29, 0.0  ;;  %v971_v35 = vmul.f32 %v2486_v29, %v2486_v29  ;;  %v610_v36 = vpop.f32.mrb[19].mxu0  ;;  %v738_v37 = vpop.f32.mrb[19].mxu1 }
 0x11c   :  { %v1042_v38 = vadd.f32 %v1041_v31, %v1040_v19  ;;  %v847_v39 = vadd.f32 %v846_v32, %v845_v28 }
 0x11d   :  { %v1043_v40 = vsel %vm828_vm1, %v971_v35, 0.0 }
 0x11e   :  { %v1044_v41 = vadd.f32 %v1043_v40, %v1042_v38 }
 0x120   :  { %v2496_v42 = vpop.f32.mrb[20].mxu0  ;;  %v2498_v43 = vpop.f32.mrb[20].mxu1 }
 0x121   :  { %v848_v46 = vsel %vm828_vm1, %v2496_v42, 0.0  ;;  %v972_v47 = vmul.f32 %v2496_v42, %v2496_v42  ;;  %v615_v48 = vpop.f32.mrb[21].mxu0  ;;  %v743_v49 = vpop.f32.mrb[21].mxu1 }
 0x122   :  { %v849_v50 = vadd.f32 %v848_v46, %v847_v39  ;;  %v2504_v53 = vpop.f32.mrb[22].mxu0  ;;  %v2506_v54 = vpop.f32.mrb[22].mxu1 }
 0x123   :  { %v1045_v55 = vsel %vm828_vm1, %v972_v47, 0.0  ;;  %v850_v56 = vsel %vm828_vm1, %v2504_v53, 0.0  ;;  %v973_v57 = vmul.f32 %v2504_v53, %v2504_v53  ;;  %v618_v58 = vpop.f32.mrb[23].mxu0  ;;  %v746_v59 = vpop.f32.mrb[23].mxu1 }
 0x124   :  { %v1046_v60 = vadd.f32 %v1045_v55, %v1044_v41  ;;  %v851_v61 = vadd.f32 %v850_v56, %v849_v50 }
 0x125   :  { %v1047_v0 = vsel %vm828_vm1, %v973_v57, 0.0 }
 0x126   :  { %v1048_v1 = vadd.f32 %v1047_v0, %v1046_v60 }
 0x128   :  { %v2514_v2 = vpop.f32.mrb[24].mxu0  ;;  %v2516_v3 = vpop.f32.mrb[24].mxu1 }
 0x129   :  { %v852_v4 = vsel %vm828_vm1, %v2514_v2, 0.0  ;;  %v974_v7 = vmul.f32 %v2514_v2, %v2514_v2  ;;  %v623_v8 = vpop.f32.mrb[25].mxu0  ;;  %v751_v9 = vpop.f32.mrb[25].mxu1 }
 0x12a   :  { %v853_v12 = vadd.f32 %v852_v4, %v851_v61  ;;  %v2522_v13 = vpop.f32.mrb[26].mxu0  ;;  %v2524_v14 = vpop.f32.mrb[26].mxu1 }
 0x12b   :  { %v1049_v17 = vsel %vm828_vm1, %v974_v7, 0.0  ;;  %v854_v18 = vsel %vm828_vm1, %v2522_v13, 0.0  ;;  %v975_v19 = vmul.f32 %v2522_v13, %v2522_v13  ;;  %v626_v22 = vpop.f32.mrb[27].mxu0  ;;  %v754_v23 = vpop.f32.mrb[27].mxu1 }
 0x12c   :  { %v1050_v24 = vadd.f32 %v1049_v17, %v1048_v1  ;;  %v855_v25 = vadd.f32 %v854_v18, %v853_v12 }
 0x12d   :  { %v1051_v28 = vsel %vm828_vm1, %v975_v19, 0.0 }
 0x12e   :  { %v1052_v31 = vadd.f32 %v1051_v28, %v1050_v24 }
 0x130   :  { %v2532_v32 = vpop.f32.mrb[28].mxu0  ;;  %v2534_v35 = vpop.f32.mrb[28].mxu1 }
 0x131   :  { %3943 = vst [vmem:[#allocation2_spill] sm:$0xff] %v2532_v32  ;;  %v856_v36 = vsel %vm828_vm1, %v2532_v32, 0.0  ;;  %v976_v37 = vmul.f32 %v2532_v32, %v2532_v32  ;;  %v631_v38 = vpop.f32.mrb[29].mxu0  ;;  %v759_v39 = vpop.f32.mrb[29].mxu1  ;;  %v894_v32 = vsel %vm828_vm1, %v2414_v16, 0.0 }
 0x132   :  { %v857_v40 = vadd.f32 %v856_v36, %v855_v25  ;;  %v2540_v41 = vpop.f32.mrb[30].mxu0  ;;  %v2542_v46 = vpop.f32.mrb[30].mxu1 }
 0x133   :  { %3944 = vst [vmem:[#allocation3_spill] sm:$0xff] %v2540_v41  ;;  %v1053_v47 = vsel %vm828_vm1, %v976_v37, 0.0  ;;  %v858_v48 = vsel %vm828_vm1, %v2540_v41, 0.0  ;;  %v977_v49 = vmul.f32 %v2540_v41, %v2540_v41  ;;  %v634_v50 = vpop.f32.mrb[31].mxu0  ;;  %v762_v55 = vpop.f32.mrb[31].mxu1 }
 0x134   :  { %v1054_v56 = vadd.f32 %v1053_v47, %v1052_v31  ;;  %v859_v57 = vadd.f32 %v858_v48, %v857_v40 }
 0x135   :  { %v1055_v58 = vsel %vm828_vm1, %v977_v49, 0.0 }
 0x136   :  { %v1056_v59 = vadd.f32 %v1055_v58, %v1054_v56 }
 0x138   :  { %v2550_v60 = vpop.f32.mrb[32].mxu0  ;;  %v2552_v61 = vpop.f32.mrb[32].mxu1 }
 0x139   :  { %3945 = vst [vmem:[#allocation4_spill] sm:$0xff] %v2550_v60  ;;  %v860_v0 = vsel %vm828_vm1, %v2550_v60, 0.0  ;;  %v978_v1 = vmul.f32 %v2550_v60, %v2550_v60  ;;  %v639_v4 = vpop.f32.mrb[33].mxu0  ;;  %v767_v7 = vpop.f32.mrb[33].mxu1 }
 0x13a   :  { %v861_v8 = vadd.f32 %v860_v0, %v859_v57  ;;  %v2558_v9 = vpop.f32.mrb[34].mxu0  ;;  %v2560_v12 = vpop.f32.mrb[34].mxu1 }
 0x13b   :  { %3946 = vst [vmem:[#allocation5_spill] sm:$0xff] %v2558_v9  ;;  %v1057_v17 = vsel %vm828_vm1, %v978_v1, 0.0  ;;  %v862_v18 = vsel %vm828_vm1, %v2558_v9, 0.0  ;;  %v979_v19 = vmul.f32 %v2558_v9, %v2558_v9  ;;  %v642_v22 = vpop.f32.mrb[35].mxu0  ;;  %v770_v23 = vpop.f32.mrb[35].mxu1 }
 0x13c   :  { %v1058_v24 = vadd.f32 %v1057_v17, %v1056_v59  ;;  %v863_v25 = vadd.f32 %v862_v18, %v861_v8 }
 0x13d   :  { %v1059_v28 = vsel %vm828_vm1, %v979_v19, 0.0 }
 0x13e   :  { %v1060_v31 = vadd.f32 %v1059_v28, %v1058_v24 }
 0x140   :  { %v2568_v36 = vpop.f32.mrb[36].mxu0  ;;  %v2570_v37 = vpop.f32.mrb[36].mxu1 }
 0x141   :  { %3947 = vst [vmem:[#allocation6_spill] sm:$0xff] %v2568_v36  ;;  %v864_v38 = vsel %vm828_vm1, %v2568_v36, 0.0  ;;  %v980_v39 = vmul.f32 %v2568_v36, %v2568_v36  ;;  %v647_v40 = vpop.f32.mrb[37].mxu0  ;;  %v775_v47 = vpop.f32.mrb[37].mxu1 }
 0x142   :  { %v865_v48 = vadd.f32 %v864_v38, %v863_v25  ;;  %v2576_v49 = vpop.f32.mrb[38].mxu0  ;;  %v2578_v50 = vpop.f32.mrb[38].mxu1 }
 0x143   :  { %3948 = vst [vmem:[#allocation7_spill] sm:$0xff] %v2576_v49  ;;  %v1061_v55 = vsel %vm828_vm1, %v980_v39, 0.0  ;;  %v866_v56 = vsel %vm828_vm1, %v2576_v49, 0.0  ;;  %v981_v57 = vmul.f32 %v2576_v49, %v2576_v49  ;;  %v650_v58 = vpop.f32.mrb[39].mxu0  ;;  %v778_v59 = vpop.f32.mrb[39].mxu1 }
 0x144   :  { %v1062_v0 = vadd.f32 %v1061_v55, %v1060_v31  ;;  %v867_v1 = vadd.f32 %v866_v56, %v865_v48 }
 0x145   :  { %v1063_v4 = vsel %vm828_vm1, %v981_v57, 0.0 }
 0x146   :  { %v1064_v7 = vadd.f32 %v1063_v4, %v1062_v0 }
 0x148   :  { %v2586_v8 = vpop.f32.mrb[40].mxu0  ;;  %v2588_v17 = vpop.f32.mrb[40].mxu1 }
 0x149   :  { %3949 = vst [vmem:[#allocation8_spill] sm:$0xff] %v2586_v8  ;;  %v868_v18 = vsel %vm828_vm1, %v2586_v8, 0.0  ;;  %v982_v19 = vmul.f32 %v2586_v8, %v2586_v8  ;;  %v655_v22 = vpop.f32.mrb[41].mxu0  ;;  %v783_v23 = vpop.f32.mrb[41].mxu1 }
 0x14a   :  { %v869_v24 = vadd.f32 %v868_v18, %v867_v1  ;;  %v2594_v25 = vpop.f32.mrb[42].mxu0  ;;  %v2596_v28 = vpop.f32.mrb[42].mxu1 }
 0x14b   :  { %3950 = vst [vmem:[#allocation9_spill] sm:$0xff] %v2594_v25  ;;  %v1065_v31 = vsel %vm828_vm1, %v982_v19, 0.0  ;;  %v870_v38 = vsel %vm828_vm1, %v2594_v25, 0.0  ;;  %v983_v39 = vmul.f32 %v2594_v25, %v2594_v25  ;;  %v658_v40 = vpop.f32.mrb[43].mxu0  ;;  %v786_v47 = vpop.f32.mrb[43].mxu1 }
 0x14c   :  { %v1066_v48 = vadd.f32 %v1065_v31, %v1064_v7  ;;  %v871_v55 = vadd.f32 %v870_v38, %v869_v24 }
 0x14d   :  { %v1067_v56 = vsel %vm828_vm1, %v983_v39, 0.0 }
 0x14e   :  { %v1068_v57 = vadd.f32 %v1067_v56, %v1066_v48 }
 0x150   :  { %v2604_v58 = vpop.f32.mrb[44].mxu0  ;;  %v2606_v59 = vpop.f32.mrb[44].mxu1 }
 0x151   :  { %3951 = vst [vmem:[#allocation10_spill] sm:$0xff] %v2604_v58  ;;  %v872_v0 = vsel %vm828_vm1, %v2604_v58, 0.0  ;;  %v984_v1 = vmul.f32 %v2604_v58, %v2604_v58  ;;  %v663_v4 = vpop.f32.mrb[45].mxu0  ;;  %v791_v18 = vpop.f32.mrb[45].mxu1 }
 0x152   :  { %v873_v19 = vadd.f32 %v872_v0, %v871_v55  ;;  %v2612_v22 = vpop.f32.mrb[46].mxu0  ;;  %v2614_v7 = vpop.f32.mrb[46].mxu1 }
 0x153   :  { %3952 = vst [vmem:[#allocation11_spill] sm:$0xff] %v2612_v22  ;;  %v1069_v23 = vsel %vm828_vm1, %v984_v1, 0.0  ;;  %v874_v24 = vsel %vm828_vm1, %v2612_v22, 0.0  ;;  %v985_v31 = vmul.f32 %v2612_v22, %v2612_v22  ;;  %v666_v38 = vpop.f32.mrb[47].mxu0  ;;  %v794_v39 = vpop.f32.mrb[47].mxu1 }
 0x154   :  { %v1070_v40 = vadd.f32 %v1069_v23, %v1068_v57  ;;  %v875_v47 = vadd.f32 %v874_v24, %v873_v19 }
 0x155   :  { %v1071_v48 = vsel %vm828_vm1, %v985_v31, 0.0 }
 0x156   :  { %v1072_v56 = vadd.f32 %v1071_v48, %v1070_v40 }
 0x158   :  { %v2622_v55 = vpop.f32.mrb[48].mxu0  ;;  %v2624_v0 = vpop.f32.mrb[48].mxu1 }
 0x159   :  { %3953 = vst [vmem:[#allocation12_spill] sm:$0xff] %v2622_v55  ;;  %v876_v1 = vsel %vm828_vm1, %v2622_v55, 0.0  ;;  %v986_v4 = vmul.f32 %v2622_v55, %v2622_v55  ;;  %v671_v18 = vpop.f32.mrb[49].mxu0  ;;  %v799_v58 = vpop.f32.mrb[49].mxu1 }
 0x15a   :  { %v877_v22 = vadd.f32 %v876_v1, %v875_v47  ;;  %v2630_v38 = vpop.f32.mrb[50].mxu0  ;;  %v2632_v57 = vpop.f32.mrb[50].mxu1 }
 0x15b   :  { %3954 = vst [vmem:[#allocation13_spill] sm:$0xff] %v2630_v38  ;;  %3955 = vst [vmem:[#allocation14_spill] sm:$0xff] %v2632_v57  ;;  %v1073_v19 = vsel %vm828_vm1, %v986_v4, 0.0  ;;  %v878_v23 = vsel %vm828_vm1, %v2630_v38, 0.0  ;;  %v987_v24 = vmul.f32 %v2630_v38, %v2630_v38  ;;  %v674_v31 = vpop.f32.mrb[51].mxu0  ;;  %v802_v39 = vpop.f32.mrb[51].mxu1 }
 0x15c   :  { %v1074_v40 = vadd.f32 %v1073_v19, %v1072_v56  ;;  %v879_v48 = vadd.f32 %v878_v23, %v877_v22 }
 0x15d   :  { %v1075_v18 = vsel %vm828_vm1, %v987_v24, 0.0 }
 0x15e   :  { %v1076_v58 = vadd.f32 %v1075_v18, %v1074_v40 }
 0x160   :  { %v2640_v47 = vpop.f32.mrb[52].mxu0  ;;  %v2642_v1 = vpop.f32.mrb[52].mxu1 }
 0x161   :  { %3956 = vst [vmem:[#allocation15_spill] sm:$0xff] %v2640_v47  ;;  %3957 = vst [vmem:[#allocation16_spill] sm:$0xff] %v2642_v1  ;;  %v880_v4 = vsel %vm828_vm1, %v2640_v47, 0.0  ;;  %v988_v55 = vmul.f32 %v2640_v47, %v2640_v47  ;;  %v679_v25 = vpop.f32.mrb[53].mxu0  ;;  %v807_v8 = vpop.f32.mrb[53].mxu1 }
 0x162   :  { %v881_v38 = vadd.f32 %v880_v4, %v879_v48  ;;  %v2648_v31 = vpop.f32.mrb[54].mxu0  ;;  %v2650_v56 = vpop.f32.mrb[54].mxu1 }
 0x163   :  { %3958 = vst [vmem:[#allocation17_spill] sm:$0xff] %v2648_v31  ;;  %3959 = vst [vmem:[#allocation18_spill] sm:$0xff] %v2650_v56  ;;  %v1077_v22 = vsel %vm828_vm1, %v988_v55, 0.0  ;;  %v882_v19 = vsel %vm828_vm1, %v2648_v31, 0.0  ;;  %v989_v23 = vmul.f32 %v2648_v31, %v2648_v31  ;;  %v682_v24 = vpop.f32.mrb[55].mxu0  ;;  %v810_v39 = vpop.f32.mrb[55].mxu1 }
 0x164   :  { %v1078_v40 = vadd.f32 %v1077_v22, %v1076_v58  ;;  %v883_v18 = vadd.f32 %v882_v19, %v881_v38 }
 0x165   :  { %v1079_v25 = vsel %vm828_vm1, %v989_v23, 0.0 }
 0x166   :  { %v1080_v8 = vadd.f32 %v1079_v25, %v1078_v40 }
 0x168   :  { %v2658_v48 = vpop.f32.mrb[56].mxu0  ;;  %v2660_v4 = vpop.f32.mrb[56].mxu1 }
 0x169   :  { %3960 = vst [vmem:[#allocation19_spill] sm:$0xff] %v2658_v48  ;;  %3961 = vst [vmem:[#allocation20_spill] sm:$0xff] %v2660_v4  ;;  %v884_v55 = vsel %vm828_vm1, %v2658_v48, 0.0  ;;  %v990_v47 = vmul.f32 %v2658_v48, %v2658_v48  ;;  %v687_v49 = vpop.f32.mrb[57].mxu0  ;;  %v815_v36 = vpop.f32.mrb[57].mxu1 }
 0x16a   :  { %v885_v31 = vadd.f32 %v884_v55, %v883_v18  ;;  %v2666_v24 = vpop.f32.mrb[58].mxu0  ;;  %v2668_v58 = vpop.f32.mrb[58].mxu1 }
 0x16b   :  { %3962 = vst [vmem:[#allocation21_spill] sm:$0xff] %v2666_v24  ;;  %3963 = vst [vmem:[#allocation22_spill] sm:$0xff] %v2668_v58  ;;  %v1081_v38 = vsel %vm828_vm1, %v990_v47, 0.0  ;;  %v886_v22 = vsel %vm828_vm1, %v2666_v24, 0.0  ;;  %v991_v19 = vmul.f32 %v2666_v24, %v2666_v24  ;;  %v690_v23 = vpop.f32.mrb[59].mxu0  ;;  %v818_v39 = vpop.f32.mrb[59].mxu1 }
 0x16c   :  { %v1082_v40 = vadd.f32 %v1081_v38, %v1080_v8  ;;  %v887_v25 = vadd.f32 %v886_v22, %v885_v31  ;;  %v994_v31 = vmul.f32 %v2408_v11, %v2408_v11 }
 0x16d   :  { %v1083_v49 = vsel %vm828_vm1, %v991_v19, 0.0 }
 0x16e   :  { %v1084_v36 = vadd.f32 %v1083_v49, %v1082_v40  ;;  %v995_v49 = vmul.f32 %v2414_v16, %v2414_v16  ;;  %v1089_v41 = vsel %vm828_vm1, %v994_v31, 0.0 }
 0x170   :  { %v2676_v18 = vpop.f32.mrb[60].mxu0  ;;  %v2678_v55 = vpop.f32.mrb[60].mxu1 }
 0x171   :  { %3964 = vst [vmem:[#allocation23_spill] sm:$0xff] %v2676_v18  ;;  %3965 = vst [vmem:[#allocation24_spill] sm:$0xff] %v2678_v55  ;;  %v888_v47 = vsel %vm828_vm1, %v2676_v18, 0.0  ;;  %v992_v48 = vmul.f32 %v2676_v18, %v2676_v18  ;;  %v695_v9 = vpop.f32.mrb[61].mxu0  ;;  %v823_v60 = vpop.f32.mrb[61].mxu1 }
 0x172   :  { %v889_v24 = vadd.f32 %v888_v47, %v887_v25  ;;  %v2684_v23 = vpop.f32.mrb[62].mxu0  ;;  %v2686_v8 = vpop.f32.mrb[62].mxu1  ;;  %v892_v25 = vsel %vm828_vm1, %v2408_v11, 0.0 }
 0x173   :  { %v1085_v38 = vsel %vm828_vm1, %v992_v48, 0.0  ;;  %v890_v22 = vsel %vm828_vm1, %v2684_v23, 0.0  ;;  %v993_v19 = vmul.f32 %v2684_v23, %v2684_v23  ;;  %v698_v39 = vpop.f32.mrb[63].mxu0  ;;  %v826_v40 = vpop.f32.mrb[63].mxu1 }
 0x174   :  { %v1086_v9 = vadd.f32 %v1085_v38, %v1084_v36  ;;  %v891_v60 = vadd.f32 %v890_v22, %v889_v24  ;;  %v996_v39 = vmul.f32 %v2426_v27, %v2426_v27  ;;  %v1091_v38 = vsel %vm828_vm1, %v995_v49, 0.0 }
 0x175   :  { %v1087_v47 = vsel %vm828_vm1, %v993_v19, 0.0  ;;  %v896_v22 = vsel %vm828_vm1, %v2426_v27, 0.0  ;;  %v997_v19 = vmul.f32 %v2434_v34, %v2434_v34  ;;  %v900_v49 = vsel %vm828_vm1, %v2444_v45, 0.0 }
 0x176   :  { %v893_v18 = vadd.f32 %v892_v25, %v891_v60  ;;  %v1088_v48 = vadd.f32 %v1087_v47, %v1086_v9  ;;  %v1093_v31 = vsel %vm828_vm1, %v996_v39, 0.0  ;;  %v898_v60 = vsel %vm828_vm1, %v2434_v34, 0.0 }
 0x177   :  { %v998_v25 = vmul.f32 %v2444_v45, %v2444_v45  ;;  %v999_v47 = vmul.f32 %v2452_v52, %v2452_v52 }
 0x178   :  { %v895_v36 = vadd.f32 %v894_v32, %v893_v18  ;;  %v1090_v24 = vadd.f32 %v1089_v41, %v1088_v48  ;;  %v1095_v18 = vsel %vm828_vm1, %v997_v19, 0.0 }
 0x179   :  { %v1097_v39 = vsel %vm828_vm1, %v998_v25, 0.0  ;;  %v1099_v19 = vsel %vm828_vm1, %v999_v47, 0.0 }
 0x17a   :  { %v897_v40 = vadd.f32 %v896_v22, %v895_v36  ;;  %v1092_v9 = vadd.f32 %v1091_v38, %v1090_v24  ;;  %v902_v24 = vsel %vm828_vm1, %v2452_v52, 0.0  ;;  %v1000_v38 = vmul.f32 %v2462_v63, %v2462_v63 }
 0x17c   :  { %v899_v32 = vadd.f32 %v898_v60, %v897_v40  ;;  %v1094_v41 = vadd.f32 %v1093_v31, %v1092_v9  ;;  %v904_v9 = vsel %vm828_vm1, %v2462_v63, 0.0  ;;  %v1001_v31 = vmul.f32 %v2470_v6, %v2470_v6 }
 0x17d   :  { %v1101_v25 = vsel %vm828_vm1, %v1000_v38, 0.0 }
 0x17e   :  { %v901_v48 = vadd.f32 %v900_v49, %v899_v32  ;;  %v1096_v36 = vadd.f32 %v1095_v18, %v1094_v41  ;;  %v906_v41 = vsel %vm828_vm1, %v2470_v6, 0.0  ;;  %v1002_v18 = vmul.f32 %v2480_v21, %v2480_v21 }
 0x17f   :  { %v1103_v47 = vsel %vm828_vm1, %v1001_v31, 0.0 }
 0x180   :  { %v903_v22 = vadd.f32 %v902_v24, %v901_v48  ;;  %v1098_v40 = vadd.f32 %v1097_v39, %v1096_v36  ;;  %v908_v36 = vsel %vm828_vm1, %v2480_v21, 0.0  ;;  %v1003_v39 = vmul.f32 %v2488_v30, %v2488_v30 }
 0x181   :  { %v1105_v38 = vsel %vm828_vm1, %v1002_v18, 0.0 }
 0x182   :  { %v905_v60 = vadd.f32 %v904_v9, %v903_v22  ;;  %v1100_v32 = vadd.f32 %v1099_v19, %v1098_v40  ;;  %v910_v40 = vsel %vm828_vm1, %v2488_v30, 0.0  ;;  %v1004_v19 = vmul.f32 %v2498_v43, %v2498_v43 }
 0x183   :  { %v1107_v31 = vsel %vm828_vm1, %v1003_v39, 0.0 }
 0x184   :  { %v907_v49 = vadd.f32 %v906_v41, %v905_v60  ;;  %v1102_v48 = vadd.f32 %v1101_v25, %v1100_v32  ;;  %v912_v32 = vsel %vm828_vm1, %v2498_v43, 0.0  ;;  %v1005_v25 = vmul.f32 %v2506_v54, %v2506_v54 }
 0x185   :  { %v1109_v18 = vsel %vm828_vm1, %v1004_v19, 0.0 }
 0x186   :  { %v1104_v24 = vadd.f32 %v1103_v47, %v1102_v48  ;;  %v909_v22 = vadd.f32 %v908_v36, %v907_v49  ;;  %v914_v48 = vsel %vm828_vm1, %v2506_v54, 0.0  ;;  %v1006_v47 = vmul.f32 %v2516_v3, %v2516_v3 }
 0x187   :  { %v1111_v39 = vsel %vm828_vm1, %v1005_v25, 0.0 }
 0x188   :  { %v911_v9 = vadd.f32 %v910_v40, %v909_v22  ;;  %v1106_v60 = vadd.f32 %v1105_v38, %v1104_v24  ;;  %v916_v22 = vsel %vm828_vm1, %v2516_v3, 0.0  ;;  %v1007_v38 = vmul.f32 %v2524_v14, %v2524_v14 }
 0x189   :  { %v1113_v19 = vsel %vm828_vm1, %v1006_v47, 0.0 }
 0x18a   :  { %v913_v41 = vadd.f32 %v912_v32, %v911_v9  ;;  %v1108_v49 = vadd.f32 %v1107_v31, %v1106_v60  ;;  %v918_v60 = vsel %vm828_vm1, %v2524_v14, 0.0  ;;  %v1008_v31 = vmul.f32 %v2534_v35, %v2534_v35 }
 0x18b   :  { %v1115_v25 = vsel %vm828_vm1, %v1007_v38, 0.0 }
 0x18c   :  { %v915_v36 = vadd.f32 %v914_v48, %v913_v41  ;;  %v1110_v24 = vadd.f32 %v1109_v18, %v1108_v49  ;;  %v920_v49 = vsel %vm828_vm1, %v2534_v35, 0.0  ;;  %v1009_v18 = vmul.f32 %v2542_v46, %v2542_v46 }
 0x18d   :  { %v1117_v47 = vsel %vm828_vm1, %v1008_v31, 0.0 }
 0x18e   :  { %v917_v40 = vadd.f32 %v916_v22, %v915_v36  ;;  %v1112_v9 = vadd.f32 %v1111_v39, %v1110_v24  ;;  %v922_v24 = vsel %vm828_vm1, %v2542_v46, 0.0  ;;  %v1010_v39 = vmul.f32 %v2552_v61, %v2552_v61 }
 0x18f   :  { %v1119_v38 = vsel %vm828_vm1, %v1009_v18, 0.0 }
 0x190   :  { %v919_v32 = vadd.f32 %v918_v60, %v917_v40  ;;  %v1114_v41 = vadd.f32 %v1113_v19, %v1112_v9  ;;  %v924_v9 = vsel %vm828_vm1, %v2552_v61, 0.0  ;;  %v1011_v19 = vmul.f32 %v2560_v12, %v2560_v12 }
 0x191   :  { %v1121_v31 = vsel %vm828_vm1, %v1010_v39, 0.0 }
 0x192   :  { %v921_v48 = vadd.f32 %v920_v49, %v919_v32  ;;  %v1116_v36 = vadd.f32 %v1115_v25, %v1114_v41  ;;  %v926_v41 = vsel %vm828_vm1, %v2560_v12, 0.0  ;;  %v1012_v25 = vmul.f32 %v2570_v37, %v2570_v37 }
 0x193   :  { %v1123_v18 = vsel %vm828_vm1, %v1011_v19, 0.0 }
 0x194   :  { %v923_v22 = vadd.f32 %v922_v24, %v921_v48  ;;  %v1118_v40 = vadd.f32 %v1117_v47, %v1116_v36  ;;  %v928_v36 = vsel %vm828_vm1, %v2570_v37, 0.0  ;;  %v1013_v47 = vmul.f32 %v2578_v50, %v2578_v50 }
 0x195   :  { %v1125_v39 = vsel %vm828_vm1, %v1012_v25, 0.0 }
 0x196   :  { %v925_v60 = vadd.f32 %v924_v9, %v923_v22  ;;  %v1120_v32 = vadd.f32 %v1119_v38, %v1118_v40  ;;  %v930_v40 = vsel %vm828_vm1, %v2578_v50, 0.0  ;;  %v1014_v38 = vmul.f32 %v2588_v17, %v2588_v17 }
 0x197   :  { %v1127_v19 = vsel %vm828_vm1, %v1013_v47, 0.0 }
 0x198   :  { %v1122_v49 = vadd.f32 %v1121_v31, %v1120_v32  ;;  %v927_v48 = vadd.f32 %v926_v41, %v925_v60  ;;  %v932_v32 = vsel %vm828_vm1, %v2588_v17, 0.0  ;;  %v1015_v31 = vmul.f32 %v2596_v28, %v2596_v28 }
 0x199   :  { %v1129_v25 = vsel %vm828_vm1, %v1014_v38, 0.0 }
 0x19a   :  { %v1124_v24 = vadd.f32 %v1123_v18, %v1122_v49  ;;  %v929_v22 = vadd.f32 %v928_v36, %v927_v48  ;;  %v934_v48 = vsel %vm828_vm1, %v2596_v28, 0.0  ;;  %v1016_v18 = vmul.f32 %v2606_v59, %v2606_v59 }
 0x19b   :  { %v1131_v47 = vsel %vm828_vm1, %v1015_v31, 0.0 }
 0x19c   :  { %v1126_v9 = vadd.f32 %v1125_v39, %v1124_v24  ;;  %v931_v60 = vadd.f32 %v930_v40, %v929_v22  ;;  %v936_v22 = vsel %vm828_vm1, %v2606_v59, 0.0  ;;  %v1017_v39 = vmul.f32 %v2614_v7, %v2614_v7 }
 0x19d   :  { %v1133_v38 = vsel %vm828_vm1, %v1016_v18, 0.0 }
 0x19e   :  { %v1128_v41 = vadd.f32 %v1127_v19, %v1126_v9  ;;  %v933_v49 = vadd.f32 %v932_v32, %v931_v60  ;;  %v938_v60 = vsel %vm828_vm1, %v2614_v7, 0.0  ;;  %v1018_v19 = vmul.f32 %v2624_v0, %v2624_v0 }
 0x19f   :  { %v1135_v31 = vsel %vm828_vm1, %v1017_v39, 0.0 }
 0x1a0   :  { %v1130_v36 = vadd.f32 %v1129_v25, %v1128_v41  ;;  %v935_v24 = vadd.f32 %v934_v48, %v933_v49  ;;  %v940_v49 = vsel %vm828_vm1, %v2624_v0, 0.0  ;;  %v1019_v25 = vmul.f32 %v2632_v57, %v2632_v57 }
 0x1a1   :  { %v1137_v18 = vsel %vm828_vm1, %v1018_v19, 0.0 }
 0x1a2   :  { %v1132_v40 = vadd.f32 %v1131_v47, %v1130_v36  ;;  %v937_v9 = vadd.f32 %v936_v22, %v935_v24  ;;  %v942_v24 = vsel %vm828_vm1, %v2632_v57, 0.0  ;;  %v1020_v47 = vmul.f32 %v2642_v1, %v2642_v1 }
 0x1a3   :  { %v1139_v39 = vsel %vm828_vm1, %v1019_v25, 0.0 }
 0x1a4   :  { %v1134_v32 = vadd.f32 %v1133_v38, %v1132_v40  ;;  %v939_v41 = vadd.f32 %v938_v60, %v937_v9  ;;  %v944_v9 = vsel %vm828_vm1, %v2642_v1, 0.0  ;;  %v1021_v38 = vmul.f32 %v2650_v56, %v2650_v56 }
 0x1a5   :  { %v1141_v19 = vsel %vm828_vm1, %v1020_v47, 0.0 }
 0x1a6   :  { %v1136_v48 = vadd.f32 %v1135_v31, %v1134_v32  ;;  %v941_v36 = vadd.f32 %v940_v49, %v939_v41  ;;  %v946_v41 = vsel %vm828_vm1, %v2650_v56, 0.0  ;;  %v1022_v31 = vmul.f32 %v2660_v4, %v2660_v4 }
 0x1a7   :  { %v1143_v25 = vsel %vm828_vm1, %v1021_v38, 0.0 }
 0x1a8   :  { %v1138_v22 = vadd.f32 %v1137_v18, %v1136_v48  ;;  %v943_v40 = vadd.f32 %v942_v24, %v941_v36  ;;  %v948_v36 = vsel %vm828_vm1, %v2660_v4, 0.0  ;;  %v1023_v18 = vmul.f32 %v2668_v58, %v2668_v58 }
 0x1a9   :  { %v1024_v24 = vmul.f32 %v2678_v55, %v2678_v55 }
 0x1aa   :  { %v1140_v60 = vadd.f32 %v1139_v39, %v1138_v22  ;;  %v945_v32 = vadd.f32 %v944_v9, %v943_v40  ;;  %v1145_v40 = vsel %vm828_vm1, %v1022_v31, 0.0  ;;  %v950_v39 = vsel %vm828_vm1, %v2668_v58, 0.0 }
 0x1ab   :  { %v952_v9 = vsel %vm828_vm1, %v2678_v55, 0.0  ;;  %v954_v31 = vsel %vm828_vm1, %v2686_v8, 0.0 }
 0x1ac   :  { %v1142_v49 = vadd.f32 %v1141_v19, %v1140_v60  ;;  %v947_v48 = vadd.f32 %v946_v41, %v945_v32  ;;  %v1147_v32 = vsel %vm828_vm1, %v1023_v18, 0.0  ;;  %v1149_v19 = vsel %vm828_vm1, %v1024_v24, 0.0 }
 0x1ad   :  { %v1025_v41 = vmul.f32 %v2686_v8, %v2686_v8 }
 0x1ae   :  { %v1144_v47 = vadd.f32 %v1143_v25, %v1142_v49  ;;  %v949_v22 = vadd.f32 %v948_v36, %v947_v48 }
 0x1af   :  { %v1151_v36 = vsel %vm828_vm1, %v1025_v41, 0.0 }
 0x1b0   :  { %v1146_v38 = vadd.f32 %v1145_v40, %v1144_v47  ;;  %v951_v60 = vadd.f32 %v950_v39, %v949_v22 }
 0x1b2   :  { %v1148_v4 = vadd.f32 %v1147_v32, %v1146_v38  ;;  %v953_v49 = vadd.f32 %v952_v9, %v951_v60 }
 0x1b4   :  { %v1150_v48 = vadd.f32 %v1149_v19, %v1148_v4  ;;  %v955_v25 = vadd.f32 %v954_v31, %v953_v49 }
 0x1b6   :  { %v956_v58 = vrot.slane %v955_v25, 4  ;;  %v1152_v55 = vadd.f32 %v1151_v36, %v1150_v48 }
 0x1b8   :  { %v957_v47 = vadd.f32 %v956_v58, %v955_v25  ;;  %v1153_v22 = vrot.slane %v1152_v55, 4 }
 0x1ba   :  { %v958_v40 = vrot.slane %v957_v47, 2  ;;  %v1154_v18 = vadd.f32 %v1153_v22, %v1152_v55 }
 0x1bc   :  { %v959_v39 = vadd.f32 %v958_v40, %v957_v47  ;;  %v1155_v24 = vrot.slane %v1154_v18, 2 }
 0x1be   :  { %v960_v56 = vrot.slane %v959_v39, 1  ;;  %v1156_v1 = vadd.f32 %v1155_v24, %v1154_v18 }
 0x1c0   :  { %v961_v57 = vadd.f32 %v960_v56, %v959_v39  ;;  %v1157_v38 = vrot.slane %v1156_v1, 1  ;;  %v1198_v39 = vlaneseq }
 0x1c2   :  { %1169 = vrot.lane.b32.xlu1 %v961_v57, %s2124_s0  ;;  %1160 = vrot.lane.b32.xlu0 %v961_v57, %s2125_s26  ;;  %v1158_v4 = vadd.f32 %v1157_v38, %v1156_v1  ;;  %v1199_v24 = vshrl.u32 %v1198_v39, 7 }
 0x1c4   :  { %v2857_v38 = vsub.s32 0, %v1199_v24 }
 0x1c6   :  { %1173 = vrot.lane.b32.xlu1 %v1158_v4, %s2124_s0  ;;  %1165 = vrot.lane.b32.xlu0 %v1158_v4, %s2125_s26 }
 0x1ca   :  { %1181 = vrot.lane.b32.xlu1 %v1158_v4, %s2126_s27  ;;  %1177 = vrot.lane.b32.xlu0 %v961_v57, %s2126_s27 }
 0x234   :  { %v1170_v58 = vpop.permute.xlu1 %1169  ;;  %v1161_v9 = vpop.permute.xlu0 %1160 }
 0x235   :  { %v1163_v60 = vadd.f32 %v1161_v9, %v961_v57  ;;  %v1190_v57 = vld [vmem:[%s3900_s2] sm:$0x1] }
 0x236   :  { %v1194_v9 = vld [vmem:[%s3901_s3] sm:$0x1] }
 0x237   :  { %v1172_v49 = vadd.f32 %v1170_v58, %v1163_v60 }
 0x238   :  { %v1174_v55 = vpop.permute.xlu1 %1173  ;;  %v1166_v32 = vpop.permute.xlu0 %1165 }
 0x239   :  { %v1168_v19 = vadd.f32 %v1166_v32, %v1158_v4 }
 0x23b   :  { %v1176_v41 = vadd.f32 %v1174_v55, %v1168_v19 }
 0x23c   :  { %v1182_v56 = vpop.permute.xlu1 %1181  ;;  %v1178_v31 = vpop.permute.xlu0 %1177 }
 0x23d   :  { %v1184_v48 = vadd.f32 %v1182_v56, %v1176_v41  ;;  %v1180_v25 = vadd.f32 %v1178_v31, %v1172_v49 }
 0x23f   :  { %v1185_v36 = vmul.f32 0.00048828125, %v1180_v25  ;;  %v1186_v47 = vmul.f32 0.00048828125, %v1184_v48 }
 0x241   :  { %v1187_v1 = vmul.f32 %v1185_v36, %v1185_v36 }
 0x243   :  { %v1188_v22 = vsub.f32 %v1186_v47, %v1187_v1 }
 0x245   :  { %v1189_v40 = vmax.f32 %v1188_v22, 0.0 }
 0x247   :  { %v1191_v18 = vadd.f32 1e-05, %v1189_v40 }
 0x249   :  { %2121 = vrsqrt.f32 %v1191_v18 }
 0x253   :  { %v2122_v4 = vpop.eup %2121 }
 0x254   :  { %v1193_v58 = vmul.f32 %v2122_v4, %v1190_v57  ;;  %v3966_v57 = vld [vmem:[#allocation2_spill] sm:$0xff]  ;;  %v3967_v4 = vld [vmem:[#allocation3_spill] sm:$0xff] }
 0x256   :  { %v1195_v60 = vmul.f32 %v1193_v58, %v1185_v36  ;;  %v1201_v55 = vrot.slane %v1193_v58, %v2857_v38 }
 0x258   :  { %v1196_v32 = vsub.f32 %v1194_v9, %v1195_v60  ;;  %1205 = vrot.lane.b32.xlu1 %v1201_v55, %s2127_s6  ;;  %1202 = vrot.lane.b32.xlu0 %v1201_v55, %s2128_s7  ;;  %v3969_v9 = vld [vmem:[#allocation5_spill] sm:$0xff]  ;;  %v3970_v60 = vld [vmem:[#allocation6_spill] sm:$0xff] }
 0x25a   :  { %v1220_v19 = vrot.slane %v1196_v32, %v2857_v38 }
 0x25c   :  { %1208 = vrot.lane.b32.xlu0 %v1201_v55, %s2129_s8  ;;  %1221 = vrot.lane.b32.xlu1 %v1220_v19, %s2128_s7  ;;  %v3971_v55 = vld [vmem:[#allocation7_spill] sm:$0xff] }
 0x260   :  { %1224 = vrot.lane.b32.xlu0 %v1220_v19, %s2127_s6  ;;  %1227 = vrot.lane.b32.xlu1 %v1220_v19, %s2129_s8  ;;  %v3972_v19 = vld [vmem:[#allocation8_spill] sm:$0xff] }
 0x2ca   :  { %v1203_v41 = vpop.permute.xlu0 %1202  ;;  %v1206_v49 = vpop.permute.xlu1 %1205 }
 0x2cb   :  { %v1212_v56 = vsel %vm1211_vm2, %v1193_v58, %v1203_v41  ;;  %v3968_v58 = vld [vmem:[#allocation4_spill] sm:$0xff] }
 0x2cc   :  { %v1213_v31 = vsel %vm442_vm0, %v1212_v56, %v1206_v49  ;;  %v3973_v49 = vld [vmem:[#allocation9_spill] sm:$0xff] }
 0x2ce   :  { %v1209_v48 = vpop.permute.xlu0 %1208  ;;  %v1222_v47 = vpop.permute.xlu1 %1221 }
 0x2cf   :  { %v1215_v25 = vsel %vm1214_vm3, %v1213_v31, %v1209_v48  ;;  %v1230_v18 = vsel %vm1211_vm2, %v1196_v32, %v1222_v47  ;;  %v3974_v31 = vld [vmem:[#allocation10_spill] sm:$0xff] }
 0x2d0   :  { %v2867_v36 = vrot.slane %v1215_v25, %v2857_v38  ;;  %v3975_v25 = vld [vmem:[#allocation11_spill] sm:$0xff] }
 0x2d2   :  { %v2871_v1 = vmul.f32 %v2867_v36, %v2406_v10  ;;  %v2875_v22 = vmul.f32 %v2867_v36, %v2412_v15  ;;  %v2879_v40 = vmul.f32 %v2867_v36, %v2424_v26  ;;  %v2883_v39 = vmul.f32 %v2867_v36, %v2432_v33 }
 0x2d3   :  { %v2887_v24 = vmul.f32 %v2867_v36, %v2442_v44  ;;  %v2891_v10 = vmul.f32 %v2867_v36, %v2450_v51  ;;  %v2895_v15 = vmul.f32 %v2867_v36, %v2460_v62  ;;  %v2899_v26 = vmul.f32 %v2867_v36, %v2468_v5 }
 0x2d4   :  { %v2903_v33 = vmul.f32 %v2867_v36, %v2478_v20  ;;  %v2907_v44 = vmul.f32 %v2867_v36, %v2486_v29  ;;  %v2911_v51 = vmul.f32 %v2867_v36, %v2496_v42  ;;  %v2915_v62 = vmul.f32 %v2867_v36, %v2504_v53 }
 0x2d5   :  { %v2919_v5 = vmul.f32 %v2867_v36, %v2514_v2  ;;  %v2923_v20 = vmul.f32 %v2867_v36, %v2522_v13  ;;  %v2927_v29 = vmul.f32 %v2867_v36, %v3966_v57  ;;  %v2931_v42 = vmul.f32 %v2867_v36, %v3967_v4  ;;  %v3977_v57 = vld [vmem:[#allocation12_spill] sm:$0xff] }
 0x2d6   :  { %v2935_v53 = vmul.f32 %v2867_v36, %v3968_v58  ;;  %v2939_v2 = vmul.f32 %v2867_v36, %v3969_v9  ;;  %v2943_v13 = vmul.f32 %v2867_v36, %v3970_v60  ;;  %v2947_v32 = vmul.f32 %v2867_v36, %v3971_v55  ;;  %v3979_v58 = vld [vmem:[#allocation13_spill] sm:$0xff]  ;;  %v3980_v60 = vld [vmem:[#allocation15_spill] sm:$0xff] }
 0x2d7   :  { %v2951_v41 = vmul.f32 %v2867_v36, %v3972_v19  ;;  %v2955_v56 = vmul.f32 %v2867_v36, %v3973_v49  ;;  %v2959_v48 = vmul.f32 %v2867_v36, %v3974_v31  ;;  %v2963_v47 = vmul.f32 %v2867_v36, %v3975_v25  ;;  %v3981_v19 = vld [vmem:[#allocation17_spill] sm:$0xff]  ;;  %v3982_v31 = vld [vmem:[#allocation19_spill] sm:$0xff] }
 0x2d8   :  { %v2967_v4 = vmul.f32 %v2867_v36, %v3977_v57  ;;  %v2971_v9 = vmul.f32 %v2867_v36, %v3979_v58  ;;  %v2975_v55 = vmul.f32 %v2867_v36, %v3980_v60  ;;  %v2979_v49 = vmul.f32 %v2867_v36, %v3981_v19 }
 0x2d9   :  { %3976 = vst [vmem:[#allocation2_spill] sm:$0xff] %v2963_v47  ;;  %v2983_v25 = vmul.f32 %v2867_v36, %v3982_v31  ;;  %v3983_v47 = vld [vmem:[#allocation21_spill] sm:$0xff]  ;;  %v2995_v60 = vmul.f32 %v2867_v36, %v2684_v23  ;;  %v2999_v19 = vmul.f32 %v2867_v36, %v2408_v11  ;;  %v3003_v31 = vmul.f32 %v2867_v36, %v2414_v16 }
 0x2da   :  { %3978 = vst [vmem:[#allocation3_spill] sm:$0xff] %v2967_v4  ;;  %v2987_v57 = vmul.f32 %v2867_v36, %v3983_v47  ;;  %v3984_v4 = vld [vmem:[#allocation23_spill] sm:$0xff]  ;;  %v3007_v47 = vmul.f32 %v2867_v36, %v2426_v27  ;;  %v3015_v23 = vmul.f32 %v2867_v36, %v2444_v45  ;;  %v3019_v11 = vmul.f32 %v2867_v36, %v2452_v52 }
 0x2db   :  { %v2991_v58 = vmul.f32 %v2867_v36, %v3984_v4  ;;  %v3011_v4 = vmul.f32 %v2867_v36, %v2434_v34  ;;  %v3023_v16 = vmul.f32 %v2867_v36, %v2462_v63  ;;  %v3027_v27 = vmul.f32 %v2867_v36, %v2470_v6 }
 0x2dc   :  { %3985 = vst [vmem:[#allocation4_spill] sm:$0xff] %v3019_v11  ;;  %v3031_v34 = vmul.f32 %v2867_v36, %v2480_v21  ;;  %v3035_v45 = vmul.f32 %v2867_v36, %v2488_v30  ;;  %v3039_v52 = vmul.f32 %v2867_v36, %v2498_v43  ;;  %v1225_v11 = vpop.permute.xlu0 %1224  ;;  %v3043_v63 = vmul.f32 %v2867_v36, %v2506_v54 }
 0x2dd   :  { %v3047_v6 = vmul.f32 %v2867_v36, %v2516_v3  ;;  %v3051_v21 = vmul.f32 %v2867_v36, %v2524_v14  ;;  %v3055_v30 = vmul.f32 %v2867_v36, %v2534_v35  ;;  %v3059_v43 = vmul.f32 %v2867_v36, %v2542_v46 }
 0x2de   :  { %3986 = vst [vmem:[#allocation5_spill] sm:$0xff] %v3035_v45  ;;  %v1228_v45 = vpop.permute.xlu1 %1227  ;;  %v3063_v54 = vmul.f32 %v2867_v36, %v2552_v61  ;;  %v3067_v3 = vmul.f32 %v2867_v36, %v2560_v12  ;;  %v3071_v14 = vmul.f32 %v2867_v36, %v2570_v37  ;;  %v3075_v35 = vmul.f32 %v2867_v36, %v2578_v50 }
 0x2df   :  { %v3079_v46 = vmul.f32 %v2867_v36, %v2588_v17  ;;  %v3083_v61 = vmul.f32 %v2867_v36, %v2596_v28  ;;  %v3088_v12 = vmul.f32 %v2867_v36, %v2606_v59  ;;  %v3092_v37 = vmul.f32 %v2867_v36, %v2614_v7  ;;  %v3994_v59 = vld [vmem:[#allocation18_spill] sm:$0xff] }
 0x2e0   :  { %3987 = vst [vmem:[#allocation6_spill] sm:$0xff] %v3063_v54  ;;  %v1231_v54 = vsel %vm442_vm0, %v1230_v18, %v1225_v11  ;;  %v3096_v50 = vmul.f32 %v2867_v36, %v2624_v0  ;;  %v3109_v11 = vmul.f32 %v2867_v36, %v3994_v59 }
 0x2e1   :  { %3988 = vst [vmem:[#allocation7_spill] sm:$0xff] %v3079_v46  ;;  %3989 = vst [vmem:[#allocation8_spill] sm:$0xff] %v3083_v61  ;;  %v1232_v17 = vsel %vm1214_vm3, %v1231_v54, %v1228_v45  ;;  %v3991_v46 = vld [vmem:[#allocation14_spill] sm:$0xff]  ;;  %v3993_v61 = vld [vmem:[#allocation16_spill] sm:$0xff] }
 0x2e2   :  { %3990 = vst [vmem:[#allocation9_spill] sm:$0xff] %v3092_v37  ;;  %v3101_v28 = vmul.f32 %v2867_v36, %v3991_v46  ;;  %v3105_v18 = vmul.f32 %v2867_v36, %v3993_v61  ;;  %v3112_v7 = vrot.slane %v1232_v17, %v2857_v38  ;;  %v3995_v37 = vld [vmem:[#allocation20_spill] sm:$0xff]  ;;  %v3996_v45 = vld [vmem:[#allocation22_spill] sm:$0xff]  ;;  %v3128_v61 = vmul.f32 %v2867_v36, %v2686_v8 }
 0x2e3   :  { %v3116_v0 = vmul.f32 %v2867_v36, %v3995_v37  ;;  %v3120_v54 = vmul.f32 %v2867_v36, %v3996_v45  ;;  %v3997_v46 = vld [vmem:[#allocation24_spill] sm:$0xff]  ;;  %v3999_v45 = vld [vmem:[#allocation3_spill] sm:$0xff] }
 0x2e4   :  { %3992 = vst [vmem:[#allocation10_spill] sm:$0xff] %v3101_v28  ;;  %v3124_v28 = vmul.f32 %v2867_v36, %v3997_v46  ;;  %v3132_v38 = vadd.f32 %v3112_v7, %v2871_v1  ;;  %v3136_v37 = vadd.f32 %v3112_v7, %v2875_v22  ;;  %v3140_v17 = vadd.f32 %v3112_v7, %v2879_v40 }
 0x2e5   :  { %v3144_v59 = vadd.f32 %v3112_v7, %v2883_v39  ;;  %v3148_v8 = vadd.f32 %v3112_v7, %v2887_v24  ;;  %v3152_v36 = vadd.f32 %v3112_v7, %v2891_v10  ;;  %v3156_v1 = vadd.f32 %v3112_v7, %v2895_v15 }
 0x2e6   :  { %v3160_v22 = vadd.f32 %v3112_v7, %v2899_v26  ;;  %v3164_v40 = vadd.f32 %v3112_v7, %v2903_v33  ;;  %v3168_v39 = vadd.f32 %v3112_v7, %v2907_v44  ;;  %v3172_v24 = vadd.f32 %v3112_v7, %v2911_v51 }
 0x2e7   :  { %v3176_v10 = vadd.f32 %v3112_v7, %v2915_v62  ;;  %v3180_v15 = vadd.f32 %v3112_v7, %v2919_v5  ;;  %v3184_v26 = vadd.f32 %v3112_v7, %v2923_v20  ;;  %v3188_v33 = vadd.f32 %v3112_v7, %v2927_v29 }
 0x2e8   :  { %v3192_v44 = vadd.f32 %v3112_v7, %v2931_v42  ;;  %v3196_v51 = vadd.f32 %v3112_v7, %v2935_v53  ;;  %v3200_v62 = vadd.f32 %v3112_v7, %v2939_v2  ;;  %v3204_v5 = vadd.f32 %v3112_v7, %v2943_v13  ;;  %v3998_v2 = vld [vmem:[#allocation2_spill] sm:$0xff] }
 0x2e9   :  { %v3208_v20 = vadd.f32 %v3112_v7, %v2947_v32  ;;  %v3212_v29 = vadd.f32 %v3112_v7, %v2951_v41  ;;  %v3216_v42 = vadd.f32 %v3112_v7, %v2955_v56  ;;  %v3220_v53 = vadd.f32 %v3112_v7, %v2959_v48 }
 0x2ea   :  { %v3224_v13 = vadd.f32 %v3112_v7, %v3998_v2  ;;  %v3228_v32 = vadd.f32 %v3112_v7, %v3999_v45  ;;  %v3232_v41 = vadd.f32 %v3112_v7, %v2971_v9  ;;  %v3236_v56 = vadd.f32 %v3112_v7, %v2975_v55  ;;  %v4003_v45 = vld [vmem:[#allocation4_spill] sm:$0xff] }
 0x2eb   :  { %v3240_v48 = vadd.f32 %v3112_v7, %v2979_v49  ;;  %v3244_v46 = vadd.f32 %v3112_v7, %v2983_v25  ;;  %v3248_v2 = vadd.f32 %v3112_v7, %v2987_v57  ;;  %v3252_v9 = vadd.f32 %v3112_v7, %v2991_v58 }
 0x2ec   :  { %v3256_v55 = vadd.f32 %v3112_v7, %v2995_v60  ;;  %v3260_v49 = vadd.f32 %v3112_v7, %v2999_v19  ;;  %v3264_v25 = vadd.f32 %v3112_v7, %v3003_v31  ;;  %v3268_v57 = vadd.f32 %v3112_v7, %v3007_v47 }
 0x2ed   :  { %v3272_v58 = vadd.f32 %v3112_v7, %v3011_v4  ;;  %v3276_v60 = vadd.f32 %v3112_v7, %v3015_v23  ;;  %v3280_v19 = vadd.f32 %v3112_v7, %v4003_v45  ;;  %v3284_v31 = vadd.f32 %v3112_v7, %v3023_v16 }
 0x2ee   :  { %4000 = vst [vmem:[#allocation11_spill] sm:$0xff] %v3256_v55  ;;  %v3288_v47 = vadd.f32 %v3112_v7, %v3027_v27  ;;  %v3292_v4 = vadd.f32 %v3112_v7, %v3031_v34  ;;  %v3300_v45 = vadd.f32 %v3112_v7, %v3039_v52  ;;  %v3304_v16 = vadd.f32 %v3112_v7, %v3043_v63 }
 0x2ef   :  { %4001 = vst [vmem:[#allocation12_spill] sm:$0xff] %v3272_v58  ;;  %4002 = vst [vmem:[#allocation13_spill] sm:$0xff] %v3276_v60  ;;  %v4006_v58 = vld [vmem:[#allocation5_spill] sm:$0xff]  ;;  %v3308_v27 = vadd.f32 %v3112_v7, %v3047_v6  ;;  %v3312_v34 = vadd.f32 %v3112_v7, %v3051_v21  ;;  %v3320_v52 = vadd.f32 %v3112_v7, %v3059_v43 }
 0x2f0   :  { %4004 = vst [vmem:[#allocation15_spill] sm:$0xff] %v3284_v31  ;;  %4005 = vst [vmem:[#allocation17_spill] sm:$0xff] %v3292_v4  ;;  %v3296_v23 = vadd.f32 %v3112_v7, %v4006_v58  ;;  %v3316_v58 = vadd.f32 %v3112_v7, %v3055_v30  ;;  %v3328_v6 = vadd.f32 %v3112_v7, %v3067_v3 }
 0x2f1   :  { %4007 = vst [vmem:[#allocation19_spill] sm:$0xff] %v3300_v45  ;;  %4009 = vst [vmem:[#allocation23_spill] sm:$0xff] %v3320_v52  ;;  %v4010_v45 = vld [vmem:[#allocation6_spill] sm:$0xff]  ;;  %v3332_v21 = vadd.f32 %v3112_v7, %v3071_v14  ;;  %v3336_v30 = vadd.f32 %v3112_v7, %v3075_v35  ;;  %v4016_v52 = vld [vmem:[#allocation8_spill] sm:$0xff]  ;;  %v3348_v3 = vadd.f32 %v3112_v7, %v3088_v12 }
 0x2f2   :  { %4008 = vst [vmem:[#allocation21_spill] sm:$0xff] %v3316_v58  ;;  %v3324_v63 = vadd.f32 %v3112_v7, %v4010_v45  ;;  %4012 = vst [vmem:[#allocation16_spill] sm:$0xff] %v3328_v6  ;;  %v4015_v58 = vld [vmem:[#allocation7_spill] sm:$0xff]  ;;  %v3344_v45 = vadd.f32 %v3112_v7, %v4016_v52  ;;  %v4017_v6 = vld [vmem:[#allocation9_spill] sm:$0xff]  ;;  %v3356_v35 = vadd.f32 %v3112_v7, %v3096_v50 }
 0x2f3   :  { %4013 = vst [vmem:[#allocation18_spill] sm:$0xff] %v3332_v21  ;;  %4014 = vst [vmem:[#allocation20_spill] sm:$0xff] %v3336_v30  ;;  %v3340_v43 = vadd.f32 %v3112_v7, %v4015_v58  ;;  %v3352_v14 = vadd.f32 %v3112_v7, %v4017_v6  ;;  %v4018_v30 = vld [vmem:[#allocation10_spill] sm:$0xff]  ;;  %v3364_v52 = vadd.f32 %v3112_v7, %v3105_v18 }
 0x2f4   :  { %4011 = vst [vmem:[#allocation14_spill] sm:$0xff] %v3324_v63  ;;  %v3360_v58 = vadd.f32 %v3112_v7, %v4018_v30  ;;  %v3368_v12 = vadd.f32 %v3112_v7, %v3109_v11  ;;  %v3372_v6 = vadd.f32 %v3112_v7, %v3116_v0  ;;  %v3376_v50 = vadd.f32 %v3112_v7, %v3120_v54 }
 0x2f5   :  { %4019 = vst [vmem:[#allocation22_spill] sm:$0xff] %v3364_v52  ;;  %v3380_v30 = vadd.f32 %v3112_v7, %v3124_v28  ;;  %v3384_v18 = vadd.f32 %v3112_v7, %v3128_v61  ;;  %v4030_v60 = vmov %v3364_v52  ;;  %v4038_v61 = vmax.f32 %v3144_v59, 0.0 }
 0x2f6   :  { %4020 = vst [vmem:[#allocation24_spill] sm:$0xff] %v3368_v12  ;;  %4021 = vst [vmem:[#allocation2_spill] sm:$0xff] %v3372_v6  ;;  %v4031_v63 = vmov %v3368_v12  ;;  %v4032_v31 = vmov %v3372_v6  ;;  %v4033_v21 = vmov %v3376_v50  ;;  %v4035_v6 = vmax.f32 %v3132_v38, 0.0 }
 0x2f7   :  { %4022 = vst [vmem:[#allocation3_spill] sm:$0xff] %v3376_v50  ;;  %4023 = vst [vmem:[#allocation4_spill] sm:$0xff] %v3380_v30  ;;  %v4034_v4 = vmov %v3380_v30  ;;  %v4036_v50 = vmax.f32 %v3136_v37, 0.0  ;;  %v4037_v30 = vmax.f32 %v3140_v17, 0.0  ;;  %v1930_v11 = vpack.c.bf16 %v4038_v61, %v4038_v61 }
 0x2f8   :  { %v4025_v55 = vld [vmem:[#allocation19_spill] sm:$0xff]  ;;  %v1927_v52 = vpack.c.bf16 %v4035_v6, %v4035_v6  ;;  %v4039_v12 = vmax.f32 %v3148_v8, 0.0  ;;  %v4040_v38 = vmax.f32 %v3152_v36, 0.0  ;;  %v4041_v37 = vmax.f32 %v3156_v1, 0.0 }
 0x2f9   :  { %v4026_v54 = vld [vmem:[#allocation21_spill] sm:$0xff]  ;;  %v1928_v28 = vpack.c.bf16 %v4036_v50, %v4036_v50  ;;  %v1929_v7 = vpack.c.bf16 %v4037_v30, %v4037_v30  ;;  %v4042_v17 = vmax.f32 %v3160_v22, 0.0  ;;  %v4043_v59 = vmax.f32 %v3164_v40, 0.0  ;;  %1693 = vst.msk [vmem:[%s3902_s4 + $0xc] sm:$0xf] %vm1689_vm4, %v1930_v11 }
 0x2fa   :  { %v1931_v0 = vpack.c.bf16 %v4039_v12, %v4039_v12  ;;  %v1932_v6 = vpack.c.bf16 %v4040_v38, %v4040_v38  ;;  %v1933_v50 = vpack.c.bf16 %v4041_v37, %v4041_v37  ;;  %v4044_v8 = vmax.f32 %v3168_v39, 0.0  ;;  %1690 = vst.msk [vmem:[%s3902_s4] sm:$0xf] %vm1689_vm4, %v1927_v52 }
 0x2fb   :  { %v1934_v30 = vpack.c.bf16 %v4042_v17, %v4042_v17  ;;  %v1935_v61 = vpack.c.bf16 %v4043_v59, %v4043_v59  ;;  %v4045_v36 = vmax.f32 %v3172_v24, 0.0  ;;  %v4046_v1 = vmax.f32 %v3176_v10, 0.0  ;;  %1691 = vst.msk [vmem:[%s3902_s4 + $0x4] sm:$0xf] %vm1689_vm4, %v1928_v28  ;;  %1692 = vst.msk [vmem:[%s3902_s4 + $0x8] sm:$0xf] %vm1689_vm4, %v1929_v7 }
 0x2fc   :  { %v1936_v12 = vpack.c.bf16 %v4044_v8, %v4044_v8  ;;  %v4047_v22 = vmax.f32 %v3180_v15, 0.0  ;;  %v4048_v39 = vmax.f32 %v3184_v26, 0.0  ;;  %v4049_v10 = vmax.f32 %v3188_v33, 0.0  ;;  %1694 = vst.msk [vmem:[%s3902_s4 + $0x10] sm:$0xf] %vm1689_vm4, %v1931_v0 }
 0x2fd   :  { %v1937_v38 = vpack.c.bf16 %v4045_v36, %v4045_v36  ;;  %v1938_v37 = vpack.c.bf16 %v4046_v1, %v4046_v1  ;;  %v4050_v28 = vmax.f32 %v3192_v44, 0.0  ;;  %1695 = vst.msk [vmem:[%s3902_s4 + $0x14] sm:$0xf] %vm1689_vm4, %v1932_v6  ;;  %1696 = vst.msk [vmem:[%s3902_s4 + $0x18] sm:$0xf] %vm1689_vm4, %v1933_v50  ;;  %v4051_v15 = vmax.f32 %v3196_v51, 0.0 }
 0x2fe   :  { %v1939_v40 = vpack.c.bf16 %v4047_v22, %v4047_v22  ;;  %v1940_v24 = vpack.c.bf16 %v4048_v39, %v4048_v39  ;;  %v1941_v52 = vpack.c.bf16 %v4049_v10, %v4049_v10  ;;  %1697 = vst.msk [vmem:[%s3902_s4 + $0x1c] sm:$0xf] %vm1689_vm4, %v1934_v30  ;;  %v4052_v33 = vmax.f32 %v3200_v62, 0.0  ;;  %1698 = vst.msk [vmem:[%s3902_s4 + $0x20] sm:$0xf] %vm1689_vm4, %v1935_v61  ;;  %v4066_v22 = vld [vmem:[#allocation11_spill] sm:$0xff] }
 0x2ff   :  { %v1942_v7 = vpack.c.bf16 %v4050_v28, %v4050_v28  ;;  %v1943_v26 = vpack.c.bf16 %v4051_v15, %v4051_v15  ;;  %v4053_v11 = vmax.f32 %v3204_v5, 0.0  ;;  %v4054_v6 = vmax.f32 %v3208_v20, 0.0  ;;  %1699 = vst.msk [vmem:[%s3902_s4 + $0x24] sm:$0xf] %vm1689_vm4, %v1936_v12  ;;  %1700 = vst.msk [vmem:[%s3902_s4 + $0x28] sm:$0xf] %vm1689_vm4, %v1937_v38 }
 0x300   :  { %v1944_v44 = vpack.c.bf16 %v4052_v33, %v4052_v33  ;;  %1701 = vst.msk [vmem:[%s3902_s4 + $0x2c] sm:$0xf] %vm1689_vm4, %v1938_v37  ;;  %v4055_v51 = vmax.f32 %v3212_v29, 0.0  ;;  %v4056_v5 = vmax.f32 %v3216_v42, 0.0  ;;  %v4057_v17 = vmax.f32 %v3220_v53, 0.0  ;;  %v4071_v28 = vld [vmem:[#allocation12_spill] sm:$0xff] }
 0x301   :  { %v1945_v0 = vpack.c.bf16 %v4053_v11, %v4053_v11  ;;  %v1946_v50 = vpack.c.bf16 %v4054_v6, %v4054_v6  ;;  %v4058_v59 = vmax.f32 %v3224_v13, 0.0  ;;  %1702 = vst.msk [vmem:[%s3902_s4 + $0x30] sm:$0xf] %vm1689_vm4, %v1939_v40  ;;  %1703 = vst.msk [vmem:[%s3902_s4 + $0x34] sm:$0xf] %vm1689_vm4, %v1940_v24  ;;  %v4059_v29 = vmax.f32 %v3228_v32, 0.0 }
 0x302   :  { %v1947_v62 = vpack.c.bf16 %v4055_v51, %v4055_v51  ;;  %v1948_v20 = vpack.c.bf16 %v4056_v5, %v4056_v5  ;;  %v1949_v30 = vpack.c.bf16 %v4057_v17, %v4057_v17  ;;  %1704 = vst.msk [vmem:[%s3902_s4 + $0x38] sm:$0xf] %vm1689_vm4, %v1941_v52  ;;  %1705 = vst.msk [vmem:[%s3902_s4 + $0x3c] sm:$0xf] %vm1689_vm4, %v1942_v7  ;;  %v4060_v53 = vmax.f32 %v3232_v41, 0.0 }
 0x303   :  { %v1950_v61 = vpack.c.bf16 %v4058_v59, %v4058_v59  ;;  %v1951_v42 = vpack.c.bf16 %v4059_v29, %v4059_v29  ;;  %v4061_v8 = vmax.f32 %v3236_v56, 0.0  ;;  %v4062_v36 = vmax.f32 %v3240_v48, 0.0  ;;  %1706 = vst.msk [vmem:[%s3902_s4 + $0x40] sm:$0xf] %vm1689_vm4, %v1943_v26  ;;  %1707 = vst.msk [vmem:[%s3902_s4 + $0x44] sm:$0xf] %vm1689_vm4, %v1944_v44 }
 0x304   :  { %v1952_v13 = vpack.c.bf16 %v4060_v53, %v4060_v53  ;;  %1708 = vst.msk [vmem:[%s3902_s4 + $0x48] sm:$0xf] %vm1689_vm4, %v1945_v0  ;;  %1709 = vst.msk [vmem:[%s3902_s4 + $0x4c] sm:$0xf] %vm1689_vm4, %v1946_v50  ;;  %v4063_v32 = vmax.f32 %v3244_v46, 0.0  ;;  %v4064_v56 = vmax.f32 %v3248_v2, 0.0 }
 0x305   :  { %v1953_v12 = vpack.c.bf16 %v4061_v8, %v4061_v8  ;;  %v1954_v38 = vpack.c.bf16 %v4062_v36, %v4062_v36  ;;  %v4065_v1 = vmax.f32 %v3252_v9, 0.0  ;;  %v4067_v40 = vmax.f32 %v4066_v22, 0.0  ;;  %1710 = vst.msk [vmem:[%s3902_s4 + $0x50] sm:$0xf] %vm1689_vm4, %v1947_v62  ;;  %1711 = vst.msk [vmem:[%s3902_s4 + $0x54] sm:$0xf] %vm1689_vm4, %v1948_v20 }
 0x306   :  { %v1955_v41 = vpack.c.bf16 %v4063_v32, %v4063_v32  ;;  %v1956_v48 = vpack.c.bf16 %v4064_v56, %v4064_v56  ;;  %1712 = vst.msk [vmem:[%s3902_s4 + $0x58] sm:$0xf] %vm1689_vm4, %v1949_v30  ;;  %1713 = vst.msk [vmem:[%s3902_s4 + $0x5c] sm:$0xf] %vm1689_vm4, %v1950_v61  ;;  %v4068_v46 = vmax.f32 %v3260_v49, 0.0  ;;  %v4069_v9 = vmax.f32 %v3264_v25, 0.0 }
 0x307   :  { %v1957_v37 = vpack.c.bf16 %v4065_v1, %v4065_v1  ;;  %v1958_v39 = vpack.c.bf16 %v4067_v40, %v4067_v40  ;;  %v4070_v10 = vmax.f32 %v3268_v57, 0.0  ;;  %v4072_v7 = vmax.f32 %v4071_v28, 0.0  ;;  %1714 = vst.msk [vmem:[%s3902_s4 + $0x60] sm:$0xf] %vm1689_vm4, %v1951_v42  ;;  %1715 = vst.msk [vmem:[%s3902_s4 + $0x64] sm:$0xf] %vm1689_vm4, %v1952_v13 }
 0x308   :  { %v1959_v2 = vpack.c.bf16 %v4068_v46, %v4068_v46  ;;  %v1960_v24 = vpack.c.bf16 %v4069_v9, %v4069_v9  ;;  %1716 = vst.msk [vmem:[%s3902_s4 + $0x68] sm:$0xf] %vm1689_vm4, %v1953_v12  ;;  %1717 = vst.msk [vmem:[%s3902_s4 + $0x6c] sm:$0xf] %vm1689_vm4, %v1954_v38  ;;  %v4073_v49 = vld [vmem:[#allocation13_spill] sm:$0xff]  ;;  %v4075_v26 = vmax.f32 %v3280_v19, 0.0 }
 0x309   :  { %v1961_v52 = vpack.c.bf16 %v4070_v10, %v4070_v10  ;;  %v1962_v15 = vpack.c.bf16 %v4072_v7, %v4072_v7  ;;  %v4074_v25 = vmax.f32 %v4073_v49, 0.0  ;;  %v4076_v44 = vld [vmem:[#allocation15_spill] sm:$0xff]  ;;  %v4078_v6 = vmax.f32 %v3288_v47, 0.0  ;;  %1718 = vst.msk [vmem:[%s3902_s4 + $0x70] sm:$0xf] %vm1689_vm4, %v1955_v41  ;;  %v4079_v19 = vld [vmem:[#allocation17_spill] sm:$0xff] }
 0x30a   :  { %v1964_v33 = vpack.c.bf16 %v4075_v26, %v4075_v26  ;;  %v4077_v11 = vmax.f32 %v4076_v44, 0.0  ;;  %1719 = vst.msk [vmem:[%s3902_s4 + $0x74] sm:$0xf] %vm1689_vm4, %v1956_v48  ;;  %1720 = vst.msk [vmem:[%s3902_s4 + $0x78] sm:$0xf] %vm1689_vm4, %v1957_v37  ;;  %v4080_v47 = vmax.f32 %v4079_v19, 0.0 }
 0x30b   :  { %v1963_v57 = vpack.c.bf16 %v4074_v25, %v4074_v25  ;;  %v1966_v50 = vpack.c.bf16 %v4078_v6, %v4078_v6  ;;  %1721 = vst.msk [vmem:[%s3902_s4 + $0x7c] sm:$0xf] %vm1689_vm4, %v1958_v39  ;;  %v4081_v62 = vmax.f32 %v3296_v23, 0.0  ;;  %v4082_v20 = vmax.f32 %v4025_v55, 0.0  ;;  %1722 = vst.msk [vmem:[%s3902_s4 + $0x80] sm:$0xf] %vm1689_vm4, %v1959_v2 }
 0x30c   :  { %v1965_v0 = vpack.c.bf16 %v4077_v11, %v4077_v11  ;;  %v1967_v51 = vpack.c.bf16 %v4080_v47, %v4080_v47  ;;  %v4083_v30 = vmax.f32 %v3304_v16, 0.0  ;;  %1723 = vst.msk [vmem:[%s3902_s4 + $0x84] sm:$0xf] %vm1689_vm4, %v1960_v24  ;;  %1724 = vst.msk [vmem:[%s3902_s4 + $0x88] sm:$0xf] %vm1689_vm4, %v1961_v52  ;;  %v4084_v55 = vmax.f32 %v3308_v27, 0.0 }
 0x30d   :  { %v1968_v5 = vpack.c.bf16 %v4081_v62, %v4081_v62  ;;  %v1969_v17 = vpack.c.bf16 %v4082_v20, %v4082_v20  ;;  %1725 = vst.msk [vmem:[%s3902_s4 + $0x8c] sm:$0xf] %vm1689_vm4, %v1962_v15  ;;  %v4085_v16 = vmax.f32 %v3312_v34, 0.0  ;;  %v4086_v29 = vmax.f32 %v4026_v54, 0.0  ;;  %v4087_v53 = vld [vmem:[#allocation23_spill] sm:$0xff]  ;;  %v4089_v27 = vld [vmem:[#allocation14_spill] sm:$0xff] }
 0x30e   :  { %v1970_v59 = vpack.c.bf16 %v4083_v30, %v4083_v30  ;;  %v1971_v23 = vpack.c.bf16 %v4084_v55, %v4084_v55  ;;  %v4088_v13 = vmax.f32 %v4087_v53, 0.0  ;;  %1726 = vst.msk [vmem:[%s3902_s4 + $0x90] sm:$0xf] %vm1689_vm4, %v1963_v57  ;;  %1727 = vst.msk [vmem:[%s3902_s4 + $0x94] sm:$0xf] %vm1689_vm4, %v1964_v33  ;;  %v4090_v34 = vmax.f32 %v4089_v27, 0.0 }
 0x30f   :  { %v1972_v61 = vpack.c.bf16 %v4085_v16, %v4085_v16  ;;  %v1973_v42 = vpack.c.bf16 %v4086_v29, %v4086_v29  ;;  %1728 = vst.msk [vmem:[%s3902_s4 + $0x98] sm:$0xf] %vm1689_vm4, %v1965_v0  ;;  %1729 = vst.msk [vmem:[%s3902_s4 + $0x9c] sm:$0xf] %vm1689_vm4, %v1966_v50  ;;  %v4091_v12 = vld [vmem:[#allocation16_spill] sm:$0xff]  ;;  %v4093_v32 = vld [vmem:[#allocation18_spill] sm:$0xff] }
 0x310   :  { %v1974_v8 = vpack.c.bf16 %v4088_v13, %v4088_v13  ;;  %v1975_v54 = vpack.c.bf16 %v4090_v34, %v4090_v34  ;;  %v4092_v36 = vmax.f32 %v4091_v12, 0.0  ;;  %v4094_v41 = vmax.f32 %v4093_v32, 0.0  ;;  %v4095_v48 = vld [vmem:[#allocation20_spill] sm:$0xff]  ;;  %1730 = vst.msk [vmem:[%s3902_s4 + $0xa0] sm:$0xf] %vm1689_vm4, %v1967_v51 }
 0x311   :  { %v4096_v1 = vmax.f32 %v4095_v48, 0.0  ;;  %1731 = vst.msk [vmem:[%s3902_s4 + $0xa4] sm:$0xf] %vm1689_vm4, %v1968_v5  ;;  %1732 = vst.msk [vmem:[%s3902_s4 + $0xa8] sm:$0xf] %vm1689_vm4, %v1969_v17  ;;  %v4097_v22 = vmax.f32 %v3340_v43, 0.0 }
 0x312   :  { %v1976_v38 = vpack.c.bf16 %v4092_v36, %v4092_v36  ;;  %v1977_v56 = vpack.c.bf16 %v4094_v41, %v4094_v41  ;;  %1733 = vst.msk [vmem:[%s3902_s4 + $0xac] sm:$0xf] %vm1689_vm4, %v1970_v59  ;;  %v4098_v39 = vmax.f32 %v3344_v45, 0.0  ;;  %v4099_v2 = vmax.f32 %v3348_v3, 0.0  ;;  %1734 = vst.msk [vmem:[%s3902_s4 + $0xb0] sm:$0xf] %vm1689_vm4, %v1971_v23 }
 0x313   :  { %v1978_v37 = vpack.c.bf16 %v4096_v1, %v4096_v1  ;;  %v1979_v40 = vpack.c.bf16 %v4097_v22, %v4097_v22  ;;  %v4100_v24 = vmax.f32 %v3352_v14, 0.0  ;;  %1735 = vst.msk [vmem:[%s3902_s4 + $0xb4] sm:$0xf] %vm1689_vm4, %v1972_v61  ;;  %1736 = vst.msk [vmem:[%s3902_s4 + $0xb8] sm:$0xf] %vm1689_vm4, %v1973_v42  ;;  %v4101_v43 = vmax.f32 %v3356_v35, 0.0 }
 0x314   :  { %v1980_v46 = vpack.c.bf16 %v4098_v39, %v4098_v39  ;;  %v1981_v9 = vpack.c.bf16 %v4099_v2, %v4099_v2  ;;  %1737 = vst.msk [vmem:[%s3902_s4 + $0xbc] sm:$0xf] %vm1689_vm4, %v1974_v8  ;;  %v4102_v3 = vmax.f32 %v3360_v58, 0.0  ;;  %v4103_v52 = vmax.f32 %v4030_v60, 0.0  ;;  %1738 = vst.msk [vmem:[%s3902_s4 + $0xc0] sm:$0xf] %vm1689_vm4, %v1975_v54 }
 0x315   :  { %v1982_v10 = vpack.c.bf16 %v4100_v24, %v4100_v24  ;;  %v1983_v45 = vpack.c.bf16 %v4101_v43, %v4101_v43  ;;  %v4104_v7 = vmax.f32 %v4031_v63, 0.0  ;;  %1739 = vst.msk [vmem:[%s3902_s4 + $0xc4] sm:$0xf] %vm1689_vm4, %v1976_v38  ;;  %1740 = vst.msk [vmem:[%s3902_s4 + $0xc8] sm:$0xf] %vm1689_vm4, %v1977_v56  ;;  %v4105_v60 = vmax.f32 %v4032_v31, 0.0 }
 0x316   :  { %v1984_v14 = vpack.c.bf16 %v4102_v3, %v4102_v3  ;;  %v1985_v28 = vpack.c.bf16 %v4103_v52, %v4103_v52  ;;  %1741 = vst.msk [vmem:[%s3902_s4 + $0xcc] sm:$0xf] %vm1689_vm4, %v1978_v37  ;;  %v4106_v35 = vmax.f32 %v4033_v21, 0.0  ;;  %v4107_v49 = vmax.f32 %v4034_v4, 0.0  ;;  %1742 = vst.msk [vmem:[%s3902_s4 + $0xd0] sm:$0xf] %vm1689_vm4, %v1979_v40 }
 0x317   :  { %v1986_v15 = vpack.c.bf16 %v4104_v7, %v4104_v7  ;;  %v1987_v63 = vpack.c.bf16 %v4105_v60, %v4105_v60  ;;  %v4108_v57 = vmax.f32 %v3384_v18, 0.0  ;;  %1743 = vst.msk [vmem:[%s3902_s4 + $0xd4] sm:$0xf] %vm1689_vm4, %v1980_v46  ;;  %1744 = vst.msk [vmem:[%s3902_s4 + $0xd8] sm:$0xf] %vm1689_vm4, %v1981_v9 }
 0x318   :  { %v1988_v58 = vpack.c.bf16 %v4106_v35, %v4106_v35  ;;  %v1989_v25 = vpack.c.bf16 %v4107_v49, %v4107_v49  ;;  %1745 = vst.msk [vmem:[%s3902_s4 + $0xdc] sm:$0xf] %vm1689_vm4, %v1982_v10  ;;  %1746 = vst.msk [vmem:[%s3902_s4 + $0xe0] sm:$0xf] %vm1689_vm4, %v1983_v45 }
 0x319   :  { %v1990_v26 = vpack.c.bf16 %v4108_v57, %v4108_v57  ;;  %1747 = vst.msk [vmem:[%s3902_s4 + $0xe4] sm:$0xf] %vm1689_vm4, %v1984_v14  ;;  %1748 = vst.msk [vmem:[%s3902_s4 + $0xe8] sm:$0xf] %vm1689_vm4, %v1985_v28 }
 0x31a   :  { %1749 = vst.msk [vmem:[%s3902_s4 + $0xec] sm:$0xf] %vm1689_vm4, %v1986_v15  ;;  %1750 = vst.msk [vmem:[%s3902_s4 + $0xf0] sm:$0xf] %vm1689_vm4, %v1987_v63 }
 0x31b   :  { %1751 = vst.msk [vmem:[%s3902_s4 + $0xf4] sm:$0xf] %vm1689_vm4, %v1988_v58  ;;  %1752 = vst.msk [vmem:[%s3902_s4 + $0xf8] sm:$0xf] %vm1689_vm4, %v1989_v25 }
 0x31c   :  { %1753 = vst.msk [vmem:[%s3902_s4 + $0xfc] sm:$0xf] %vm1689_vm4, %v1990_v26 }

// kernel: generator_forward.9
= control target key start
LH: loop header
LB: loop body
LE: loop exit
PB: predicated region body
PF: predicated region fallthrough
CT: control target
= control target key end

     0   :  { %s3174_s9 = smov 0   ;;  %s3601_s0 = inlined_call_operand.vmem [shape: bf16[2048,72], index: 0, kind: input, shape index: {}]   ;;  %s3602_s1 = inlined_call_operand.vmem [shape: bf16[72,12], index: 1, kind: input, shape index: {}]   ;;  %s3603_s2 = inlined_call_operand.vmem [shape: bf16[2048,12], index: 2, kind: output, shape index: {}]  }
   0x1 LB: > { %s2199_s10 = sadd.s32 4294967295, %s3157_s9   ;;  %p2203_p0 = scmp.ge.s32.totalorder %s3157_s9, 1  ;;  %s3157_s9 = sphi %s3174_s9, %s12_s9  }
   0x2   : > { %p113_p1 = scmp.lt.s32.totalorder %s3157_s9, 3 }
   0x4   : > { %p114_p2 = pnand %p2203_p0, %p113_p1 }
   0x5   : > { %v2826_v0 = vld [vmem:[%s3602_s1] sm:$0xff] (!%p114_p2)   ;;  %v2827_v1 = vld [vmem:[%s3602_s1 + $0x8] sm:$0xff] (!%p114_p2)   ;;  %s2204_s15 = sshll.u32 (!%p114_p2), %s2199_s10, 7  ;;  %v2828_v2 = vld [vmem:[%s3602_s1 + $0x10] sm:$0xff] (!%p114_p2)   ;;  %vm632_vm0 = vcmask (!%p114_p2), 588800   ;;  %vm825_vm1 = vcmask (!%p114_p2), 1043456  }
   0x6   : > { %117 = sbr.rel (%p114_p2) target bundleno = 382 (0x17e), region = 28  ;;  %2668 = vmatprep.subr.bf16.mxu0 (!%p114_p2), %v2826_v0  ;;  %2806 = vmatprep.subr.bf16.mxu1 (!%p114_p2), %v2826_v0  ;;  %p136_p3 = scmp.lt.s32.totalorder (!%p114_p2), %s2204_s15, 255  ;;  %v2829_v3 = vld [vmem:[%s3602_s1 + $0x18] sm:$0xff] (!%p114_p2)   ;;  %v2830_v6 = vld [vmem:[%s3602_s1 + $0x20] ss:$0 sps:$4 sm:$0xff] (!%p114_p2)   ;;  %vm2014_vm2 = vcmask (!%p114_p2), 93184  }
   0x7   : > { %2669 = vmatpush3.bf16.msra.mxu0 (!%p114_p2), %v2826_v0  ;;  %2811 = vmatpush3.bf16.msra.mxu1 (!%p114_p2), %v2826_v0  ;;  %v827_v7 = vsel (!%p114_p2), %vm825_vm1, %v2830_v6, 0 }
   0x8   : > { %2670 = vmatprep.subr.bf16.mxu0 (!%p114_p2), %v2827_v1  ;;  %2807 = vmatprep.subr.bf16.mxu1 (!%p114_p2), %v2827_v1 }
   0xb   : > { %2671 = vmatpush3.bf16.msra.mxu0 (!%p114_p2), %v2827_v1  ;;  %2812 = vmatpush3.bf16.msra.mxu1 (!%p114_p2), %v2827_v1 }
   0xc   : > { %2672 = vmatprep.subr.bf16.mxu0 (!%p114_p2), %v2828_v2  ;;  %2808 = vmatprep.subr.bf16.mxu1 (!%p114_p2), %v2828_v2 }
   0xd   : > { %s3605_s15 = smov (!%p136_p3, %s2204_s15), 255 }
   0xe   : > { %s2205_s18 = sshll.u32 %s3605_s15, 2 }
   0xf   : > { %s3202_s23 = scalar_lea.vmem %s3601_s0, %s2205_s18  ;;  %2673 = vmatpush3.bf16.msra.mxu0 %v2828_v2  ;;  %2813 = vmatpush3.bf16.msra.mxu1 %v2828_v2  ;;  %s3340_s28 = scalar_lea.vmem %s3603_s2, %s2205_s18 }
  0x10   : > { %v2831_v4 = vld [vmem:[%s3202_s23] sm:$0xff]   ;;  %2674 = vmatprep.subr.bf16.mxu0 %v2829_v3  ;;  %2809 = vmatprep.subr.bf16.mxu1 %v2829_v3  ;;  %v2833_v8 = vld [vmem:[%s3202_s23 + $0x8] sm:$0xff]   ;;  %v2835_v10 = vld [vmem:[%s3202_s23 + $0x10] sm:$0xff]  }
  0x11   : > { %v2832_v5 = vld [vmem:[%s3202_s23 + $0x100] sm:$0xff]   ;;  %2678 = vmatprep.mubr.msk.bf16.mxu0 %vm632_vm0, %v2831_v4  ;;  %v2834_v9 = vld [vmem:[%s3202_s23 + $0x108] sm:$0xff]   ;;  %v2836_v11 = vld [vmem:[%s3202_s23 + $0x110] sm:$0xff]  }
  0x12   : > { %2742 = vmatprep.mubr.msk.bf16.mxu1 %vm632_vm0, %v2832_v5  ;;  %v2837_v12 = vld [vmem:[%s3202_s23 + $0x18] sm:$0xff]   ;;  %v2839_v14 = vld [vmem:[%s3202_s23 + $0x20] sm:$0xff]   ;;  %v2841_v16 = vld [vmem:[%s3202_s23 + $0x28] sm:$0xff]  }
  0x13   : > { %2675 = vmatpush3.bf16.msra.mxu0 %v2829_v3  ;;  %2814 = vmatpush3.bf16.msra.mxu1 %v2829_v3  ;;  %v2838_v13 = vld [vmem:[%s3202_s23 + $0x118] sm:$0xff]   ;;  %v2840_v15 = vld [vmem:[%s3202_s23 + $0x120] sm:$0xff]   ;;  %v2842_v17 = vld [vmem:[%s3202_s23 + $0x128] sm:$0xff]  }
  0x14   : > { %2816 = vmatprep.subr.msk.bf16.mxu0 %vm825_vm1, %v2830_v6  ;;  %2817 = vmatprep.subr.msk.bf16.mxu1 %vm825_vm1, %v2830_v6  ;;  %v2843_v18 = vld [vmem:[%s3202_s23 + $0x30] sm:$0xff]   ;;  %v2845_v20 = vld [vmem:[%s3202_s23 + $0x38] sm:$0xff]   ;;  %v2847_v22 = vld [vmem:[%s3202_s23 + $0x40] sm:$0xff]  }
  0x15   : > { %v2844_v19 = vld [vmem:[%s3202_s23 + $0x130] sm:$0xff]   ;;  %v2846_v21 = vld [vmem:[%s3202_s23 + $0x138] sm:$0xff]   ;;  %v2848_v23 = vld [vmem:[%s3202_s23 + $0x140] sm:$0xff]  }
  0x16   : > { %v2849_v24 = vld [vmem:[%s3202_s23 + $0x48] sm:$0xff]   ;;  %v2851_v26 = vld [vmem:[%s3202_s23 + $0x50] sm:$0xff]   ;;  %v2853_v28 = vld [vmem:[%s3202_s23 + $0x58] sm:$0xff]  }
  0x17   : > { %2677 = vmatpush3.bf16.msra.mxu0 %v827_v7  ;;  %2815 = vmatpush3.bf16.msra.mxu1 %v827_v7  ;;  %v2850_v25 = vld [vmem:[%s3202_s23 + $0x148] sm:$0xff]   ;;  %v2852_v27 = vld [vmem:[%s3202_s23 + $0x150] sm:$0xff]   ;;  %v2854_v29 = vld [vmem:[%s3202_s23 + $0x158] sm:$0xff]  }
  0x18   : > { %v2855_v30 = vld [vmem:[%s3202_s23 + $0x60] sm:$0xff]   ;;  %v2857_v32 = vld [vmem:[%s3202_s23 + $0x68] sm:$0xff]   ;;  %v2859_v34 = vld [vmem:[%s3202_s23 + $0x70] sm:$0xff]  }
  0x19   : > { %v2856_v31 = vld [vmem:[%s3202_s23 + $0x160] sm:$0xff]   ;;  %v2858_v33 = vld [vmem:[%s3202_s23 + $0x168] sm:$0xff]   ;;  %v2860_v35 = vld [vmem:[%s3202_s23 + $0x170] sm:$0xff]  }
  0x1a   : > { %2679 = vmatmul.mubr.msk.bf16.vlgmr.msra.gmra.mrb[0].mxu0 %vm632_vm0, %v2833_v8  ;;  %2743 = vmatmul.mubr.msk.bf16.vlgmr.msra.gmra.mrb[0].mxu1 %vm632_vm0, %v2834_v9  ;;  %v2861_v36 = vld [vmem:[%s3202_s23 + $0x78] sm:$0xff]   ;;  %v2863_v38 = vld [vmem:[%s3202_s23 + $0x80] sm:$0xff]   ;;  %v2865_v40 = vld [vmem:[%s3202_s23 + $0x88] sm:$0xff]  }
  0x1b   : > { %2682 = vmatprep.mubr.msk.bf16.mxu0 %vm632_vm0, %v2835_v10  ;;  %2746 = vmatprep.mubr.msk.bf16.mxu1 %vm632_vm0, %v2836_v11  ;;  %v2862_v37 = vld [vmem:[%s3202_s23 + $0x178] sm:$0xff]   ;;  %v2864_v39 = vld [vmem:[%s3202_s23 + $0x180] sm:$0xff]   ;;  %v2866_v41 = vld [vmem:[%s3202_s23 + $0x188] sm:$0xff]  }
  0x1c   : > { %v2867_v42 = vld [vmem:[%s3202_s23 + $0x90] sm:$0xff]   ;;  %v2869_v44 = vld [vmem:[%s3202_s23 + $0x98] sm:$0xff]   ;;  %v2871_v46 = vld [vmem:[%s3202_s23 + $0xa0] sm:$0xff]  }
  0x1d   : > { %v2868_v43 = vld [vmem:[%s3202_s23 + $0x190] sm:$0xff]   ;;  %v2870_v45 = vld [vmem:[%s3202_s23 + $0x198] sm:$0xff]   ;;  %v2872_v47 = vld [vmem:[%s3202_s23 + $0x1a0] sm:$0xff]  }
  0x1e   : > { %v2873_v48 = vld [vmem:[%s3202_s23 + $0xa8] sm:$0xff]   ;;  %v2875_v50 = vld [vmem:[%s3202_s23 + $0xb0] sm:$0xff]   ;;  %v2877_v52 = vld [vmem:[%s3202_s23 + $0xb8] sm:$0xff]  }
  0x1f   : > { %v2874_v49 = vld [vmem:[%s3202_s23 + $0x1a8] sm:$0xff]   ;;  %v2876_v51 = vld [vmem:[%s3202_s23 + $0x1b0] sm:$0xff]   ;;  %v2878_v53 = vld [vmem:[%s3202_s23 + $0x1b8] sm:$0xff]  }
  0x20   : > { %v2879_v54 = vld [vmem:[%s3202_s23 + $0xc0] sm:$0xff]   ;;  %v2881_v56 = vld [vmem:[%s3202_s23 + $0xc8] sm:$0xff]   ;;  %v2883_v58 = vld [vmem:[%s3202_s23 + $0xd0] sm:$0xff]  }
  0x21   : > { %v2880_v55 = vld [vmem:[%s3202_s23 + $0x1c0] sm:$0xff]   ;;  %v2882_v57 = vld [vmem:[%s3202_s23 + $0x1c8] sm:$0xff]   ;;  %v2884_v59 = vld [vmem:[%s3202_s23 + $0x1d0] sm:$0xff]  }
  0x22   : > { %2683 = vmatmul.mubr.msk.bf16.gmra.mrb[4].mxu0 %vm632_vm0, %v2837_v12  ;;  %2747 = vmatmul.mubr.msk.bf16.gmra.mrb[4].mxu1 %vm632_vm0, %v2838_v13  ;;  %v2885_v60 = vld [vmem:[%s3202_s23 + $0xd8] sm:$0xff]   ;;  %v2887_v62 = vld [vmem:[%s3202_s23 + $0xe0] sm:$0xff]   ;;  %v2889_v0 = vld [vmem:[%s3202_s23 + $0xe8] sm:$0xff]  }
  0x23   : > { %2686 = vmatprep.mubr.msk.bf16.mxu0 %vm632_vm0, %v2839_v14  ;;  %2750 = vmatprep.mubr.msk.bf16.mxu1 %vm632_vm0, %v2840_v15  ;;  %v2886_v61 = vld [vmem:[%s3202_s23 + $0x1d8] sm:$0xff]   ;;  %v2888_v63 = vld [vmem:[%s3202_s23 + $0x1e0] sm:$0xff]   ;;  %v2890_v1 = vld [vmem:[%s3202_s23 + $0x1e8] sm:$0xff]  }
  0x24   : > { %v2891_v2 = vld [vmem:[%s3202_s23 + $0xf0] sm:$0xff]   ;;  %v2893_v4 = vld [vmem:[%s3202_s23 + $0xf8] sm:$0xff]  }
  0x25   : > { %v2892_v3 = vld [vmem:[%s3202_s23 + $0x1f0] sm:$0xff]   ;;  %v2894_v5 = vld [vmem:[%s3202_s23 + $0x1f8] sm:$0xff]  }
  0x2a   : > { %2687 = vmatmul.mubr.msk.bf16.gmra.mrb[8].mxu0 %vm632_vm0, %v2841_v16  ;;  %2751 = vmatmul.mubr.msk.bf16.gmra.mrb[8].mxu1 %vm632_vm0, %v2842_v17 }
  0x2b   : > { %2690 = vmatprep.mubr.msk.bf16.mxu0 %vm632_vm0, %v2843_v18  ;;  %2754 = vmatprep.mubr.msk.bf16.mxu1 %vm632_vm0, %v2844_v19 }
  0x32   : > { %2691 = vmatmul.mubr.msk.bf16.gmra.mrb[12].mxu0 %vm632_vm0, %v2845_v20  ;;  %2755 = vmatmul.mubr.msk.bf16.gmra.mrb[12].mxu1 %vm632_vm0, %v2846_v21 }
  0x33   : > { %2694 = vmatprep.mubr.msk.bf16.mxu0 %vm632_vm0, %v2847_v22  ;;  %2758 = vmatprep.mubr.msk.bf16.mxu1 %vm632_vm0, %v2848_v23 }
  0x3a   : > { %2695 = vmatmul.mubr.msk.bf16.gmra.mrb[16].mxu0 %vm632_vm0, %v2849_v24  ;;  %2759 = vmatmul.mubr.msk.bf16.gmra.mrb[16].mxu1 %vm632_vm0, %v2850_v25 }
  0x3b   : > { %2698 = vmatprep.mubr.msk.bf16.mxu0 %vm632_vm0, %v2851_v26  ;;  %2762 = vmatprep.mubr.msk.bf16.mxu1 %vm632_vm0, %v2852_v27 }
  0x42   : > { %2699 = vmatmul.mubr.msk.bf16.gmra.mrb[20].mxu0 %vm632_vm0, %v2853_v28  ;;  %2763 = vmatmul.mubr.msk.bf16.gmra.mrb[20].mxu1 %vm632_vm0, %v2854_v29 }
  0x43   : > { %2702 = vmatprep.mubr.msk.bf16.mxu0 %vm632_vm0, %v2855_v30  ;;  %2766 = vmatprep.mubr.msk.bf16.mxu1 %vm632_vm0, %v2856_v31 }
  0x4a   : > { %2703 = vmatmul.mubr.msk.bf16.gmra.mrb[24].mxu0 %vm632_vm0, %v2857_v32  ;;  %2767 = vmatmul.mubr.msk.bf16.gmra.mrb[24].mxu1 %vm632_vm0, %v2858_v33 }
  0x4b   : > { %2706 = vmatprep.mubr.msk.bf16.mxu0 %vm632_vm0, %v2859_v34  ;;  %2770 = vmatprep.mubr.msk.bf16.mxu1 %vm632_vm0, %v2860_v35 }
  0x52   : > { %2707 = vmatmul.mubr.msk.bf16.gmra.mrb[28].mxu0 %vm632_vm0, %v2861_v36  ;;  %2771 = vmatmul.mubr.msk.bf16.gmra.mrb[28].mxu1 %vm632_vm0, %v2862_v37 }
  0x53   : > { %2710 = vmatprep.mubr.msk.bf16.mxu0 %vm632_vm0, %v2863_v38  ;;  %2774 = vmatprep.mubr.msk.bf16.mxu1 %vm632_vm0, %v2864_v39 }
  0x5a   : > { %2711 = vmatmul.mubr.msk.bf16.gmra.mrb[32].mxu0 %vm632_vm0, %v2865_v40  ;;  %2775 = vmatmul.mubr.msk.bf16.gmra.mrb[32].mxu1 %vm632_vm0, %v2866_v41 }
  0x5b   : > { %2714 = vmatprep.mubr.msk.bf16.mxu0 %vm632_vm0, %v2867_v42  ;;  %2778 = vmatprep.mubr.msk.bf16.mxu1 %vm632_vm0, %v2868_v43 }
  0x62   : > { %2715 = vmatmul.mubr.msk.bf16.gmra.mrb[36].mxu0 %vm632_vm0, %v2869_v44  ;;  %2779 = vmatmul.mubr.msk.bf16.gmra.mrb[36].mxu1 %vm632_vm0, %v2870_v45 }
  0x63   : > { %2718 = vmatprep.mubr.msk.bf16.mxu0 %vm632_vm0, %v2871_v46  ;;  %2782 = vmatprep.mubr.msk.bf16.mxu1 %vm632_vm0, %v2872_v47 }
  0x6a   : > { %2719 = vmatmul.mubr.msk.bf16.gmra.mrb[40].mxu0 %vm632_vm0, %v2873_v48  ;;  %2783 = vmatmul.mubr.msk.bf16.gmra.mrb[40].mxu1 %vm632_vm0, %v2874_v49 }
  0x6b   : > { %2722 = vmatprep.mubr.msk.bf16.mxu0 %vm632_vm0, %v2875_v50  ;;  %2786 = vmatprep.mubr.msk.bf16.mxu1 %vm632_vm0, %v2876_v51 }
  0x72   : > { %2723 = vmatmul.mubr.msk.bf16.gmra.mrb[44].mxu0 %vm632_vm0, %v2877_v52  ;;  %2787 = vmatmul.mubr.msk.bf16.gmra.mrb[44].mxu1 %vm632_vm0, %v2878_v53 }
  0x73   : > { %2726 = vmatprep.mubr.msk.bf16.mxu0 %vm632_vm0, %v2879_v54  ;;  %2790 = vmatprep.mubr.msk.bf16.mxu1 %vm632_vm0, %v2880_v55 }
  0x7a   : > { %2727 = vmatmul.mubr.msk.bf16.gmra.mrb[48].mxu0 %vm632_vm0, %v2881_v56  ;;  %2791 = vmatmul.mubr.msk.bf16.gmra.mrb[48].mxu1 %vm632_vm0, %v2882_v57 }
  0x7b   : > { %2730 = vmatprep.mubr.msk.bf16.mxu0 %vm632_vm0, %v2883_v58  ;;  %2794 = vmatprep.mubr.msk.bf16.mxu1 %vm632_vm0, %v2884_v59 }
  0x82   : > { %2731 = vmatmul.mubr.msk.bf16.gmra.mrb[52].mxu0 %vm632_vm0, %v2885_v60  ;;  %2795 = vmatmul.mubr.msk.bf16.gmra.mrb[52].mxu1 %vm632_vm0, %v2886_v61 }
  0x83   : > { %2734 = vmatprep.mubr.msk.bf16.mxu0 %vm632_vm0, %v2887_v62  ;;  %2798 = vmatprep.mubr.msk.bf16.mxu1 %vm632_vm0, %v2888_v63 }
  0x8a   : > { %2735 = vmatmul.mubr.msk.bf16.gmra.mrb[56].mxu0 %vm632_vm0, %v2889_v0  ;;  %2799 = vmatmul.mubr.msk.bf16.gmra.mrb[56].mxu1 %vm632_vm0, %v2890_v1 }
  0x8b   : > { %2738 = vmatprep.mubr.msk.bf16.mxu0 %vm632_vm0, %v2891_v2  ;;  %2802 = vmatprep.mubr.msk.bf16.mxu1 %vm632_vm0, %v2892_v3 }
  0x92   : > { %2739 = vmatmul.mubr.msk.bf16.gmra.mrb[60].mxu0 %vm632_vm0, %v2893_v4  ;;  %2803 = vmatmul.mubr.msk.bf16.gmra.mrb[60].mxu1 %vm632_vm0, %v2894_v5 }
  0xed   : > { %v2680_v6 = vpop.f32.mrb[0].mxu0  ;;  %v2744_v7 = vpop.f32.mrb[0].mxu1 }
  0xee   : > { %2895 = vtanh.f32 %v2680_v6  ;;  %v863_v8 = vpop.f32.mrb[1].mxu0  ;;  %v1119_v9 = vpop.f32.mrb[1].mxu1 }
  0xef   : > { %2897 = vtanh.f32 %v2744_v7  ;;  %v2681_v10 = vpop.f32.mrb[2].mxu0  ;;  %v2745_v11 = vpop.f32.mrb[2].mxu1 }
  0xf0   : > { %2899 = vtanh.f32 %v863_v8  ;;  %v866_v12 = vpop.f32.mrb[3].mxu0  ;;  %v1122_v13 = vpop.f32.mrb[3].mxu1 }
  0xf1   : > { %2901 = vtanh.f32 %v1119_v9 }
  0xf2   : > { %2903 = vtanh.f32 %v2681_v10 }
  0xf3   : > { %2905 = vtanh.f32 %v2745_v11 }
  0xf4   : > { %2907 = vtanh.f32 %v866_v12 }
  0xf5   : > { %2909 = vtanh.f32 %v1122_v13  ;;  %v2684_v14 = vpop.f32.mrb[4].mxu0  ;;  %v2748_v15 = vpop.f32.mrb[4].mxu1 }
  0xf6   : > { %2911 = vtanh.f32 %v2684_v14  ;;  %v879_v16 = vpop.f32.mrb[5].mxu0  ;;  %v1135_v17 = vpop.f32.mrb[5].mxu1 }
  0xf7   : > { %2913 = vtanh.f32 %v2748_v15  ;;  %v2685_v18 = vpop.f32.mrb[6].mxu0  ;;  %v2749_v19 = vpop.f32.mrb[6].mxu1 }
  0xf8   : > { %v2896_v20 = vpop.eup %2895  ;;  %2915 = vtanh.f32 %v879_v16  ;;  %v882_v21 = vpop.f32.mrb[7].mxu0 }
  0xf9   : > { %v1138_v22 = vpop.f32.mrb[7].mxu1  ;;  %v2898_v23 = vpop.eup %2897  ;;  %v2473_v24 = vpack.c.bf16 %v2896_v20, %v2896_v20  ;;  %2917 = vtanh.f32 %v1135_v17 }
  0xfa   : > { %v2900_v25 = vpop.eup %2899  ;;  %v2537_v26 = vpack.c.bf16 %v2898_v23, %v2898_v23  ;;  %2919 = vtanh.f32 %v2685_v18 }
  0xfb   : > { %v2902_v27 = vpop.eup %2901  ;;  %2017 = vst.msk [vmem:[%s3340_s28 + $0x8] sm:$0xf] %vm2014_vm2, %v2473_v24  ;;  %v2471_v28 = vpack.c.bf16 %v2900_v25, %v2900_v25  ;;  %2921 = vtanh.f32 %v2749_v19 }
  0xfc   : > { %v2904_v29 = vpop.eup %2903  ;;  %2081 = vst.msk [vmem:[%s3340_s28 + $0x108] sm:$0xf] %vm2014_vm2, %v2537_v26  ;;  %v2535_v30 = vpack.c.bf16 %v2902_v27, %v2902_v27  ;;  %2923 = vtanh.f32 %v882_v21 }
  0xfd   : > { %v2906_v31 = vpop.eup %2905  ;;  %2015 = vst.msk [vmem:[%s3340_s28] sm:$0xf] %vm2014_vm2, %v2471_v28  ;;  %v2474_v32 = vpack.c.bf16 %v2904_v29, %v2904_v29  ;;  %2925 = vtanh.f32 %v1138_v22  ;;  %v2688_v33 = vpop.f32.mrb[8].mxu0 }
  0xfe   : > { %v2752_v34 = vpop.f32.mrb[8].mxu1  ;;  %v2908_v35 = vpop.eup %2907  ;;  %2079 = vst.msk [vmem:[%s3340_s28 + $0x100] sm:$0xf] %vm2014_vm2, %v2535_v30  ;;  %v2538_v36 = vpack.c.bf16 %v2906_v31, %v2906_v31  ;;  %2927 = vtanh.f32 %v2688_v33 }
  0xff   : > { %v895_v37 = vpop.f32.mrb[9].mxu0  ;;  %v1151_v38 = vpop.f32.mrb[9].mxu1  ;;  %2018 = vst.msk [vmem:[%s3340_s28 + $0xc] sm:$0xf] %vm2014_vm2, %v2474_v32  ;;  %v2472_v40 = vpack.c.bf16 %v2908_v35, %v2908_v35  ;;  %2929 = vtanh.f32 %v2752_v34 }
 0x100   : > { %v2910_v39 = vpop.eup %2909  ;;  %v2689_v41 = vpop.f32.mrb[10].mxu0  ;;  %2082 = vst.msk [vmem:[%s3340_s28 + $0x10c] sm:$0xf] %vm2014_vm2, %v2538_v36  ;;  %2931 = vtanh.f32 %v895_v37 }
 0x101   : > { %v2753_v42 = vpop.f32.mrb[10].mxu1  ;;  %v2912_v43 = vpop.eup %2911  ;;  %v2536_v44 = vpack.c.bf16 %v2910_v39, %v2910_v39  ;;  %2016 = vst.msk [vmem:[%s3340_s28 + $0x4] sm:$0xf] %vm2014_vm2, %v2472_v40  ;;  %2933 = vtanh.f32 %v1151_v38 }
 0x102   : > { %v898_v45 = vpop.f32.mrb[11].mxu0  ;;  %v1154_v46 = vpop.f32.mrb[11].mxu1  ;;  %v2477_v48 = vpack.c.bf16 %v2912_v43, %v2912_v43  ;;  %2935 = vtanh.f32 %v2689_v41 }
 0x103   : > { %v2914_v47 = vpop.eup %2913  ;;  %2080 = vst.msk [vmem:[%s3340_s28 + $0x104] sm:$0xf] %vm2014_vm2, %v2536_v44  ;;  %2937 = vtanh.f32 %v2753_v42 }
 0x104   : > { %v2916_v49 = vpop.eup %2915  ;;  %v2541_v50 = vpack.c.bf16 %v2914_v47, %v2914_v47  ;;  %2021 = vst.msk [vmem:[%s3340_s28 + $0x18] sm:$0xf] %vm2014_vm2, %v2477_v48  ;;  %2939 = vtanh.f32 %v898_v45 }
 0x105   : > { %v2918_v51 = vpop.eup %2917  ;;  %v2475_v52 = vpack.c.bf16 %v2916_v49, %v2916_v49  ;;  %2941 = vtanh.f32 %v1154_v46  ;;  %v2692_v57 = vpop.f32.mrb[12].mxu0 }
 0x106   : > { %v2920_v53 = vpop.eup %2919  ;;  %2085 = vst.msk [vmem:[%s3340_s28 + $0x118] sm:$0xf] %vm2014_vm2, %v2541_v50  ;;  %v2539_v54 = vpack.c.bf16 %v2918_v51, %v2918_v51  ;;  %v2756_v58 = vpop.f32.mrb[12].mxu1  ;;  %2943 = vtanh.f32 %v2692_v57 }
 0x107   : > { %v2922_v55 = vpop.eup %2921  ;;  %2019 = vst.msk [vmem:[%s3340_s28 + $0x10] sm:$0xf] %vm2014_vm2, %v2475_v52  ;;  %v2478_v56 = vpack.c.bf16 %v2920_v53, %v2920_v53  ;;  %v911_v61 = vpop.f32.mrb[13].mxu0  ;;  %2945 = vtanh.f32 %v2756_v58 }
 0x108   : > { %v2924_v59 = vpop.eup %2923  ;;  %2083 = vst.msk [vmem:[%s3340_s28 + $0x110] sm:$0xf] %vm2014_vm2, %v2539_v54  ;;  %v2542_v60 = vpack.c.bf16 %v2922_v55, %v2922_v55  ;;  %v1167_v62 = vpop.f32.mrb[13].mxu1  ;;  %2947 = vtanh.f32 %v911_v61 }
 0x109   : > { %v2926_v63 = vpop.eup %2925  ;;  %2022 = vst.msk [vmem:[%s3340_s28 + $0x1c] sm:$0xf] %vm2014_vm2, %v2478_v56  ;;  %v2476_v0 = vpack.c.bf16 %v2924_v59, %v2924_v59  ;;  %v2693_v1 = vpop.f32.mrb[14].mxu0  ;;  %2949 = vtanh.f32 %v1167_v62 }
 0x10a   : > { %v2757_v2 = vpop.f32.mrb[14].mxu1  ;;  %v2928_v3 = vpop.eup %2927  ;;  %2086 = vst.msk [vmem:[%s3340_s28 + $0x11c] sm:$0xf] %vm2014_vm2, %v2542_v60  ;;  %v2540_v4 = vpack.c.bf16 %v2926_v63, %v2926_v63  ;;  %2951 = vtanh.f32 %v2693_v1 }
 0x10b   : > { %v914_v5 = vpop.f32.mrb[15].mxu0  ;;  %v1170_v6 = vpop.f32.mrb[15].mxu1  ;;  %2020 = vst.msk [vmem:[%s3340_s28 + $0x14] sm:$0xf] %vm2014_vm2, %v2476_v0  ;;  %v2481_v8 = vpack.c.bf16 %v2928_v3, %v2928_v3  ;;  %2953 = vtanh.f32 %v2757_v2 }
 0x10c   : > { %v2930_v7 = vpop.eup %2929  ;;  %2084 = vst.msk [vmem:[%s3340_s28 + $0x114] sm:$0xf] %vm2014_vm2, %v2540_v4  ;;  %2955 = vtanh.f32 %v914_v5 }
 0x10d   : > { %v2932_v9 = vpop.eup %2931  ;;  %v2545_v10 = vpack.c.bf16 %v2930_v7, %v2930_v7  ;;  %2025 = vst.msk [vmem:[%s3340_s28 + $0x28] sm:$0xf] %vm2014_vm2, %v2481_v8  ;;  %2957 = vtanh.f32 %v1170_v6  ;;  %v2696_v17 = vpop.f32.mrb[16].mxu0 }
 0x10e   : > { %v2934_v11 = vpop.eup %2933  ;;  %v2479_v12 = vpack.c.bf16 %v2932_v9, %v2932_v9  ;;  %v2760_v18 = vpop.f32.mrb[16].mxu1  ;;  %2959 = vtanh.f32 %v2696_v17 }
 0x10f   : > { %v2936_v13 = vpop.eup %2935  ;;  %2089 = vst.msk [vmem:[%s3340_s28 + $0x128] sm:$0xf] %vm2014_vm2, %v2545_v10  ;;  %v2543_v14 = vpack.c.bf16 %v2934_v11, %v2934_v11  ;;  %v927_v21 = vpop.f32.mrb[17].mxu0  ;;  %2961 = vtanh.f32 %v2760_v18 }
 0x110   : > { %v2938_v15 = vpop.eup %2937  ;;  %2023 = vst.msk [vmem:[%s3340_s28 + $0x20] sm:$0xf] %vm2014_vm2, %v2479_v12  ;;  %v2482_v16 = vpack.c.bf16 %v2936_v13, %v2936_v13  ;;  %v1183_v22 = vpop.f32.mrb[17].mxu1  ;;  %2963 = vtanh.f32 %v927_v21 }
 0x111   : > { %v2940_v19 = vpop.eup %2939  ;;  %2087 = vst.msk [vmem:[%s3340_s28 + $0x120] sm:$0xf] %vm2014_vm2, %v2543_v14  ;;  %v2546_v20 = vpack.c.bf16 %v2938_v15, %v2938_v15  ;;  %v2697_v25 = vpop.f32.mrb[18].mxu0  ;;  %2965 = vtanh.f32 %v1183_v22 }
 0x112   : > { %v2942_v23 = vpop.eup %2941  ;;  %2026 = vst.msk [vmem:[%s3340_s28 + $0x2c] sm:$0xf] %vm2014_vm2, %v2482_v16  ;;  %v2480_v24 = vpack.c.bf16 %v2940_v19, %v2940_v19  ;;  %v2761_v26 = vpop.f32.mrb[18].mxu1  ;;  %2967 = vtanh.f32 %v2697_v25 }
 0x113   : > { %v2944_v27 = vpop.eup %2943  ;;  %2090 = vst.msk [vmem:[%s3340_s28 + $0x12c] sm:$0xf] %vm2014_vm2, %v2546_v20  ;;  %v2544_v28 = vpack.c.bf16 %v2942_v23, %v2942_v23  ;;  %v930_v29 = vpop.f32.mrb[19].mxu0  ;;  %2969 = vtanh.f32 %v2761_v26 }
 0x114   : > { %v1186_v30 = vpop.f32.mrb[19].mxu1  ;;  %v2946_v31 = vpop.eup %2945  ;;  %2024 = vst.msk [vmem:[%s3340_s28 + $0x24] sm:$0xf] %vm2014_vm2, %v2480_v24  ;;  %v2485_v32 = vpack.c.bf16 %v2944_v27, %v2944_v27  ;;  %2971 = vtanh.f32 %v930_v29 }
 0x115   : > { %v2948_v33 = vpop.eup %2947  ;;  %2088 = vst.msk [vmem:[%s3340_s28 + $0x124] sm:$0xf] %vm2014_vm2, %v2544_v28  ;;  %v2549_v34 = vpack.c.bf16 %v2946_v31, %v2946_v31  ;;  %2973 = vtanh.f32 %v1186_v30  ;;  %v2700_v41 = vpop.f32.mrb[20].mxu0 }
 0x116   : > { %v2950_v35 = vpop.eup %2949  ;;  %2029 = vst.msk [vmem:[%s3340_s28 + $0x38] sm:$0xf] %vm2014_vm2, %v2485_v32  ;;  %v2483_v36 = vpack.c.bf16 %v2948_v33, %v2948_v33  ;;  %v2764_v42 = vpop.f32.mrb[20].mxu1  ;;  %2975 = vtanh.f32 %v2700_v41 }
 0x117   : > { %v2952_v37 = vpop.eup %2951  ;;  %2093 = vst.msk [vmem:[%s3340_s28 + $0x138] sm:$0xf] %vm2014_vm2, %v2549_v34  ;;  %v2547_v38 = vpack.c.bf16 %v2950_v35, %v2950_v35  ;;  %v943_v45 = vpop.f32.mrb[21].mxu0  ;;  %2977 = vtanh.f32 %v2764_v42 }
 0x118   : > { %v2954_v39 = vpop.eup %2953  ;;  %2027 = vst.msk [vmem:[%s3340_s28 + $0x30] sm:$0xf] %vm2014_vm2, %v2483_v36  ;;  %v2486_v40 = vpack.c.bf16 %v2952_v37, %v2952_v37  ;;  %v1199_v46 = vpop.f32.mrb[21].mxu1  ;;  %2979 = vtanh.f32 %v943_v45 }
 0x119   : > { %v2956_v43 = vpop.eup %2955  ;;  %2091 = vst.msk [vmem:[%s3340_s28 + $0x130] sm:$0xf] %vm2014_vm2, %v2547_v38  ;;  %v2550_v44 = vpack.c.bf16 %v2954_v39, %v2954_v39  ;;  %v2701_v49 = vpop.f32.mrb[22].mxu0  ;;  %2981 = vtanh.f32 %v1199_v46 }
 0x11a   : > { %v2958_v47 = vpop.eup %2957  ;;  %2030 = vst.msk [vmem:[%s3340_s28 + $0x3c] sm:$0xf] %vm2014_vm2, %v2486_v40  ;;  %v2484_v48 = vpack.c.bf16 %v2956_v43, %v2956_v43  ;;  %v2765_v50 = vpop.f32.mrb[22].mxu1  ;;  %2983 = vtanh.f32 %v2701_v49 }
 0x11b   : > { %v2960_v51 = vpop.eup %2959  ;;  %2094 = vst.msk [vmem:[%s3340_s28 + $0x13c] sm:$0xf] %vm2014_vm2, %v2550_v44  ;;  %v2548_v52 = vpack.c.bf16 %v2958_v47, %v2958_v47  ;;  %v946_v53 = vpop.f32.mrb[23].mxu0  ;;  %2985 = vtanh.f32 %v2765_v50 }
 0x11c   : > { %v1202_v54 = vpop.f32.mrb[23].mxu1  ;;  %v2962_v55 = vpop.eup %2961  ;;  %2028 = vst.msk [vmem:[%s3340_s28 + $0x34] sm:$0xf] %vm2014_vm2, %v2484_v48  ;;  %v2489_v56 = vpack.c.bf16 %v2960_v51, %v2960_v51  ;;  %2987 = vtanh.f32 %v946_v53 }
 0x11d   : > { %v2964_v57 = vpop.eup %2963  ;;  %2092 = vst.msk [vmem:[%s3340_s28 + $0x134] sm:$0xf] %vm2014_vm2, %v2548_v52  ;;  %v2553_v58 = vpack.c.bf16 %v2962_v55, %v2962_v55  ;;  %2989 = vtanh.f32 %v1202_v54  ;;  %v2704_v1 = vpop.f32.mrb[24].mxu0 }
 0x11e   : > { %v2966_v59 = vpop.eup %2965  ;;  %2033 = vst.msk [vmem:[%s3340_s28 + $0x48] sm:$0xf] %vm2014_vm2, %v2489_v56  ;;  %v2487_v60 = vpack.c.bf16 %v2964_v57, %v2964_v57  ;;  %v2768_v2 = vpop.f32.mrb[24].mxu1  ;;  %2991 = vtanh.f32 %v2704_v1 }
 0x11f   : > { %v2968_v61 = vpop.eup %2967  ;;  %2097 = vst.msk [vmem:[%s3340_s28 + $0x148] sm:$0xf] %vm2014_vm2, %v2553_v58  ;;  %v2551_v62 = vpack.c.bf16 %v2966_v59, %v2966_v59  ;;  %v959_v5 = vpop.f32.mrb[25].mxu0  ;;  %2993 = vtanh.f32 %v2768_v2 }
 0x120   : > { %v2970_v63 = vpop.eup %2969  ;;  %2031 = vst.msk [vmem:[%s3340_s28 + $0x40] sm:$0xf] %vm2014_vm2, %v2487_v60  ;;  %v2490_v0 = vpack.c.bf16 %v2968_v61, %v2968_v61  ;;  %v1215_v6 = vpop.f32.mrb[25].mxu1  ;;  %2995 = vtanh.f32 %v959_v5 }
 0x121   : > { %v2972_v3 = vpop.eup %2971  ;;  %2095 = vst.msk [vmem:[%s3340_s28 + $0x140] sm:$0xf] %vm2014_vm2, %v2551_v62  ;;  %v2554_v4 = vpack.c.bf16 %v2970_v63, %v2970_v63  ;;  %v2705_v9 = vpop.f32.mrb[26].mxu0  ;;  %2997 = vtanh.f32 %v1215_v6 }
 0x122   : > { %v2974_v7 = vpop.eup %2973  ;;  %2034 = vst.msk [vmem:[%s3340_s28 + $0x4c] sm:$0xf] %vm2014_vm2, %v2490_v0  ;;  %v2488_v8 = vpack.c.bf16 %v2972_v3, %v2972_v3  ;;  %v2769_v10 = vpop.f32.mrb[26].mxu1  ;;  %2999 = vtanh.f32 %v2705_v9 }
 0x123   : > { %v2976_v11 = vpop.eup %2975  ;;  %2098 = vst.msk [vmem:[%s3340_s28 + $0x14c] sm:$0xf] %vm2014_vm2, %v2554_v4  ;;  %v2552_v12 = vpack.c.bf16 %v2974_v7, %v2974_v7  ;;  %v962_v13 = vpop.f32.mrb[27].mxu0  ;;  %3001 = vtanh.f32 %v2769_v10 }
 0x124   : > { %v1218_v14 = vpop.f32.mrb[27].mxu1  ;;  %v2978_v15 = vpop.eup %2977  ;;  %2032 = vst.msk [vmem:[%s3340_s28 + $0x44] sm:$0xf] %vm2014_vm2, %v2488_v8  ;;  %v2493_v16 = vpack.c.bf16 %v2976_v11, %v2976_v11  ;;  %3003 = vtanh.f32 %v962_v13 }
 0x125   : > { %v2980_v17 = vpop.eup %2979  ;;  %2096 = vst.msk [vmem:[%s3340_s28 + $0x144] sm:$0xf] %vm2014_vm2, %v2552_v12  ;;  %v2557_v18 = vpack.c.bf16 %v2978_v15, %v2978_v15  ;;  %3005 = vtanh.f32 %v1218_v14  ;;  %v2708_v25 = vpop.f32.mrb[28].mxu0 }
 0x126   : > { %v2982_v19 = vpop.eup %2981  ;;  %2037 = vst.msk [vmem:[%s3340_s28 + $0x58] sm:$0xf] %vm2014_vm2, %v2493_v16  ;;  %v2491_v20 = vpack.c.bf16 %v2980_v17, %v2980_v17  ;;  %v2772_v26 = vpop.f32.mrb[28].mxu1  ;;  %3007 = vtanh.f32 %v2708_v25 }
 0x127   : > { %v2984_v21 = vpop.eup %2983  ;;  %2101 = vst.msk [vmem:[%s3340_s28 + $0x158] sm:$0xf] %vm2014_vm2, %v2557_v18  ;;  %v2555_v22 = vpack.c.bf16 %v2982_v19, %v2982_v19  ;;  %v975_v29 = vpop.f32.mrb[29].mxu0  ;;  %3009 = vtanh.f32 %v2772_v26 }
 0x128   : > { %v2986_v23 = vpop.eup %2985  ;;  %2035 = vst.msk [vmem:[%s3340_s28 + $0x50] sm:$0xf] %vm2014_vm2, %v2491_v20  ;;  %v2494_v24 = vpack.c.bf16 %v2984_v21, %v2984_v21  ;;  %v1231_v30 = vpop.f32.mrb[29].mxu1  ;;  %3011 = vtanh.f32 %v975_v29 }
 0x129   : > { %v2988_v27 = vpop.eup %2987  ;;  %2099 = vst.msk [vmem:[%s3340_s28 + $0x150] sm:$0xf] %vm2014_vm2, %v2555_v22  ;;  %v2558_v28 = vpack.c.bf16 %v2986_v23, %v2986_v23  ;;  %v2709_v33 = vpop.f32.mrb[30].mxu0  ;;  %3013 = vtanh.f32 %v1231_v30 }
 0x12a   : > { %v2990_v31 = vpop.eup %2989  ;;  %2038 = vst.msk [vmem:[%s3340_s28 + $0x5c] sm:$0xf] %vm2014_vm2, %v2494_v24  ;;  %v2492_v32 = vpack.c.bf16 %v2988_v27, %v2988_v27  ;;  %v2773_v34 = vpop.f32.mrb[30].mxu1  ;;  %3015 = vtanh.f32 %v2709_v33 }
 0x12b   : > { %v2992_v35 = vpop.eup %2991  ;;  %2102 = vst.msk [vmem:[%s3340_s28 + $0x15c] sm:$0xf] %vm2014_vm2, %v2558_v28  ;;  %v2556_v36 = vpack.c.bf16 %v2990_v31, %v2990_v31  ;;  %v978_v37 = vpop.f32.mrb[31].mxu0  ;;  %3017 = vtanh.f32 %v2773_v34 }
 0x12c   : > { %v1234_v38 = vpop.f32.mrb[31].mxu1  ;;  %v2994_v39 = vpop.eup %2993  ;;  %2036 = vst.msk [vmem:[%s3340_s28 + $0x54] sm:$0xf] %vm2014_vm2, %v2492_v32  ;;  %v2497_v40 = vpack.c.bf16 %v2992_v35, %v2992_v35  ;;  %3019 = vtanh.f32 %v978_v37 }
 0x12d   : > { %v2996_v41 = vpop.eup %2995  ;;  %2100 = vst.msk [vmem:[%s3340_s28 + $0x154] sm:$0xf] %vm2014_vm2, %v2556_v36  ;;  %v2561_v42 = vpack.c.bf16 %v2994_v39, %v2994_v39  ;;  %3021 = vtanh.f32 %v1234_v38  ;;  %v2712_v49 = vpop.f32.mrb[32].mxu0 }
 0x12e   : > { %v2998_v43 = vpop.eup %2997  ;;  %2041 = vst.msk [vmem:[%s3340_s28 + $0x68] sm:$0xf] %vm2014_vm2, %v2497_v40  ;;  %v2495_v44 = vpack.c.bf16 %v2996_v41, %v2996_v41  ;;  %v2776_v50 = vpop.f32.mrb[32].mxu1  ;;  %3023 = vtanh.f32 %v2712_v49 }
 0x12f   : > { %v3000_v45 = vpop.eup %2999  ;;  %2105 = vst.msk [vmem:[%s3340_s28 + $0x168] sm:$0xf] %vm2014_vm2, %v2561_v42  ;;  %v2559_v46 = vpack.c.bf16 %v2998_v43, %v2998_v43  ;;  %v991_v53 = vpop.f32.mrb[33].mxu0  ;;  %3025 = vtanh.f32 %v2776_v50 }
 0x130   : > { %v3002_v47 = vpop.eup %3001  ;;  %2039 = vst.msk [vmem:[%s3340_s28 + $0x60] sm:$0xf] %vm2014_vm2, %v2495_v44  ;;  %v2498_v48 = vpack.c.bf16 %v3000_v45, %v3000_v45  ;;  %v1247_v54 = vpop.f32.mrb[33].mxu1  ;;  %3027 = vtanh.f32 %v991_v53 }
 0x131   : > { %v3004_v51 = vpop.eup %3003  ;;  %2103 = vst.msk [vmem:[%s3340_s28 + $0x160] sm:$0xf] %vm2014_vm2, %v2559_v46  ;;  %v2562_v52 = vpack.c.bf16 %v3002_v47, %v3002_v47  ;;  %v2713_v57 = vpop.f32.mrb[34].mxu0  ;;  %3029 = vtanh.f32 %v1247_v54 }
 0x132   : > { %v3006_v55 = vpop.eup %3005  ;;  %2042 = vst.msk [vmem:[%s3340_s28 + $0x6c] sm:$0xf] %vm2014_vm2, %v2498_v48  ;;  %v2496_v56 = vpack.c.bf16 %v3004_v51, %v3004_v51  ;;  %v2777_v58 = vpop.f32.mrb[34].mxu1  ;;  %3031 = vtanh.f32 %v2713_v57 }
 0x133   : > { %v3008_v59 = vpop.eup %3007  ;;  %2106 = vst.msk [vmem:[%s3340_s28 + $0x16c] sm:$0xf] %vm2014_vm2, %v2562_v52  ;;  %v2560_v60 = vpack.c.bf16 %v3006_v55, %v3006_v55  ;;  %v994_v61 = vpop.f32.mrb[35].mxu0  ;;  %3033 = vtanh.f32 %v2777_v58 }
 0x134   : > { %v1250_v62 = vpop.f32.mrb[35].mxu1  ;;  %v3010_v63 = vpop.eup %3009  ;;  %2040 = vst.msk [vmem:[%s3340_s28 + $0x64] sm:$0xf] %vm2014_vm2, %v2496_v56  ;;  %v2501_v0 = vpack.c.bf16 %v3008_v59, %v3008_v59  ;;  %3035 = vtanh.f32 %v994_v61 }
 0x135   : > { %v3012_v1 = vpop.eup %3011  ;;  %2104 = vst.msk [vmem:[%s3340_s28 + $0x164] sm:$0xf] %vm2014_vm2, %v2560_v60  ;;  %v2565_v2 = vpack.c.bf16 %v3010_v63, %v3010_v63  ;;  %3037 = vtanh.f32 %v1250_v62  ;;  %v2716_v9 = vpop.f32.mrb[36].mxu0 }
 0x136   : > { %v3014_v3 = vpop.eup %3013  ;;  %2045 = vst.msk [vmem:[%s3340_s28 + $0x78] sm:$0xf] %vm2014_vm2, %v2501_v0  ;;  %v2499_v4 = vpack.c.bf16 %v3012_v1, %v3012_v1  ;;  %v2780_v10 = vpop.f32.mrb[36].mxu1  ;;  %3039 = vtanh.f32 %v2716_v9 }
 0x137   : > { %v3016_v5 = vpop.eup %3015  ;;  %2109 = vst.msk [vmem:[%s3340_s28 + $0x178] sm:$0xf] %vm2014_vm2, %v2565_v2  ;;  %v2563_v6 = vpack.c.bf16 %v3014_v3, %v3014_v3  ;;  %v1007_v13 = vpop.f32.mrb[37].mxu0  ;;  %3041 = vtanh.f32 %v2780_v10 }
 0x138   : > { %v3018_v7 = vpop.eup %3017  ;;  %2043 = vst.msk [vmem:[%s3340_s28 + $0x70] sm:$0xf] %vm2014_vm2, %v2499_v4  ;;  %v2502_v8 = vpack.c.bf16 %v3016_v5, %v3016_v5  ;;  %v1263_v14 = vpop.f32.mrb[37].mxu1  ;;  %3043 = vtanh.f32 %v1007_v13 }
 0x139   : > { %v3020_v11 = vpop.eup %3019  ;;  %2107 = vst.msk [vmem:[%s3340_s28 + $0x170] sm:$0xf] %vm2014_vm2, %v2563_v6  ;;  %v2566_v12 = vpack.c.bf16 %v3018_v7, %v3018_v7  ;;  %v2717_v17 = vpop.f32.mrb[38].mxu0  ;;  %3045 = vtanh.f32 %v1263_v14 }
 0x13a   : > { %v3022_v15 = vpop.eup %3021  ;;  %2046 = vst.msk [vmem:[%s3340_s28 + $0x7c] sm:$0xf] %vm2014_vm2, %v2502_v8  ;;  %v2500_v16 = vpack.c.bf16 %v3020_v11, %v3020_v11  ;;  %v2781_v18 = vpop.f32.mrb[38].mxu1  ;;  %3047 = vtanh.f32 %v2717_v17 }
 0x13b   : > { %v3024_v19 = vpop.eup %3023  ;;  %2110 = vst.msk [vmem:[%s3340_s28 + $0x17c] sm:$0xf] %vm2014_vm2, %v2566_v12  ;;  %v2564_v20 = vpack.c.bf16 %v3022_v15, %v3022_v15  ;;  %v1010_v21 = vpop.f32.mrb[39].mxu0  ;;  %3049 = vtanh.f32 %v2781_v18 }
 0x13c   : > { %v1266_v22 = vpop.f32.mrb[39].mxu1  ;;  %v3026_v23 = vpop.eup %3025  ;;  %2044 = vst.msk [vmem:[%s3340_s28 + $0x74] sm:$0xf] %vm2014_vm2, %v2500_v16  ;;  %v2505_v24 = vpack.c.bf16 %v3024_v19, %v3024_v19  ;;  %3051 = vtanh.f32 %v1010_v21 }
 0x13d   : > { %v3028_v25 = vpop.eup %3027  ;;  %2108 = vst.msk [vmem:[%s3340_s28 + $0x174] sm:$0xf] %vm2014_vm2, %v2564_v20  ;;  %v2569_v26 = vpack.c.bf16 %v3026_v23, %v3026_v23  ;;  %3053 = vtanh.f32 %v1266_v22  ;;  %v2720_v33 = vpop.f32.mrb[40].mxu0 }
 0x13e   : > { %v3030_v27 = vpop.eup %3029  ;;  %2049 = vst.msk [vmem:[%s3340_s28 + $0x88] sm:$0xf] %vm2014_vm2, %v2505_v24  ;;  %v2503_v28 = vpack.c.bf16 %v3028_v25, %v3028_v25  ;;  %v2784_v34 = vpop.f32.mrb[40].mxu1  ;;  %3055 = vtanh.f32 %v2720_v33 }
 0x13f   : > { %v3032_v29 = vpop.eup %3031  ;;  %2113 = vst.msk [vmem:[%s3340_s28 + $0x188] sm:$0xf] %vm2014_vm2, %v2569_v26  ;;  %v2567_v30 = vpack.c.bf16 %v3030_v27, %v3030_v27  ;;  %v1023_v37 = vpop.f32.mrb[41].mxu0  ;;  %3057 = vtanh.f32 %v2784_v34 }
 0x140   : > { %v3034_v31 = vpop.eup %3033  ;;  %2047 = vst.msk [vmem:[%s3340_s28 + $0x80] sm:$0xf] %vm2014_vm2, %v2503_v28  ;;  %v2506_v32 = vpack.c.bf16 %v3032_v29, %v3032_v29  ;;  %v1279_v38 = vpop.f32.mrb[41].mxu1  ;;  %3059 = vtanh.f32 %v1023_v37 }
 0x141   : > { %v3036_v35 = vpop.eup %3035  ;;  %2111 = vst.msk [vmem:[%s3340_s28 + $0x180] sm:$0xf] %vm2014_vm2, %v2567_v30  ;;  %v2570_v36 = vpack.c.bf16 %v3034_v31, %v3034_v31  ;;  %v2721_v41 = vpop.f32.mrb[42].mxu0  ;;  %3061 = vtanh.f32 %v1279_v38 }
 0x142   : > { %v3038_v39 = vpop.eup %3037  ;;  %2050 = vst.msk [vmem:[%s3340_s28 + $0x8c] sm:$0xf] %vm2014_vm2, %v2506_v32  ;;  %v2504_v40 = vpack.c.bf16 %v3036_v35, %v3036_v35  ;;  %v2785_v42 = vpop.f32.mrb[42].mxu1  ;;  %3063 = vtanh.f32 %v2721_v41 }
 0x143   : > { %v3040_v43 = vpop.eup %3039  ;;  %2114 = vst.msk [vmem:[%s3340_s28 + $0x18c] sm:$0xf] %vm2014_vm2, %v2570_v36  ;;  %v2568_v44 = vpack.c.bf16 %v3038_v39, %v3038_v39  ;;  %v1026_v45 = vpop.f32.mrb[43].mxu0  ;;  %3065 = vtanh.f32 %v2785_v42 }
 0x144   : > { %v1282_v46 = vpop.f32.mrb[43].mxu1  ;;  %v3042_v47 = vpop.eup %3041  ;;  %2048 = vst.msk [vmem:[%s3340_s28 + $0x84] sm:$0xf] %vm2014_vm2, %v2504_v40  ;;  %v2509_v48 = vpack.c.bf16 %v3040_v43, %v3040_v43  ;;  %3067 = vtanh.f32 %v1026_v45 }
 0x145   : > { %v3044_v49 = vpop.eup %3043  ;;  %2112 = vst.msk [vmem:[%s3340_s28 + $0x184] sm:$0xf] %vm2014_vm2, %v2568_v44  ;;  %v2573_v50 = vpack.c.bf16 %v3042_v47, %v3042_v47  ;;  %3069 = vtanh.f32 %v1282_v46  ;;  %v2724_v57 = vpop.f32.mrb[44].mxu0 }
 0x146   : > { %v3046_v51 = vpop.eup %3045  ;;  %2053 = vst.msk [vmem:[%s3340_s28 + $0x98] sm:$0xf] %vm2014_vm2, %v2509_v48  ;;  %v2507_v52 = vpack.c.bf16 %v3044_v49, %v3044_v49  ;;  %v2788_v58 = vpop.f32.mrb[44].mxu1  ;;  %3071 = vtanh.f32 %v2724_v57 }
 0x147   : > { %v3048_v53 = vpop.eup %3047  ;;  %2117 = vst.msk [vmem:[%s3340_s28 + $0x198] sm:$0xf] %vm2014_vm2, %v2573_v50  ;;  %v2571_v54 = vpack.c.bf16 %v3046_v51, %v3046_v51  ;;  %v1039_v61 = vpop.f32.mrb[45].mxu0  ;;  %3073 = vtanh.f32 %v2788_v58 }
 0x148   : > { %v3050_v55 = vpop.eup %3049  ;;  %2051 = vst.msk [vmem:[%s3340_s28 + $0x90] sm:$0xf] %vm2014_vm2, %v2507_v52  ;;  %v2510_v56 = vpack.c.bf16 %v3048_v53, %v3048_v53  ;;  %v1295_v62 = vpop.f32.mrb[45].mxu1  ;;  %3075 = vtanh.f32 %v1039_v61 }
 0x149   : > { %v3052_v59 = vpop.eup %3051  ;;  %2115 = vst.msk [vmem:[%s3340_s28 + $0x190] sm:$0xf] %vm2014_vm2, %v2571_v54  ;;  %v2574_v60 = vpack.c.bf16 %v3050_v55, %v3050_v55  ;;  %v2725_v1 = vpop.f32.mrb[46].mxu0  ;;  %3077 = vtanh.f32 %v1295_v62 }
 0x14a   : > { %v3054_v63 = vpop.eup %3053  ;;  %2054 = vst.msk [vmem:[%s3340_s28 + $0x9c] sm:$0xf] %vm2014_vm2, %v2510_v56  ;;  %v2508_v0 = vpack.c.bf16 %v3052_v59, %v3052_v59  ;;  %v2789_v2 = vpop.f32.mrb[46].mxu1  ;;  %3079 = vtanh.f32 %v2725_v1 }
 0x14b   : > { %v3056_v3 = vpop.eup %3055  ;;  %2118 = vst.msk [vmem:[%s3340_s28 + $0x19c] sm:$0xf] %vm2014_vm2, %v2574_v60  ;;  %v2572_v4 = vpack.c.bf16 %v3054_v63, %v3054_v63  ;;  %v1042_v5 = vpop.f32.mrb[47].mxu0  ;;  %3081 = vtanh.f32 %v2789_v2 }
 0x14c   : > { %v1298_v6 = vpop.f32.mrb[47].mxu1  ;;  %v3058_v7 = vpop.eup %3057  ;;  %2052 = vst.msk [vmem:[%s3340_s28 + $0x94] sm:$0xf] %vm2014_vm2, %v2508_v0  ;;  %v2513_v8 = vpack.c.bf16 %v3056_v3, %v3056_v3  ;;  %3083 = vtanh.f32 %v1042_v5 }
 0x14d   : > { %v3060_v9 = vpop.eup %3059  ;;  %2116 = vst.msk [vmem:[%s3340_s28 + $0x194] sm:$0xf] %vm2014_vm2, %v2572_v4  ;;  %v2577_v10 = vpack.c.bf16 %v3058_v7, %v3058_v7  ;;  %3085 = vtanh.f32 %v1298_v6  ;;  %v2728_v17 = vpop.f32.mrb[48].mxu0 }
 0x14e   : > { %v3062_v11 = vpop.eup %3061  ;;  %2057 = vst.msk [vmem:[%s3340_s28 + $0xa8] sm:$0xf] %vm2014_vm2, %v2513_v8  ;;  %v2511_v12 = vpack.c.bf16 %v3060_v9, %v3060_v9  ;;  %v2792_v18 = vpop.f32.mrb[48].mxu1  ;;  %3087 = vtanh.f32 %v2728_v17 }
 0x14f   : > { %v3064_v13 = vpop.eup %3063  ;;  %2121 = vst.msk [vmem:[%s3340_s28 + $0x1a8] sm:$0xf] %vm2014_vm2, %v2577_v10  ;;  %v2575_v14 = vpack.c.bf16 %v3062_v11, %v3062_v11  ;;  %v1055_v21 = vpop.f32.mrb[49].mxu0  ;;  %3089 = vtanh.f32 %v2792_v18 }
 0x150   : > { %v3066_v15 = vpop.eup %3065  ;;  %2055 = vst.msk [vmem:[%s3340_s28 + $0xa0] sm:$0xf] %vm2014_vm2, %v2511_v12  ;;  %v2514_v16 = vpack.c.bf16 %v3064_v13, %v3064_v13  ;;  %v1311_v22 = vpop.f32.mrb[49].mxu1  ;;  %3091 = vtanh.f32 %v1055_v21 }
 0x151   : > { %v3068_v19 = vpop.eup %3067  ;;  %2119 = vst.msk [vmem:[%s3340_s28 + $0x1a0] sm:$0xf] %vm2014_vm2, %v2575_v14  ;;  %v2578_v20 = vpack.c.bf16 %v3066_v15, %v3066_v15  ;;  %v2729_v25 = vpop.f32.mrb[50].mxu0  ;;  %3093 = vtanh.f32 %v1311_v22 }
 0x152   : > { %v3070_v23 = vpop.eup %3069  ;;  %2058 = vst.msk [vmem:[%s3340_s28 + $0xac] sm:$0xf] %vm2014_vm2, %v2514_v16  ;;  %v2512_v24 = vpack.c.bf16 %v3068_v19, %v3068_v19  ;;  %v2793_v26 = vpop.f32.mrb[50].mxu1  ;;  %3095 = vtanh.f32 %v2729_v25 }
 0x153   : > { %v3072_v27 = vpop.eup %3071  ;;  %2122 = vst.msk [vmem:[%s3340_s28 + $0x1ac] sm:$0xf] %vm2014_vm2, %v2578_v20  ;;  %v2576_v28 = vpack.c.bf16 %v3070_v23, %v3070_v23  ;;  %v1058_v29 = vpop.f32.mrb[51].mxu0  ;;  %3097 = vtanh.f32 %v2793_v26 }
 0x154   : > { %v1314_v30 = vpop.f32.mrb[51].mxu1  ;;  %v3074_v31 = vpop.eup %3073  ;;  %2056 = vst.msk [vmem:[%s3340_s28 + $0xa4] sm:$0xf] %vm2014_vm2, %v2512_v24  ;;  %v2517_v32 = vpack.c.bf16 %v3072_v27, %v3072_v27  ;;  %3099 = vtanh.f32 %v1058_v29 }
 0x155   : > { %v3076_v33 = vpop.eup %3075  ;;  %2120 = vst.msk [vmem:[%s3340_s28 + $0x1a4] sm:$0xf] %vm2014_vm2, %v2576_v28  ;;  %v2581_v34 = vpack.c.bf16 %v3074_v31, %v3074_v31  ;;  %3101 = vtanh.f32 %v1314_v30  ;;  %v2732_v41 = vpop.f32.mrb[52].mxu0 }
 0x156   : > { %v3078_v35 = vpop.eup %3077  ;;  %2061 = vst.msk [vmem:[%s3340_s28 + $0xb8] sm:$0xf] %vm2014_vm2, %v2517_v32  ;;  %v2515_v36 = vpack.c.bf16 %v3076_v33, %v3076_v33  ;;  %v2796_v42 = vpop.f32.mrb[52].mxu1  ;;  %3103 = vtanh.f32 %v2732_v41 }
 0x157   : > { %v3080_v37 = vpop.eup %3079  ;;  %2125 = vst.msk [vmem:[%s3340_s28 + $0x1b8] sm:$0xf] %vm2014_vm2, %v2581_v34  ;;  %v2579_v38 = vpack.c.bf16 %v3078_v35, %v3078_v35  ;;  %v1071_v45 = vpop.f32.mrb[53].mxu0  ;;  %3105 = vtanh.f32 %v2796_v42 }
 0x158   : > { %v3082_v39 = vpop.eup %3081  ;;  %2059 = vst.msk [vmem:[%s3340_s28 + $0xb0] sm:$0xf] %vm2014_vm2, %v2515_v36  ;;  %v2518_v40 = vpack.c.bf16 %v3080_v37, %v3080_v37  ;;  %v1327_v46 = vpop.f32.mrb[53].mxu1  ;;  %3107 = vtanh.f32 %v1071_v45 }
 0x159   : > { %v3084_v43 = vpop.eup %3083  ;;  %2123 = vst.msk [vmem:[%s3340_s28 + $0x1b0] sm:$0xf] %vm2014_vm2, %v2579_v38  ;;  %v2582_v44 = vpack.c.bf16 %v3082_v39, %v3082_v39  ;;  %v2733_v49 = vpop.f32.mrb[54].mxu0  ;;  %3109 = vtanh.f32 %v1327_v46 }
 0x15a   : > { %v3086_v47 = vpop.eup %3085  ;;  %2062 = vst.msk [vmem:[%s3340_s28 + $0xbc] sm:$0xf] %vm2014_vm2, %v2518_v40  ;;  %v2516_v48 = vpack.c.bf16 %v3084_v43, %v3084_v43  ;;  %v2797_v50 = vpop.f32.mrb[54].mxu1  ;;  %3111 = vtanh.f32 %v2733_v49 }
 0x15b   : > { %v3088_v51 = vpop.eup %3087  ;;  %2126 = vst.msk [vmem:[%s3340_s28 + $0x1bc] sm:$0xf] %vm2014_vm2, %v2582_v44  ;;  %v2580_v52 = vpack.c.bf16 %v3086_v47, %v3086_v47  ;;  %v1074_v53 = vpop.f32.mrb[55].mxu0  ;;  %3113 = vtanh.f32 %v2797_v50 }
 0x15c   : > { %v1330_v54 = vpop.f32.mrb[55].mxu1  ;;  %v3090_v55 = vpop.eup %3089  ;;  %2060 = vst.msk [vmem:[%s3340_s28 + $0xb4] sm:$0xf] %vm2014_vm2, %v2516_v48  ;;  %v2521_v56 = vpack.c.bf16 %v3088_v51, %v3088_v51  ;;  %3115 = vtanh.f32 %v1074_v53 }
 0x15d   : > { %v3092_v57 = vpop.eup %3091  ;;  %2124 = vst.msk [vmem:[%s3340_s28 + $0x1b4] sm:$0xf] %vm2014_vm2, %v2580_v52  ;;  %v2585_v58 = vpack.c.bf16 %v3090_v55, %v3090_v55  ;;  %3117 = vtanh.f32 %v1330_v54  ;;  %v2736_v1 = vpop.f32.mrb[56].mxu0 }
 0x15e   : > { %v3094_v59 = vpop.eup %3093  ;;  %2065 = vst.msk [vmem:[%s3340_s28 + $0xc8] sm:$0xf] %vm2014_vm2, %v2521_v56  ;;  %v2519_v60 = vpack.c.bf16 %v3092_v57, %v3092_v57  ;;  %v2800_v2 = vpop.f32.mrb[56].mxu1  ;;  %3119 = vtanh.f32 %v2736_v1 }
 0x15f   : > { %v3096_v61 = vpop.eup %3095  ;;  %2129 = vst.msk [vmem:[%s3340_s28 + $0x1c8] sm:$0xf] %vm2014_vm2, %v2585_v58  ;;  %v2583_v62 = vpack.c.bf16 %v3094_v59, %v3094_v59  ;;  %v1087_v5 = vpop.f32.mrb[57].mxu0  ;;  %3121 = vtanh.f32 %v2800_v2 }
 0x160   : > { %v3098_v63 = vpop.eup %3097  ;;  %2063 = vst.msk [vmem:[%s3340_s28 + $0xc0] sm:$0xf] %vm2014_vm2, %v2519_v60  ;;  %v2522_v0 = vpack.c.bf16 %v3096_v61, %v3096_v61  ;;  %v1343_v6 = vpop.f32.mrb[57].mxu1  ;;  %3123 = vtanh.f32 %v1087_v5 }
 0x161   : > { %v3100_v3 = vpop.eup %3099  ;;  %2127 = vst.msk [vmem:[%s3340_s28 + $0x1c0] sm:$0xf] %vm2014_vm2, %v2583_v62  ;;  %v2586_v4 = vpack.c.bf16 %v3098_v63, %v3098_v63  ;;  %v2737_v9 = vpop.f32.mrb[58].mxu0  ;;  %3125 = vtanh.f32 %v1343_v6 }
 0x162   : > { %v3102_v7 = vpop.eup %3101  ;;  %2066 = vst.msk [vmem:[%s3340_s28 + $0xcc] sm:$0xf] %vm2014_vm2, %v2522_v0  ;;  %v2520_v8 = vpack.c.bf16 %v3100_v3, %v3100_v3  ;;  %v2801_v10 = vpop.f32.mrb[58].mxu1  ;;  %3127 = vtanh.f32 %v2737_v9 }
 0x163   : > { %v3104_v11 = vpop.eup %3103  ;;  %2130 = vst.msk [vmem:[%s3340_s28 + $0x1cc] sm:$0xf] %vm2014_vm2, %v2586_v4  ;;  %v2584_v12 = vpack.c.bf16 %v3102_v7, %v3102_v7  ;;  %v1090_v13 = vpop.f32.mrb[59].mxu0  ;;  %3129 = vtanh.f32 %v2801_v10 }
 0x164   : > { %v1346_v14 = vpop.f32.mrb[59].mxu1  ;;  %v3106_v15 = vpop.eup %3105  ;;  %2064 = vst.msk [vmem:[%s3340_s28 + $0xc4] sm:$0xf] %vm2014_vm2, %v2520_v8  ;;  %v2525_v16 = vpack.c.bf16 %v3104_v11, %v3104_v11  ;;  %3131 = vtanh.f32 %v1090_v13 }
 0x165   : > { %v3108_v17 = vpop.eup %3107  ;;  %2128 = vst.msk [vmem:[%s3340_s28 + $0x1c4] sm:$0xf] %vm2014_vm2, %v2584_v12  ;;  %v2589_v18 = vpack.c.bf16 %v3106_v15, %v3106_v15  ;;  %3133 = vtanh.f32 %v1346_v14  ;;  %v2740_v25 = vpop.f32.mrb[60].mxu0 }
 0x166   : > { %v3110_v19 = vpop.eup %3109  ;;  %2069 = vst.msk [vmem:[%s3340_s28 + $0xd8] sm:$0xf] %vm2014_vm2, %v2525_v16  ;;  %v2523_v20 = vpack.c.bf16 %v3108_v17, %v3108_v17  ;;  %v2804_v26 = vpop.f32.mrb[60].mxu1  ;;  %3135 = vtanh.f32 %v2740_v25 }
 0x167   : > { %v3112_v21 = vpop.eup %3111  ;;  %2133 = vst.msk [vmem:[%s3340_s28 + $0x1d8] sm:$0xf] %vm2014_vm2, %v2589_v18  ;;  %v2587_v22 = vpack.c.bf16 %v3110_v19, %v3110_v19  ;;  %v1103_v29 = vpop.f32.mrb[61].mxu0  ;;  %3137 = vtanh.f32 %v2804_v26 }
 0x168   : > { %v3114_v23 = vpop.eup %3113  ;;  %2067 = vst.msk [vmem:[%s3340_s28 + $0xd0] sm:$0xf] %vm2014_vm2, %v2523_v20  ;;  %v2526_v24 = vpack.c.bf16 %v3112_v21, %v3112_v21  ;;  %v1359_v30 = vpop.f32.mrb[61].mxu1  ;;  %3139 = vtanh.f32 %v1103_v29 }
 0x169   : > { %v3116_v27 = vpop.eup %3115  ;;  %2131 = vst.msk [vmem:[%s3340_s28 + $0x1d0] sm:$0xf] %vm2014_vm2, %v2587_v22  ;;  %v2590_v28 = vpack.c.bf16 %v3114_v23, %v3114_v23  ;;  %v2741_v33 = vpop.f32.mrb[62].mxu0  ;;  %3141 = vtanh.f32 %v1359_v30 }
 0x16a   : > { %v3118_v31 = vpop.eup %3117  ;;  %2070 = vst.msk [vmem:[%s3340_s28 + $0xdc] sm:$0xf] %vm2014_vm2, %v2526_v24  ;;  %v2524_v32 = vpack.c.bf16 %v3116_v27, %v3116_v27  ;;  %v2805_v34 = vpop.f32.mrb[62].mxu1  ;;  %3143 = vtanh.f32 %v2741_v33 }
 0x16b   : > { %v3120_v35 = vpop.eup %3119  ;;  %2134 = vst.msk [vmem:[%s3340_s28 + $0x1dc] sm:$0xf] %vm2014_vm2, %v2590_v28  ;;  %v2588_v36 = vpack.c.bf16 %v3118_v31, %v3118_v31  ;;  %v1106_v37 = vpop.f32.mrb[63].mxu0  ;;  %3145 = vtanh.f32 %v2805_v34 }
 0x16c   : > { %v1362_v38 = vpop.f32.mrb[63].mxu1  ;;  %v3122_v39 = vpop.eup %3121  ;;  %2068 = vst.msk [vmem:[%s3340_s28 + $0xd4] sm:$0xf] %vm2014_vm2, %v2524_v32  ;;  %v2529_v40 = vpack.c.bf16 %v3120_v35, %v3120_v35  ;;  %3147 = vtanh.f32 %v1106_v37 }
 0x16d   : > { %v3124_v41 = vpop.eup %3123  ;;  %2132 = vst.msk [vmem:[%s3340_s28 + $0x1d4] sm:$0xf] %vm2014_vm2, %v2588_v36  ;;  %v2593_v42 = vpack.c.bf16 %v3122_v39, %v3122_v39  ;;  %3149 = vtanh.f32 %v1362_v38 }
 0x16e   : > { %v3126_v43 = vpop.eup %3125  ;;  %2073 = vst.msk [vmem:[%s3340_s28 + $0xe8] sm:$0xf] %vm2014_vm2, %v2529_v40  ;;  %v2527_v44 = vpack.c.bf16 %v3124_v41, %v3124_v41 }
 0x16f   : > { %v3128_v45 = vpop.eup %3127  ;;  %2137 = vst.msk [vmem:[%s3340_s28 + $0x1e8] sm:$0xf] %vm2014_vm2, %v2593_v42  ;;  %v2591_v46 = vpack.c.bf16 %v3126_v43, %v3126_v43 }
 0x170   : > { %v3130_v47 = vpop.eup %3129  ;;  %2071 = vst.msk [vmem:[%s3340_s28 + $0xe0] sm:$0xf] %vm2014_vm2, %v2527_v44  ;;  %v2530_v48 = vpack.c.bf16 %v3128_v45, %v3128_v45 }
 0x171   : > { %v3132_v49 = vpop.eup %3131  ;;  %2135 = vst.msk [vmem:[%s3340_s28 + $0x1e0] sm:$0xf] %vm2014_vm2, %v2591_v46  ;;  %v2594_v50 = vpack.c.bf16 %v3130_v47, %v3130_v47 }
 0x172   : > { %v3134_v51 = vpop.eup %3133  ;;  %2074 = vst.msk [vmem:[%s3340_s28 + $0xec] sm:$0xf] %vm2014_vm2, %v2530_v48  ;;  %v2528_v52 = vpack.c.bf16 %v3132_v49, %v3132_v49 }
 0x173   : > { %v3136_v53 = vpop.eup %3135  ;;  %2138 = vst.msk [vmem:[%s3340_s28 + $0x1ec] sm:$0xf] %vm2014_vm2, %v2594_v50  ;;  %v2592_v54 = vpack.c.bf16 %v3134_v51, %v3134_v51 }
 0x174   : > { %v3138_v55 = vpop.eup %3137  ;;  %2072 = vst.msk [vmem:[%s3340_s28 + $0xe4] sm:$0xf] %vm2014_vm2, %v2528_v52  ;;  %v2533_v56 = vpack.c.bf16 %v3136_v53, %v3136_v53 }
 0x175   : > { %v3140_v57 = vpop.eup %3139  ;;  %2136 = vst.msk [vmem:[%s3340_s28 + $0x1e4] sm:$0xf] %vm2014_vm2, %v2592_v54  ;;  %v2597_v58 = vpack.c.bf16 %v3138_v55, %v3138_v55 }
 0x176   : > { %v3142_v59 = vpop.eup %3141  ;;  %2077 = vst.msk [vmem:[%s3340_s28 + $0xf8] sm:$0xf] %vm2014_vm2, %v2533_v56  ;;  %v2531_v60 = vpack.c.bf16 %v3140_v57, %v3140_v57 }
 0x177   : > { %v3144_v61 = vpop.eup %3143  ;;  %2141 = vst.msk [vmem:[%s3340_s28 + $0x1f8] sm:$0xf] %vm2014_vm2, %v2597_v58  ;;  %v2595_v62 = vpack.c.bf16 %v3142_v59, %v3142_v59 }
 0x178   : > { %v3146_v63 = vpop.eup %3145  ;;  %2075 = vst.msk [vmem:[%s3340_s28 + $0xf0] sm:$0xf] %vm2014_vm2, %v2531_v60  ;;  %v2534_v0 = vpack.c.bf16 %v3144_v61, %v3144_v61 }
 0x179   : > { %v3148_v1 = vpop.eup %3147  ;;  %2139 = vst.msk [vmem:[%s3340_s28 + $0x1f0] sm:$0xf] %vm2014_vm2, %v2595_v62  ;;  %v2598_v2 = vpack.c.bf16 %v3146_v63, %v3146_v63 }
 0x17a   : > { %v3150_v3 = vpop.eup %3149  ;;  %2078 = vst.msk [vmem:[%s3340_s28 + $0xfc] sm:$0xf] %vm2014_vm2, %v2534_v0  ;;  %v2532_v4 = vpack.c.bf16 %v3148_v1, %v3148_v1 }
 0x17b   : > { %2142 = vst.msk [vmem:[%s3340_s28 + $0x1fc] sm:$0xf] %vm2014_vm2, %v2598_v2  ;;  %v2596_v5 = vpack.c.bf16 %v3150_v3, %v3150_v3 }
 0x17c   : > { %2076 = vst.msk [vmem:[%s3340_s28 + $0xf4] sm:$0xf] %vm2014_vm2, %v2532_v4 }
 0x17d   : > { %2140 = vst.msk [vmem:[%s3340_s28 + $0x1f4] sm:$0xf] %vm2014_vm2, %v2596_v5 }
 0x17e PF: > { %s12_s9 = sadd.s32 1, %s3157_s9  }
 0x17f   : > { %p9_p4 = scmp.ge.s32.totalorder %s12_s9, 4  }
 0x181   :  { %11 = sbr.rel (!%p9_p4) target bundleno = 1 (0x1), region = 58 }

</bundles_post_ra>
